<compile_context>
chip_gen: v6e
topology: v6e:2x2x1
jax: 0.10.0
libtpu: 0.0.40
codegen_flags: <defaults>
</compile_context>

<pallas_src>
import jax
import jax.numpy as jnp
from jax.experimental import pallas as pl
from jax.experimental.pallas import tpu as pltpu

# ---- synthetic (small) model hyper-parameters -------------------------------
N_EMBED  = 32            # n_embed (transformer dim)
N_LAYER  = 2             # n_layer (Encoder depth)
N_HEADS  = 4             # attention heads (x-transformers default 8, scaled down)
DIM_HEAD = 8             # per-head dim (x-transformers default 64, scaled down)
FF_MULT  = 4             # feed-forward expansion (x-transformers default)
VOCAB    = 1000          # vocab_size (30522 in the real module, scaled down)
MAX_SEQ  = 8             # max_seq_len (77 in the real module, scaled down)
LN_EPS   = 1e-5
INNER    = N_HEADS * DIM_HEAD
FF_DIM   = FF_MULT * N_EMBED


def _layernorm(x, gamma, beta):
    mu = jnp.mean(x, axis=-1, keepdims=True)
    var = jnp.mean(jnp.square(x - mu), axis=-1, keepdims=True)
    return (x - mu) * jax.lax.rsqrt(var + LN_EPS) * gamma + beta


# ----------------------------- fused Pallas kernel ---------------------------
def bert_fused_kernel(tok_ref,                      # (B*S,) int32, SMEM scalar prefetch
                      tok_emb_ref, pos_ref,         # (V, D) f32, (S, D) f32
                      ln1_g_ref, ln1_b_ref,         # (L, D) f32
                      wq_ref, wk_ref, wv_ref,       # (L, H, D, Dh) bf16
                      wo_ref, bo_ref,               # (L, H, Dh, D) bf16, (L, D) f32
                      ln2_g_ref, ln2_b_ref,         # (L, D) f32
                      w1_ref, b1_ref,               # (L, D, F) bf16, (L, F) f32
                      w2_ref, b2_ref,               # (L, F, D) bf16, (L, D) f32
                      fin_g_ref, fin_b_ref,         # (1, D) f32
                      out_ref):                     # (B, S, D) f32
    n_tok = tok_ref.shape[0]
    s, d = pos_ref.shape
    b = n_tok // s
    n_layer, n_heads, _, dim_head = wq_ref.shape
    grp = b * n_heads                               # einsum batch size (B*H)
    vocab = tok_emb_ref.shape[0]
    scale = dim_head ** -0.5

    # ---- fused token-embedding gather: one-hot(ids) @ table on the MXU ------
    vocab_iota = jax.lax.broadcasted_iota(jnp.int32, (1, vocab), 1)       # (1, V)
    onehot = jnp.concatenate(
        [(vocab_iota == tok_ref[i]).astype(jnp.float32) for i in range(n_tok)],
        axis=0)                                                           # (B*S, V)
    x = jnp.dot(onehot, tok_emb_ref[...],
                preferred_element_type=jnp.float32)                       # (B*S, D)
    x = x.reshape(b, s, d) + pos_ref[...][None]                           # (B, S, D)
    # emb_dropout = 0.0 -> identity; project_emb = Identity (emb_dim == dim)

    def bcast_heads(t):                 # (B, S, D) -> (B*H, S, D), no relayout
        t = jnp.broadcast_to(t[:, None], (b, n_heads, s, d))
        return t.reshape(grp, s, d)

    def bcast_head_weight(w):           # (H, m, n) -> (B*H, m, n)
        return jnp.broadcast_to(w[None], (b,) + w.shape).reshape((grp,) + w.shape[1:])

    def bcast_batch(w):                 # (m, n) -> (B, m, n)
        return jnp.broadcast_to(w[None], (b,) + w.shape)

    for l in range(n_layer):            # static, unrolled layer loop
        # ------------- pre-norm multi-head self-attention + residual ---------
        xn = _layernorm(x, ln1_g_ref[l], ln1_b_ref[l]).astype(jnp.bfloat16)
        xg = bcast_heads(xn)                                              # (B*H, S, D)
        q = jnp.einsum('gsd,gdk->gsk', xg, bcast_head_weight(wq_ref[l]),
                       preferred_element_type=jnp.float32)                # (B*H, S, Dh)
        k = jnp.einsum('gsd,gdk->gsk', xg, bcast_head_weight(wk_ref[l]),
                       preferred_element_type=jnp.float32)
        v = jnp.einsum('gsd,gdk->gsk', xg, bcast_head_weight(wv_ref[l]),
                       preferred_element_type=jnp.float32)
        # TODO(synk): no attention/padding mask (the tokenizer path of the real
        # module would supply one); all positions attend to all positions.
        sc = jnp.einsum('gqd,gkd->gqk',
                        q.astype(jnp.bfloat16), k.astype(jnp.bfloat16),
                        preferred_element_type=jnp.float32) * scale       # (B*H, S, S)
        sc = sc - jnp.max(sc, axis=-1, keepdims=True)
        p = jnp.exp(sc)
        p = p * pl.reciprocal(jnp.sum(p, axis=-1, keepdims=True), approx=True)
        av = jnp.einsum('gqk,gkd->gqd',
                        p.astype(jnp.bfloat16), v.astype(jnp.bfloat16),
                        preferred_element_type=jnp.float32)               # (B*H, S, Dh)
        # output projection: sum_h av_h @ Wo_h  ==  concat(heads) @ Wo
        yg = jnp.einsum('gsk,gkd->gsd',
                        av.astype(jnp.bfloat16), bcast_head_weight(wo_ref[l]),
                        preferred_element_type=jnp.float32)               # (B*H, S, D)
        y = jnp.sum(yg.reshape(b, n_heads, s, d), axis=1) + bo_ref[l]     # (B, S, D)
        x = x + y

        # ------------------- pre-norm feed-forward + residual ----------------
        xn = _layernorm(x, ln2_g_ref[l], ln2_b_ref[l]).astype(jnp.bfloat16)
        h = jnp.einsum('bsd,bdf->bsf', xn, bcast_batch(w1_ref[l]),
                       preferred_element_type=jnp.float32) + b1_ref[l]    # (B, S, F)
        # TODO(synk): torch nn.GELU() default is exact erf; tanh approximation
        # used here for guaranteed EUP lowering of the transcendental.
        h = jax.nn.gelu(h, approximate=True).astype(jnp.bfloat16)
        y = jnp.einsum('bsf,bfd->bsd', h, bcast_batch(w2_ref[l]),
                       preferred_element_type=jnp.float32) + b2_ref[l]    # (B, S, D)
        x = x + y

    # ------------------------------ final LayerNorm --------------------------
    out_ref[...] = _layernorm(x, fin_g_ref[0], fin_b_ref[0])


# ----------------------------- pallas_call wrapper ---------------------------
def bert_embedder_forward(tokens, params):
    """tokens: (B, S) int32 token ids -> embeddings (B, S, N_EMBED) float32."""
    B, S = tokens.shape
    D = N_EMBED
    assert S <= MAX_SEQ
    tok_flat = tokens.reshape(B * S).astype(jnp.int32)
    pos = params['pos_emb'][:S]

    def _full(shape):
        nd = len(shape)
        return pl.BlockSpec(shape, lambda i, tok: (0,) * nd)

    in_specs = [
        _full((VOCAB, D)),                               # tok_emb
        _full((S, D)),                                   # pos_emb (first S rows)
        _full((N_LAYER, D)), _full((N_LAYER, D)),        # ln1_g, ln1_b
        _full((N_LAYER, N_HEADS, D, DIM_HEAD)),          # wq
        _full((N_LAYER, N_HEADS, D, DIM_HEAD)),          # wk
        _full((N_LAYER, N_HEADS, D, DIM_HEAD)),          # wv
        _full((N_LAYER, N_HEADS, DIM_HEAD, D)),          # wo
        _full((N_LAYER, D)),                             # bo
        _full((N_LAYER, D)), _full((N_LAYER, D)),        # ln2_g, ln2_b
        _full((N_LAYER, D, FF_DIM)),                     # w1
        _full((N_LAYER, FF_DIM)),                        # b1
        _full((N_LAYER, FF_DIM, D)),                     # w2
        _full((N_LAYER, D)),                             # b2
        _full((1, D)), _full((1, D)),                    # final_g, final_b
    ]

    # advisory cost estimate for the XLA scheduler
    flops = (2 * N_LAYER * B * S * (3 * D * INNER + 2 * S * INNER
                                    + INNER * D + 2 * D * FF_DIM)
             + 2 * B * S * VOCAB * D)
    transcendentals = N_LAYER * (B * N_HEADS * S * S + B * S * FF_DIM) + 4 * B * S
    bytes_accessed = (4 * VOCAB * D + 4 * B * S * D
                      + 2 * N_LAYER * (4 * D * INNER + 2 * D * FF_DIM)
                      + 4 * (4 * N_LAYER + 2) * D + 4 * N_LAYER * FF_DIM)

    out = pl.pallas_call(
        bert_fused_kernel,
        out_shape=jax.ShapeDtypeStruct((B, S, D), jnp.float32),
        grid_spec=pltpu.PrefetchScalarGridSpec(
            num_scalar_prefetch=1,
            grid=(1,),
            in_specs=in_specs,
            out_specs=pl.BlockSpec((B, S, D), lambda i, tok: (0, 0, 0)),
        ),
        # NOTE: one grid step keeps the whole forward in a single launch.  On
        # v7x (2 TensorCores) a size-2 "parallel" batch axis would engage the
        # second core, but at these shapes launch/fusion overhead dominates.
        compiler_params=pltpu.CompilerParams(dimension_semantics=("arbitrary",)),
        cost_estimate=pl.CostEstimate(flops=flops,
                                      transcendentals=transcendentals,
                                      bytes_accessed=bytes_accessed),
    )(tok_flat,
      params['tok_emb'], pos,
      params['ln1_g'], params['ln1_b'],
      params['wq'], params['wk'], params['wv'], params['wo'], params['bo'],
      params['ln2_g'], params['ln2_b'],
      params['w1'], params['b1'], params['w2'], params['b2'],
      params['final_g'], params['final_b'])
    return out                                           # return_embeddings=True


# ----------------------------- parameter init --------------------------------
def init_params(key):
    def nrm(k, shape, std, dtype=jnp.float32):
        return (std * jax.random.normal(k, shape, dtype=jnp.float32)).astype(dtype)

    keys = jax.random.split(key, 8)
    return {
        'tok_emb': nrm(keys[0], (VOCAB, N_EMBED), 0.02),
        'pos_emb': nrm(keys[1], (MAX_SEQ, N_EMBED), 0.02),
        # Per-layer weights are stacked on a leading layer axis.  Q/K/V/O are
        # stored head-major (L, H, D, Dh) / (L, H, Dh, D) so the kernel can
        # batch heads without any in-kernel relayout.  Matmul weights in bf16.
        'ln1_g': jnp.ones((N_LAYER, N_EMBED), jnp.float32),
        'ln1_b': jnp.zeros((N_LAYER, N_EMBED), jnp.float32),
        'wq': nrm(keys[2], (N_LAYER, N_HEADS, N_EMBED, DIM_HEAD), 0.05, jnp.bfloat16),
        'wk': nrm(keys[3], (N_LAYER, N_HEADS, N_EMBED, DIM_HEAD), 0.05, jnp.bfloat16),
        'wv': nrm(keys[4], (N_LAYER, N_HEADS, N_EMBED, DIM_HEAD), 0.05, jnp.bfloat16),
        'wo': nrm(keys[5], (N_LAYER, N_HEADS, DIM_HEAD, N_EMBED), 0.05, jnp.bfloat16),
        'bo': jnp.zeros((N_LAYER, N_EMBED), jnp.float32),
        'ln2_g': jnp.ones((N_LAYER, N_EMBED), jnp.float32),
        'ln2_b': jnp.zeros((N_LAYER, N_EMBED), jnp.float32),
        'w1': nrm(keys[6], (N_LAYER, N_EMBED, FF_DIM), 0.05, jnp.bfloat16),
        'b1': jnp.zeros((N_LAYER, FF_DIM), jnp.float32),
        'w2': nrm(keys[7], (N_LAYER, FF_DIM, N_EMBED), 0.05, jnp.bfloat16),
        'b2': jnp.zeros((N_LAYER, N_EMBED), jnp.float32),
        'final_g': jnp.ones((1, N_EMBED), jnp.float32),
        'final_b': jnp.zeros((1, N_EMBED), jnp.float32),
    }


if __name__ == "__main__":
    key = jax.random.PRNGKey(0)
    pkey, tkey = jax.random.split(key)
    params = init_params(pkey)
    tokens = jax.random.randint(tkey, (2, MAX_SEQ), 0, VOCAB, dtype=jnp.int32)
    z = bert_embedder_forward(tokens, params)
    z = jax.block_until_ready(z)
    assert z.shape == (2, MAX_SEQ, N_EMBED) and z.dtype == jnp.float32
    print("KERNEL_OK")
</pallas_src>

<mosaic_0001>
module attributes {stable_mosaic.version = 11 : i64} {
  func.func @bert_fused_kernel(%arg0: i32, %arg1: memref<16xi32, #tpu.memory_space<smem>>, %arg2: memref<1000x32xf32, #tpu.memory_space<vmem>>, %arg3: memref<8x32xf32, #tpu.memory_space<vmem>>, %arg4: memref<2x32xf32, #tpu.memory_space<vmem>>, %arg5: memref<2x32xf32, #tpu.memory_space<vmem>>, %arg6: memref<2x4x32x8xbf16, #tpu.memory_space<vmem>>, %arg7: memref<2x4x32x8xbf16, #tpu.memory_space<vmem>>, %arg8: memref<2x4x32x8xbf16, #tpu.memory_space<vmem>>, %arg9: memref<2x4x8x32xbf16, #tpu.memory_space<vmem>>, %arg10: memref<2x32xf32, #tpu.memory_space<vmem>>, %arg11: memref<2x32xf32, #tpu.memory_space<vmem>>, %arg12: memref<2x32xf32, #tpu.memory_space<vmem>>, %arg13: memref<2x32x128xbf16, #tpu.memory_space<vmem>>, %arg14: memref<2x128xf32, #tpu.memory_space<vmem>>, %arg15: memref<2x128x32xbf16, #tpu.memory_space<vmem>>, %arg16: memref<2x32xf32, #tpu.memory_space<vmem>>, %arg17: memref<1x32xf32, #tpu.memory_space<vmem>>, %arg18: memref<1x32xf32, #tpu.memory_space<vmem>>, %arg19: memref<2x8x32xf32, #tpu.memory_space<vmem>>) attributes {dimension_semantics = [#tpu.dimension_semantics<arbitrary>], iteration_bounds = array<i64: 1>, scalar_prefetch = 1 : i64, scratch_operands = 0 : i64, tpu.core_type = #tpu.core_type<tc>, window_params = [{pipeline_mode = #tpu.pipeline_mode<synchronous>, transform_indices = @transform_0, window_bounds = array<i64: 1000, 32>}, {pipeline_mode = #tpu.pipeline_mode<synchronous>, transform_indices = @transform_1, window_bounds = array<i64: 8, 32>}, {pipeline_mode = #tpu.pipeline_mode<synchronous>, transform_indices = @transform_2, window_bounds = array<i64: 2, 32>}, {pipeline_mode = #tpu.pipeline_mode<synchronous>, transform_indices = @transform_3, window_bounds = array<i64: 2, 32>}, {pipeline_mode = #tpu.pipeline_mode<synchronous>, transform_indices = @transform_4, window_bounds = array<i64: 2, 4, 32, 8>}, {pipeline_mode = #tpu.pipeline_mode<synchronous>, transform_indices = @transform_5, window_bounds = array<i64: 2, 4, 32, 8>}, {pipeline_mode = #tpu.pipeline_mode<synchronous>, transform_indices = @transform_6, window_bounds = array<i64: 2, 4, 32, 8>}, {pipeline_mode = #tpu.pipeline_mode<synchronous>, transform_indices = @transform_7, window_bounds = array<i64: 2, 4, 8, 32>}, {pipeline_mode = #tpu.pipeline_mode<synchronous>, transform_indices = @transform_8, window_bounds = array<i64: 2, 32>}, {pipeline_mode = #tpu.pipeline_mode<synchronous>, transform_indices = @transform_9, window_bounds = array<i64: 2, 32>}, {pipeline_mode = #tpu.pipeline_mode<synchronous>, transform_indices = @transform_10, window_bounds = array<i64: 2, 32>}, {pipeline_mode = #tpu.pipeline_mode<synchronous>, transform_indices = @transform_11, window_bounds = array<i64: 2, 32, 128>}, {pipeline_mode = #tpu.pipeline_mode<synchronous>, transform_indices = @transform_12, window_bounds = array<i64: 2, 128>}, {pipeline_mode = #tpu.pipeline_mode<synchronous>, transform_indices = @transform_13, window_bounds = array<i64: 2, 128, 32>}, {pipeline_mode = #tpu.pipeline_mode<synchronous>, transform_indices = @transform_14, window_bounds = array<i64: 2, 32>}, {pipeline_mode = #tpu.pipeline_mode<synchronous>, transform_indices = @transform_15, window_bounds = array<i64: 1, 32>}, {pipeline_mode = #tpu.pipeline_mode<synchronous>, transform_indices = @transform_16, window_bounds = array<i64: 1, 32>}, {pipeline_mode = #tpu.pipeline_mode<synchronous>, transform_indices = @transform_17, window_bounds = array<i64: 2, 8, 32>}]} {
    %0 = tpu.iota {dimensions = array<i32: 1>} : vector<1x1000xi32>
    %c0 = arith.constant 0 : index
    %1 = memref.load %arg1[%c0] : memref<16xi32, #tpu.memory_space<smem>>
    %2 = vector.broadcast %1 : i32 to vector<1x1000xi32>
    %3 = arith.cmpi eq, %0, %2 : vector<1x1000xi32>
    %4 = arith.extui %3 : vector<1x1000xi1> to vector<1x1000xi32>
    %5 = arith.sitofp %4 : vector<1x1000xi32> to vector<1x1000xf32>
    %c1 = arith.constant 1 : index
    %6 = memref.load %arg1[%c1] : memref<16xi32, #tpu.memory_space<smem>>
    %7 = vector.broadcast %6 : i32 to vector<1x1000xi32>
    %8 = arith.cmpi eq, %0, %7 : vector<1x1000xi32>
    %9 = arith.extui %8 : vector<1x1000xi1> to vector<1x1000xi32>
    %10 = arith.sitofp %9 : vector<1x1000xi32> to vector<1x1000xf32>
    %c2 = arith.constant 2 : index
    %11 = memref.load %arg1[%c2] : memref<16xi32, #tpu.memory_space<smem>>
    %12 = vector.broadcast %11 : i32 to vector<1x1000xi32>
    %13 = arith.cmpi eq, %0, %12 : vector<1x1000xi32>
    %14 = arith.extui %13 : vector<1x1000xi1> to vector<1x1000xi32>
    %15 = arith.sitofp %14 : vector<1x1000xi32> to vector<1x1000xf32>
    %c3 = arith.constant 3 : index
    %16 = memref.load %arg1[%c3] : memref<16xi32, #tpu.memory_space<smem>>
    %17 = vector.broadcast %16 : i32 to vector<1x1000xi32>
    %18 = arith.cmpi eq, %0, %17 : vector<1x1000xi32>
    %19 = arith.extui %18 : vector<1x1000xi1> to vector<1x1000xi32>
    %20 = arith.sitofp %19 : vector<1x1000xi32> to vector<1x1000xf32>
    %c4 = arith.constant 4 : index
    %21 = memref.load %arg1[%c4] : memref<16xi32, #tpu.memory_space<smem>>
    %22 = vector.broadcast %21 : i32 to vector<1x1000xi32>
    %23 = arith.cmpi eq, %0, %22 : vector<1x1000xi32>
    %24 = arith.extui %23 : vector<1x1000xi1> to vector<1x1000xi32>
    %25 = arith.sitofp %24 : vector<1x1000xi32> to vector<1x1000xf32>
    %c5 = arith.constant 5 : index
    %26 = memref.load %arg1[%c5] : memref<16xi32, #tpu.memory_space<smem>>
    %27 = vector.broadcast %26 : i32 to vector<1x1000xi32>
    %28 = arith.cmpi eq, %0, %27 : vector<1x1000xi32>
    %29 = arith.extui %28 : vector<1x1000xi1> to vector<1x1000xi32>
    %30 = arith.sitofp %29 : vector<1x1000xi32> to vector<1x1000xf32>
    %c6 = arith.constant 6 : index
    %31 = memref.load %arg1[%c6] : memref<16xi32, #tpu.memory_space<smem>>
    %32 = vector.broadcast %31 : i32 to vector<1x1000xi32>
    %33 = arith.cmpi eq, %0, %32 : vector<1x1000xi32>
    %34 = arith.extui %33 : vector<1x1000xi1> to vector<1x1000xi32>
    %35 = arith.sitofp %34 : vector<1x1000xi32> to vector<1x1000xf32>
    %c7 = arith.constant 7 : index
    %36 = memref.load %arg1[%c7] : memref<16xi32, #tpu.memory_space<smem>>
    %37 = vector.broadcast %36 : i32 to vector<1x1000xi32>
    %38 = arith.cmpi eq, %0, %37 : vector<1x1000xi32>
    %39 = arith.extui %38 : vector<1x1000xi1> to vector<1x1000xi32>
    %40 = arith.sitofp %39 : vector<1x1000xi32> to vector<1x1000xf32>
    %c8 = arith.constant 8 : index
    %41 = memref.load %arg1[%c8] : memref<16xi32, #tpu.memory_space<smem>>
    %42 = vector.broadcast %41 : i32 to vector<1x1000xi32>
    %43 = arith.cmpi eq, %0, %42 : vector<1x1000xi32>
    %44 = arith.extui %43 : vector<1x1000xi1> to vector<1x1000xi32>
    %45 = arith.sitofp %44 : vector<1x1000xi32> to vector<1x1000xf32>
    %c9 = arith.constant 9 : index
    %46 = memref.load %arg1[%c9] : memref<16xi32, #tpu.memory_space<smem>>
    %47 = vector.broadcast %46 : i32 to vector<1x1000xi32>
    %48 = arith.cmpi eq, %0, %47 : vector<1x1000xi32>
    %49 = arith.extui %48 : vector<1x1000xi1> to vector<1x1000xi32>
    %50 = arith.sitofp %49 : vector<1x1000xi32> to vector<1x1000xf32>
    %c10 = arith.constant 10 : index
    %51 = memref.load %arg1[%c10] : memref<16xi32, #tpu.memory_space<smem>>
    %52 = vector.broadcast %51 : i32 to vector<1x1000xi32>
    %53 = arith.cmpi eq, %0, %52 : vector<1x1000xi32>
    %54 = arith.extui %53 : vector<1x1000xi1> to vector<1x1000xi32>
    %55 = arith.sitofp %54 : vector<1x1000xi32> to vector<1x1000xf32>
    %c11 = arith.constant 11 : index
    %56 = memref.load %arg1[%c11] : memref<16xi32, #tpu.memory_space<smem>>
    %57 = vector.broadcast %56 : i32 to vector<1x1000xi32>
    %58 = arith.cmpi eq, %0, %57 : vector<1x1000xi32>
    %59 = arith.extui %58 : vector<1x1000xi1> to vector<1x1000xi32>
    %60 = arith.sitofp %59 : vector<1x1000xi32> to vector<1x1000xf32>
    %c12 = arith.constant 12 : index
    %61 = memref.load %arg1[%c12] : memref<16xi32, #tpu.memory_space<smem>>
    %62 = vector.broadcast %61 : i32 to vector<1x1000xi32>
    %63 = arith.cmpi eq, %0, %62 : vector<1x1000xi32>
    %64 = arith.extui %63 : vector<1x1000xi1> to vector<1x1000xi32>
    %65 = arith.sitofp %64 : vector<1x1000xi32> to vector<1x1000xf32>
    %c13 = arith.constant 13 : index
    %66 = memref.load %arg1[%c13] : memref<16xi32, #tpu.memory_space<smem>>
    %67 = vector.broadcast %66 : i32 to vector<1x1000xi32>
    %68 = arith.cmpi eq, %0, %67 : vector<1x1000xi32>
    %69 = arith.extui %68 : vector<1x1000xi1> to vector<1x1000xi32>
    %70 = arith.sitofp %69 : vector<1x1000xi32> to vector<1x1000xf32>
    %c14 = arith.constant 14 : index
    %71 = memref.load %arg1[%c14] : memref<16xi32, #tpu.memory_space<smem>>
    %72 = vector.broadcast %71 : i32 to vector<1x1000xi32>
    %73 = arith.cmpi eq, %0, %72 : vector<1x1000xi32>
    %74 = arith.extui %73 : vector<1x1000xi1> to vector<1x1000xi32>
    %75 = arith.sitofp %74 : vector<1x1000xi32> to vector<1x1000xf32>
    %c15 = arith.constant 15 : index
    %76 = memref.load %arg1[%c15] : memref<16xi32, #tpu.memory_space<smem>>
    %77 = vector.broadcast %76 : i32 to vector<1x1000xi32>
    %78 = arith.cmpi eq, %0, %77 : vector<1x1000xi32>
    %79 = arith.extui %78 : vector<1x1000xi1> to vector<1x1000xi32>
    %80 = arith.sitofp %79 : vector<1x1000xi32> to vector<1x1000xf32>
    %81 = tpu.concatenate %5, %10, %15, %20, %25, %30, %35, %40, %45, %50, %55, %60, %65, %70, %75, %80 in 0 : vector<1x1000xf32>, vector<1x1000xf32>, vector<1x1000xf32>, vector<1x1000xf32>, vector<1x1000xf32>, vector<1x1000xf32>, vector<1x1000xf32>, vector<1x1000xf32>, vector<1x1000xf32>, vector<1x1000xf32>, vector<1x1000xf32>, vector<1x1000xf32>, vector<1x1000xf32>, vector<1x1000xf32>, vector<1x1000xf32>, vector<1x1000xf32> -> vector<16x1000xf32>
    %c0_0 = arith.constant 0 : index
    %c0_1 = arith.constant 0 : index
    %82 = vector.load %arg2[%c0_0, %c0_1] : memref<1000x32xf32, #tpu.memory_space<vmem>>, vector<1000x32xf32>
    %cst = arith.constant dense<0.000000e+00> : vector<16x32xf32>
    %83 = tpu.matmul %81, %82, %cst {dimension_numbers = #tpu.dot_dimension_numbers<[1], [0], [0], [1], [0, 0, 1, 1], [], []>} : vector<16x1000xf32>, vector<1000x32xf32>, vector<16x32xf32> -> vector<16x32xf32>
    %84 = vector.shape_cast %83 : vector<16x32xf32> to vector<2x8x32xf32>
    %c0_2 = arith.constant 0 : index
    %c0_3 = arith.constant 0 : index
    %85 = vector.load %arg3[%c0_2, %c0_3] : memref<8x32xf32, #tpu.memory_space<vmem>>, vector<8x32xf32>
    %86 = vector.shape_cast %85 : vector<8x32xf32> to vector<1x8x32xf32>
    %87 = vector.broadcast %86 : vector<1x8x32xf32> to vector<2x8x32xf32>
    %88 = arith.addf %84, %87 : vector<2x8x32xf32>
    %c0_4 = arith.constant 0 : index
    %c0_5 = arith.constant 0 : index
    %89 = vector.load %arg4[%c0_4, %c0_5] : memref<2x32xf32, #tpu.memory_space<vmem>>, vector<1x32xf32>
    %90 = vector.shape_cast %89 : vector<1x32xf32> to vector<32xf32>
    %c0_6 = arith.constant 0 : index
    %c0_7 = arith.constant 0 : index
    %91 = vector.load %arg5[%c0_6, %c0_7] : memref<2x32xf32, #tpu.memory_space<vmem>>, vector<1x32xf32>
    %92 = vector.shape_cast %91 : vector<1x32xf32> to vector<32xf32>
    %cst_8 = arith.constant dense<0.000000e+00> : vector<2x8xf32>
    %93 = vector.multi_reduction <add>, %88, %cst_8 [2] : vector<2x8x32xf32> to vector<2x8xf32>
    %94 = vector.shape_cast %93 : vector<2x8xf32> to vector<2x8x1xf32>
    %cst_9 = arith.constant 3.200000e+01 : f32
    %95 = vector.broadcast %cst_9 : f32 to vector<2x8x1xf32>
    %96 = arith.divf %94, %95 : vector<2x8x1xf32>
    %97 = vector.broadcast %96 : vector<2x8x1xf32> to vector<2x8x32xf32>
    %98 = arith.subf %88, %97 : vector<2x8x32xf32>
    %99 = arith.mulf %98, %98 : vector<2x8x32xf32>
    %cst_10 = arith.constant dense<0.000000e+00> : vector<2x8xf32>
    %100 = vector.multi_reduction <add>, %99, %cst_10 [2] : vector<2x8x32xf32> to vector<2x8xf32>
    %101 = vector.shape_cast %100 : vector<2x8xf32> to vector<2x8x1xf32>
    %cst_11 = arith.constant 3.200000e+01 : f32
    %102 = vector.broadcast %cst_11 : f32 to vector<2x8x1xf32>
    %103 = arith.divf %101, %102 : vector<2x8x1xf32>
    %104 = vector.broadcast %96 : vector<2x8x1xf32> to vector<2x8x32xf32>
    %105 = arith.subf %88, %104 : vector<2x8x32xf32>
    %cst_12 = arith.constant 9.99999974E-6 : f32
    %106 = vector.broadcast %cst_12 : f32 to vector<2x8x1xf32>
    %107 = arith.addf %103, %106 : vector<2x8x1xf32>
    %108 = math.rsqrt %107 : vector<2x8x1xf32>
    %109 = vector.broadcast %108 : vector<2x8x1xf32> to vector<2x8x32xf32>
    %110 = arith.mulf %105, %109 : vector<2x8x32xf32>
    %111 = vector.shape_cast %90 : vector<32xf32> to vector<1x1x32xf32>
    %112 = vector.broadcast %111 : vector<1x1x32xf32> to vector<2x8x32xf32>
    %113 = arith.mulf %110, %112 : vector<2x8x32xf32>
    %114 = vector.shape_cast %92 : vector<32xf32> to vector<1x1x32xf32>
    %115 = vector.broadcast %114 : vector<1x1x32xf32> to vector<2x8x32xf32>
    %116 = arith.addf %113, %115 : vector<2x8x32xf32>
    %117 = arith.truncf %116 : vector<2x8x32xf32> to vector<2x8x32xbf16>
    %118 = vector.shape_cast %117 : vector<2x8x32xbf16> to vector<2x1x8x32xbf16>
    %119 = vector.shape_cast %118 : vector<2x1x8x32xbf16> to vector<2x1x8x32xbf16>
    %120 = vector.broadcast %119 : vector<2x1x8x32xbf16> to vector<2x4x8x32xbf16>
    %121 = vector.shape_cast %120 : vector<2x4x8x32xbf16> to vector<8x8x32xbf16>
    %c0_13 = arith.constant 0 : index
    %c0_14 = arith.constant 0 : index
    %c0_15 = arith.constant 0 : index
    %c0_16 = arith.constant 0 : index
    %122 = vector.load %arg6[%c0_13, %c0_14, %c0_15, %c0_16] : memref<2x4x32x8xbf16, #tpu.memory_space<vmem>>, vector<1x4x32x8xbf16>
    %123 = vector.shape_cast %122 : vector<1x4x32x8xbf16> to vector<4x32x8xbf16>
    %124 = vector.shape_cast %123 : vector<4x32x8xbf16> to vector<1x4x32x8xbf16>
    %125 = vector.shape_cast %124 : vector<1x4x32x8xbf16> to vector<1x4x32x8xbf16>
    %126 = vector.broadcast %125 : vector<1x4x32x8xbf16> to vector<2x4x32x8xbf16>
    %127 = vector.shape_cast %126 : vector<2x4x32x8xbf16> to vector<8x32x8xbf16>
    "tpu.trace_start"() <{level = 10 : i32, message = "gsd,gdk->gsk"}> : () -> ()
    %cst_17 = arith.constant dense<0.000000e+00> : vector<8x8x8xf32>
    %128 = tpu.matmul %121, %127, %cst_17 {dimension_numbers = #tpu.dot_dimension_numbers<[2], [1], [1], [2], [0, 0, 0, 1, 1, 2], [0], [0]>} : vector<8x8x32xbf16>, vector<8x32x8xbf16>, vector<8x8x8xf32> -> vector<8x8x8xf32>
    "tpu.trace_stop"() : () -> ()
    %c0_18 = arith.constant 0 : index
    %c0_19 = arith.constant 0 : index
    %c0_20 = arith.constant 0 : index
    %c0_21 = arith.constant 0 : index
    %129 = vector.load %arg7[%c0_18, %c0_19, %c0_20, %c0_21] : memref<2x4x32x8xbf16, #tpu.memory_space<vmem>>, vector<1x4x32x8xbf16>
    %130 = vector.shape_cast %129 : vector<1x4x32x8xbf16> to vector<4x32x8xbf16>
    %131 = vector.shape_cast %130 : vector<4x32x8xbf16> to vector<1x4x32x8xbf16>
    %132 = vector.shape_cast %131 : vector<1x4x32x8xbf16> to vector<1x4x32x8xbf16>
    %133 = vector.broadcast %132 : vector<1x4x32x8xbf16> to vector<2x4x32x8xbf16>
    %134 = vector.shape_cast %133 : vector<2x4x32x8xbf16> to vector<8x32x8xbf16>
    "tpu.trace_start"() <{level = 10 : i32, message = "gsd,gdk->gsk"}> : () -> ()
    %cst_22 = arith.constant dense<0.000000e+00> : vector<8x8x8xf32>
    %135 = tpu.matmul %121, %134, %cst_22 {dimension_numbers = #tpu.dot_dimension_numbers<[2], [1], [1], [2], [0, 0, 0, 1, 1, 2], [0], [0]>} : vector<8x8x32xbf16>, vector<8x32x8xbf16>, vector<8x8x8xf32> -> vector<8x8x8xf32>
    "tpu.trace_stop"() : () -> ()
    %c0_23 = arith.constant 0 : index
    %c0_24 = arith.constant 0 : index
    %c0_25 = arith.constant 0 : index
    %c0_26 = arith.constant 0 : index
    %136 = vector.load %arg8[%c0_23, %c0_24, %c0_25, %c0_26] : memref<2x4x32x8xbf16, #tpu.memory_space<vmem>>, vector<1x4x32x8xbf16>
    %137 = vector.shape_cast %136 : vector<1x4x32x8xbf16> to vector<4x32x8xbf16>
    %138 = vector.shape_cast %137 : vector<4x32x8xbf16> to vector<1x4x32x8xbf16>
    %139 = vector.shape_cast %138 : vector<1x4x32x8xbf16> to vector<1x4x32x8xbf16>
    %140 = vector.broadcast %139 : vector<1x4x32x8xbf16> to vector<2x4x32x8xbf16>
    %141 = vector.shape_cast %140 : vector<2x4x32x8xbf16> to vector<8x32x8xbf16>
    "tpu.trace_start"() <{level = 10 : i32, message = "gsd,gdk->gsk"}> : () -> ()
    %cst_27 = arith.constant dense<0.000000e+00> : vector<8x8x8xf32>
    %142 = tpu.matmul %121, %141, %cst_27 {dimension_numbers = #tpu.dot_dimension_numbers<[2], [1], [1], [2], [0, 0, 0, 1, 1, 2], [0], [0]>} : vector<8x8x32xbf16>, vector<8x32x8xbf16>, vector<8x8x8xf32> -> vector<8x8x8xf32>
    "tpu.trace_stop"() : () -> ()
    %143 = arith.truncf %128 : vector<8x8x8xf32> to vector<8x8x8xbf16>
    %144 = arith.truncf %135 : vector<8x8x8xf32> to vector<8x8x8xbf16>
    "tpu.trace_start"() <{level = 10 : i32, message = "gqd,gkd->gqk"}> : () -> ()
    %cst_28 = arith.constant dense<0.000000e+00> : vector<8x8x8xf32>
    %145 = tpu.matmul %143, %144, %cst_28 {dimension_numbers = #tpu.dot_dimension_numbers<[2], [2], [1], [1], [0, 0, 0, 1, 1, 1], [0], [0]>} : vector<8x8x8xbf16>, vector<8x8x8xbf16>, vector<8x8x8xf32> -> vector<8x8x8xf32>
    "tpu.trace_stop"() : () -> ()
    %cst_29 = arith.constant 0.353553385 : f32
    %146 = vector.broadcast %cst_29 : f32 to vector<8x8x8xf32>
    %147 = arith.mulf %145, %146 : vector<8x8x8xf32>
    %cst_30 = arith.constant dense<0xFF800000> : vector<8x8xf32>
    %148 = vector.multi_reduction <maximumf>, %147, %cst_30 [2] : vector<8x8x8xf32> to vector<8x8xf32>
    %149 = vector.shape_cast %148 : vector<8x8xf32> to vector<8x8x1xf32>
    %150 = vector.broadcast %149 : vector<8x8x1xf32> to vector<8x8x8xf32>
    %151 = arith.subf %147, %150 : vector<8x8x8xf32>
    %152 = math.exp %151 : vector<8x8x8xf32>
    %cst_31 = arith.constant dense<0.000000e+00> : vector<8x8xf32>
    %153 = vector.multi_reduction <add>, %152, %cst_31 [2] : vector<8x8x8xf32> to vector<8x8xf32>
    %154 = vector.shape_cast %153 : vector<8x8xf32> to vector<8x8x1xf32>
    %155 = tpu.reciprocal %154 {approx = true} : vector<8x8x1xf32> -> vector<8x8x1xf32>
    %156 = vector.broadcast %155 : vector<8x8x1xf32> to vector<8x8x8xf32>
    %157 = arith.mulf %152, %156 : vector<8x8x8xf32>
    %158 = arith.truncf %157 : vector<8x8x8xf32> to vector<8x8x8xbf16>
    %159 = arith.truncf %142 : vector<8x8x8xf32> to vector<8x8x8xbf16>
    "tpu.trace_start"() <{level = 10 : i32, message = "gqk,gkd->gqd"}> : () -> ()
    %cst_32 = arith.constant dense<0.000000e+00> : vector<8x8x8xf32>
    %160 = tpu.matmul %158, %159, %cst_32 {dimension_numbers = #tpu.dot_dimension_numbers<[2], [1], [1], [2], [0, 0, 0, 1, 1, 2], [0], [0]>} : vector<8x8x8xbf16>, vector<8x8x8xbf16>, vector<8x8x8xf32> -> vector<8x8x8xf32>
    "tpu.trace_stop"() : () -> ()
    %161 = arith.truncf %160 : vector<8x8x8xf32> to vector<8x8x8xbf16>
    %c0_33 = arith.constant 0 : index
    %c0_34 = arith.constant 0 : index
    %c0_35 = arith.constant 0 : index
    %c0_36 = arith.constant 0 : index
    %162 = vector.load %arg9[%c0_33, %c0_34, %c0_35, %c0_36] : memref<2x4x8x32xbf16, #tpu.memory_space<vmem>>, vector<1x4x8x32xbf16>
    %163 = vector.shape_cast %162 : vector<1x4x8x32xbf16> to vector<4x8x32xbf16>
    %164 = vector.shape_cast %163 : vector<4x8x32xbf16> to vector<1x4x8x32xbf16>
    %165 = vector.shape_cast %164 : vector<1x4x8x32xbf16> to vector<1x4x8x32xbf16>
    %166 = vector.broadcast %165 : vector<1x4x8x32xbf16> to vector<2x4x8x32xbf16>
    %167 = vector.shape_cast %166 : vector<2x4x8x32xbf16> to vector<8x8x32xbf16>
    "tpu.trace_start"() <{level = 10 : i32, message = "gsk,gkd->gsd"}> : () -> ()
    %cst_37 = arith.constant dense<0.000000e+00> : vector<8x8x32xf32>
    %168 = tpu.matmul %161, %167, %cst_37 {dimension_numbers = #tpu.dot_dimension_numbers<[2], [1], [1], [2], [0, 0, 0, 1, 1, 2], [0], [0]>} : vector<8x8x8xbf16>, vector<8x8x32xbf16>, vector<8x8x32xf32> -> vector<8x8x32xf32>
    "tpu.trace_stop"() : () -> ()
    %169 = vector.shape_cast %168 : vector<8x8x32xf32> to vector<2x4x8x32xf32>
    %cst_38 = arith.constant dense<0.000000e+00> : vector<2x8x32xf32>
    %170 = vector.multi_reduction <add>, %169, %cst_38 [1] : vector<2x4x8x32xf32> to vector<2x8x32xf32>
    %c0_39 = arith.constant 0 : index
    %c0_40 = arith.constant 0 : index
    %171 = vector.load %arg10[%c0_39, %c0_40] : memref<2x32xf32, #tpu.memory_space<vmem>>, vector<1x32xf32>
    %172 = vector.shape_cast %171 : vector<1x32xf32> to vector<32xf32>
    %173 = vector.shape_cast %172 : vector<32xf32> to vector<1x1x32xf32>
    %174 = vector.broadcast %173 : vector<1x1x32xf32> to vector<2x8x32xf32>
    %175 = arith.addf %170, %174 : vector<2x8x32xf32>
    %176 = arith.addf %88, %175 : vector<2x8x32xf32>
    %c0_41 = arith.constant 0 : index
    %c0_42 = arith.constant 0 : index
    %177 = vector.load %arg11[%c0_41, %c0_42] : memref<2x32xf32, #tpu.memory_space<vmem>>, vector<1x32xf32>
    %178 = vector.shape_cast %177 : vector<1x32xf32> to vector<32xf32>
    %c0_43 = arith.constant 0 : index
    %c0_44 = arith.constant 0 : index
    %179 = vector.load %arg12[%c0_43, %c0_44] : memref<2x32xf32, #tpu.memory_space<vmem>>, vector<1x32xf32>
    %180 = vector.shape_cast %179 : vector<1x32xf32> to vector<32xf32>
    %cst_45 = arith.constant dense<0.000000e+00> : vector<2x8xf32>
    %181 = vector.multi_reduction <add>, %176, %cst_45 [2] : vector<2x8x32xf32> to vector<2x8xf32>
    %182 = vector.shape_cast %181 : vector<2x8xf32> to vector<2x8x1xf32>
    %cst_46 = arith.constant 3.200000e+01 : f32
    %183 = vector.broadcast %cst_46 : f32 to vector<2x8x1xf32>
    %184 = arith.divf %182, %183 : vector<2x8x1xf32>
    %185 = vector.broadcast %184 : vector<2x8x1xf32> to vector<2x8x32xf32>
    %186 = arith.subf %176, %185 : vector<2x8x32xf32>
    %187 = arith.mulf %186, %186 : vector<2x8x32xf32>
    %cst_47 = arith.constant dense<0.000000e+00> : vector<2x8xf32>
    %188 = vector.multi_reduction <add>, %187, %cst_47 [2] : vector<2x8x32xf32> to vector<2x8xf32>
    %189 = vector.shape_cast %188 : vector<2x8xf32> to vector<2x8x1xf32>
    %cst_48 = arith.constant 3.200000e+01 : f32
    %190 = vector.broadcast %cst_48 : f32 to vector<2x8x1xf32>
    %191 = arith.divf %189, %190 : vector<2x8x1xf32>
    %192 = vector.broadcast %184 : vector<2x8x1xf32> to vector<2x8x32xf32>
    %193 = arith.subf %176, %192 : vector<2x8x32xf32>
    %cst_49 = arith.constant 9.99999974E-6 : f32
    %194 = vector.broadcast %cst_49 : f32 to vector<2x8x1xf32>
    %195 = arith.addf %191, %194 : vector<2x8x1xf32>
    %196 = math.rsqrt %195 : vector<2x8x1xf32>
    %197 = vector.broadcast %196 : vector<2x8x1xf32> to vector<2x8x32xf32>
    %198 = arith.mulf %193, %197 : vector<2x8x32xf32>
    %199 = vector.shape_cast %178 : vector<32xf32> to vector<1x1x32xf32>
    %200 = vector.broadcast %199 : vector<1x1x32xf32> to vector<2x8x32xf32>
    %201 = arith.mulf %198, %200 : vector<2x8x32xf32>
    %202 = vector.shape_cast %180 : vector<32xf32> to vector<1x1x32xf32>
    %203 = vector.broadcast %202 : vector<1x1x32xf32> to vector<2x8x32xf32>
    %204 = arith.addf %201, %203 : vector<2x8x32xf32>
    %205 = arith.truncf %204 : vector<2x8x32xf32> to vector<2x8x32xbf16>
    %c0_50 = arith.constant 0 : index
    %c0_51 = arith.constant 0 : index
    %c0_52 = arith.constant 0 : index
    %206 = vector.load %arg13[%c0_50, %c0_51, %c0_52] : memref<2x32x128xbf16, #tpu.memory_space<vmem>>, vector<1x32x128xbf16>
    %207 = vector.shape_cast %206 : vector<1x32x128xbf16> to vector<32x128xbf16>
    %208 = vector.shape_cast %207 : vector<32x128xbf16> to vector<1x32x128xbf16>
    %209 = vector.shape_cast %208 : vector<1x32x128xbf16> to vector<1x32x128xbf16>
    %210 = vector.broadcast %209 : vector<1x32x128xbf16> to vector<2x32x128xbf16>
    "tpu.trace_start"() <{level = 10 : i32, message = "bsd,bdf->bsf"}> : () -> ()
    %cst_53 = arith.constant dense<0.000000e+00> : vector<2x8x128xf32>
    %211 = tpu.matmul %205, %210, %cst_53 {dimension_numbers = #tpu.dot_dimension_numbers<[2], [1], [1], [2], [0, 0, 0, 1, 1, 2], [0], [0]>} : vector<2x8x32xbf16>, vector<2x32x128xbf16>, vector<2x8x128xf32> -> vector<2x8x128xf32>
    "tpu.trace_stop"() : () -> ()
    %c0_54 = arith.constant 0 : index
    %c0_55 = arith.constant 0 : index
    %212 = vector.load %arg14[%c0_54, %c0_55] : memref<2x128xf32, #tpu.memory_space<vmem>>, vector<1x128xf32>
    %213 = vector.shape_cast %212 : vector<1x128xf32> to vector<128xf32>
    %214 = vector.shape_cast %213 : vector<128xf32> to vector<1x1x128xf32>
    %215 = vector.broadcast %214 : vector<1x1x128xf32> to vector<2x8x128xf32>
    %216 = arith.addf %211, %215 : vector<2x8x128xf32>
    %217 = arith.mulf %216, %216 : vector<2x8x128xf32>
    %218 = arith.mulf %216, %217 : vector<2x8x128xf32>
    %cst_56 = arith.constant 4.471500e-02 : f32
    %219 = vector.broadcast %cst_56 : f32 to vector<2x8x128xf32>
    %220 = arith.mulf %219, %218 : vector<2x8x128xf32>
    %221 = arith.addf %216, %220 : vector<2x8x128xf32>
    %cst_57 = arith.constant 0.797884583 : f32
    %222 = vector.broadcast %cst_57 : f32 to vector<2x8x128xf32>
    %223 = arith.mulf %222, %221 : vector<2x8x128xf32>
    %224 = math.tanh %223 : vector<2x8x128xf32>
    %cst_58 = arith.constant 1.000000e+00 : f32
    %225 = vector.broadcast %cst_58 : f32 to vector<2x8x128xf32>
    %226 = arith.addf %225, %224 : vector<2x8x128xf32>
    %cst_59 = arith.constant 5.000000e-01 : f32
    %227 = vector.broadcast %cst_59 : f32 to vector<2x8x128xf32>
    %228 = arith.mulf %227, %226 : vector<2x8x128xf32>
    %229 = arith.mulf %216, %228 : vector<2x8x128xf32>
    %230 = arith.truncf %229 : vector<2x8x128xf32> to vector<2x8x128xbf16>
    %c0_60 = arith.constant 0 : index
    %c0_61 = arith.constant 0 : index
    %c0_62 = arith.constant 0 : index
    %231 = vector.load %arg15[%c0_60, %c0_61, %c0_62] : memref<2x128x32xbf16, #tpu.memory_space<vmem>>, vector<1x128x32xbf16>
    %232 = vector.shape_cast %231 : vector<1x128x32xbf16> to vector<128x32xbf16>
    %233 = vector.shape_cast %232 : vector<128x32xbf16> to vector<1x128x32xbf16>
    %234 = vector.shape_cast %233 : vector<1x128x32xbf16> to vector<1x128x32xbf16>
    %235 = vector.broadcast %234 : vector<1x128x32xbf16> to vector<2x128x32xbf16>
    "tpu.trace_start"() <{level = 10 : i32, message = "bsf,bfd->bsd"}> : () -> ()
    %cst_63 = arith.constant dense<0.000000e+00> : vector<2x8x32xf32>
    %236 = tpu.matmul %230, %235, %cst_63 {dimension_numbers = #tpu.dot_dimension_numbers<[2], [1], [1], [2], [0, 0, 0, 1, 1, 2], [0], [0]>} : vector<2x8x128xbf16>, vector<2x128x32xbf16>, vector<2x8x32xf32> -> vector<2x8x32xf32>
    "tpu.trace_stop"() : () -> ()
    %c0_64 = arith.constant 0 : index
    %c0_65 = arith.constant 0 : index
    %237 = vector.load %arg16[%c0_64, %c0_65] : memref<2x32xf32, #tpu.memory_space<vmem>>, vector<1x32xf32>
    %238 = vector.shape_cast %237 : vector<1x32xf32> to vector<32xf32>
    %239 = vector.shape_cast %238 : vector<32xf32> to vector<1x1x32xf32>
    %240 = vector.broadcast %239 : vector<1x1x32xf32> to vector<2x8x32xf32>
    %241 = arith.addf %236, %240 : vector<2x8x32xf32>
    %242 = arith.addf %176, %241 : vector<2x8x32xf32>
    %c1_66 = arith.constant 1 : index
    %c0_67 = arith.constant 0 : index
    %243 = vector.load %arg4[%c1_66, %c0_67] : memref<2x32xf32, #tpu.memory_space<vmem>>, vector<1x32xf32>
    %244 = vector.shape_cast %243 : vector<1x32xf32> to vector<32xf32>
    %c1_68 = arith.constant 1 : index
    %c0_69 = arith.constant 0 : index
    %245 = vector.load %arg5[%c1_68, %c0_69] : memref<2x32xf32, #tpu.memory_space<vmem>>, vector<1x32xf32>
    %246 = vector.shape_cast %245 : vector<1x32xf32> to vector<32xf32>
    %cst_70 = arith.constant dense<0.000000e+00> : vector<2x8xf32>
    %247 = vector.multi_reduction <add>, %242, %cst_70 [2] : vector<2x8x32xf32> to vector<2x8xf32>
    %248 = vector.shape_cast %247 : vector<2x8xf32> to vector<2x8x1xf32>
    %cst_71 = arith.constant 3.200000e+01 : f32
    %249 = vector.broadcast %cst_71 : f32 to vector<2x8x1xf32>
    %250 = arith.divf %248, %249 : vector<2x8x1xf32>
    %251 = vector.broadcast %250 : vector<2x8x1xf32> to vector<2x8x32xf32>
    %252 = arith.subf %242, %251 : vector<2x8x32xf32>
    %253 = arith.mulf %252, %252 : vector<2x8x32xf32>
    %cst_72 = arith.constant dense<0.000000e+00> : vector<2x8xf32>
    %254 = vector.multi_reduction <add>, %253, %cst_72 [2] : vector<2x8x32xf32> to vector<2x8xf32>
    %255 = vector.shape_cast %254 : vector<2x8xf32> to vector<2x8x1xf32>
    %cst_73 = arith.constant 3.200000e+01 : f32
    %256 = vector.broadcast %cst_73 : f32 to vector<2x8x1xf32>
    %257 = arith.divf %255, %256 : vector<2x8x1xf32>
    %258 = vector.broadcast %250 : vector<2x8x1xf32> to vector<2x8x32xf32>
    %259 = arith.subf %242, %258 : vector<2x8x32xf32>
    %cst_74 = arith.constant 9.99999974E-6 : f32
    %260 = vector.broadcast %cst_74 : f32 to vector<2x8x1xf32>
    %261 = arith.addf %257, %260 : vector<2x8x1xf32>
    %262 = math.rsqrt %261 : vector<2x8x1xf32>
    %263 = vector.broadcast %262 : vector<2x8x1xf32> to vector<2x8x32xf32>
    %264 = arith.mulf %259, %263 : vector<2x8x32xf32>
    %265 = vector.shape_cast %244 : vector<32xf32> to vector<1x1x32xf32>
    %266 = vector.broadcast %265 : vector<1x1x32xf32> to vector<2x8x32xf32>
    %267 = arith.mulf %264, %266 : vector<2x8x32xf32>
    %268 = vector.shape_cast %246 : vector<32xf32> to vector<1x1x32xf32>
    %269 = vector.broadcast %268 : vector<1x1x32xf32> to vector<2x8x32xf32>
    %270 = arith.addf %267, %269 : vector<2x8x32xf32>
    %271 = arith.truncf %270 : vector<2x8x32xf32> to vector<2x8x32xbf16>
    %272 = vector.shape_cast %271 : vector<2x8x32xbf16> to vector<2x1x8x32xbf16>
    %273 = vector.shape_cast %272 : vector<2x1x8x32xbf16> to vector<2x1x8x32xbf16>
    %274 = vector.broadcast %273 : vector<2x1x8x32xbf16> to vector<2x4x8x32xbf16>
    %275 = vector.shape_cast %274 : vector<2x4x8x32xbf16> to vector<8x8x32xbf16>
    %c1_75 = arith.constant 1 : index
    %c0_76 = arith.constant 0 : index
    %c0_77 = arith.constant 0 : index
    %c0_78 = arith.constant 0 : index
    %276 = vector.load %arg6[%c1_75, %c0_76, %c0_77, %c0_78] : memref<2x4x32x8xbf16, #tpu.memory_space<vmem>>, vector<1x4x32x8xbf16>
    %277 = vector.shape_cast %276 : vector<1x4x32x8xbf16> to vector<4x32x8xbf16>
    %278 = vector.shape_cast %277 : vector<4x32x8xbf16> to vector<1x4x32x8xbf16>
    %279 = vector.shape_cast %278 : vector<1x4x32x8xbf16> to vector<1x4x32x8xbf16>
    %280 = vector.broadcast %279 : vector<1x4x32x8xbf16> to vector<2x4x32x8xbf16>
    %281 = vector.shape_cast %280 : vector<2x4x32x8xbf16> to vector<8x32x8xbf16>
    "tpu.trace_start"() <{level = 10 : i32, message = "gsd,gdk->gsk"}> : () -> ()
    %cst_79 = arith.constant dense<0.000000e+00> : vector<8x8x8xf32>
    %282 = tpu.matmul %275, %281, %cst_79 {dimension_numbers = #tpu.dot_dimension_numbers<[2], [1], [1], [2], [0, 0, 0, 1, 1, 2], [0], [0]>} : vector<8x8x32xbf16>, vector<8x32x8xbf16>, vector<8x8x8xf32> -> vector<8x8x8xf32>
    "tpu.trace_stop"() : () -> ()
    %c1_80 = arith.constant 1 : index
    %c0_81 = arith.constant 0 : index
    %c0_82 = arith.constant 0 : index
    %c0_83 = arith.constant 0 : index
    %283 = vector.load %arg7[%c1_80, %c0_81, %c0_82, %c0_83] : memref<2x4x32x8xbf16, #tpu.memory_space<vmem>>, vector<1x4x32x8xbf16>
    %284 = vector.shape_cast %283 : vector<1x4x32x8xbf16> to vector<4x32x8xbf16>
    %285 = vector.shape_cast %284 : vector<4x32x8xbf16> to vector<1x4x32x8xbf16>
    %286 = vector.shape_cast %285 : vector<1x4x32x8xbf16> to vector<1x4x32x8xbf16>
    %287 = vector.broadcast %286 : vector<1x4x32x8xbf16> to vector<2x4x32x8xbf16>
    %288 = vector.shape_cast %287 : vector<2x4x32x8xbf16> to vector<8x32x8xbf16>
    "tpu.trace_start"() <{level = 10 : i32, message = "gsd,gdk->gsk"}> : () -> ()
    %cst_84 = arith.constant dense<0.000000e+00> : vector<8x8x8xf32>
    %289 = tpu.matmul %275, %288, %cst_84 {dimension_numbers = #tpu.dot_dimension_numbers<[2], [1], [1], [2], [0, 0, 0, 1, 1, 2], [0], [0]>} : vector<8x8x32xbf16>, vector<8x32x8xbf16>, vector<8x8x8xf32> -> vector<8x8x8xf32>
    "tpu.trace_stop"() : () -> ()
    %c1_85 = arith.constant 1 : index
    %c0_86 = arith.constant 0 : index
    %c0_87 = arith.constant 0 : index
    %c0_88 = arith.constant 0 : index
    %290 = vector.load %arg8[%c1_85, %c0_86, %c0_87, %c0_88] : memref<2x4x32x8xbf16, #tpu.memory_space<vmem>>, vector<1x4x32x8xbf16>
    %291 = vector.shape_cast %290 : vector<1x4x32x8xbf16> to vector<4x32x8xbf16>
    %292 = vector.shape_cast %291 : vector<4x32x8xbf16> to vector<1x4x32x8xbf16>
    %293 = vector.shape_cast %292 : vector<1x4x32x8xbf16> to vector<1x4x32x8xbf16>
    %294 = vector.broadcast %293 : vector<1x4x32x8xbf16> to vector<2x4x32x8xbf16>
    %295 = vector.shape_cast %294 : vector<2x4x32x8xbf16> to vector<8x32x8xbf16>
    "tpu.trace_start"() <{level = 10 : i32, message = "gsd,gdk->gsk"}> : () -> ()
    %cst_89 = arith.constant dense<0.000000e+00> : vector<8x8x8xf32>
    %296 = tpu.matmul %275, %295, %cst_89 {dimension_numbers = #tpu.dot_dimension_numbers<[2], [1], [1], [2], [0, 0, 0, 1, 1, 2], [0], [0]>} : vector<8x8x32xbf16>, vector<8x32x8xbf16>, vector<8x8x8xf32> -> vector<8x8x8xf32>
    "tpu.trace_stop"() : () -> ()
    %297 = arith.truncf %282 : vector<8x8x8xf32> to vector<8x8x8xbf16>
    %298 = arith.truncf %289 : vector<8x8x8xf32> to vector<8x8x8xbf16>
    "tpu.trace_start"() <{level = 10 : i32, message = "gqd,gkd->gqk"}> : () -> ()
    %cst_90 = arith.constant dense<0.000000e+00> : vector<8x8x8xf32>
    %299 = tpu.matmul %297, %298, %cst_90 {dimension_numbers = #tpu.dot_dimension_numbers<[2], [2], [1], [1], [0, 0, 0, 1, 1, 1], [0], [0]>} : vector<8x8x8xbf16>, vector<8x8x8xbf16>, vector<8x8x8xf32> -> vector<8x8x8xf32>
    "tpu.trace_stop"() : () -> ()
    %cst_91 = arith.constant 0.353553385 : f32
    %300 = vector.broadcast %cst_91 : f32 to vector<8x8x8xf32>
    %301 = arith.mulf %299, %300 : vector<8x8x8xf32>
    %cst_92 = arith.constant dense<0xFF800000> : vector<8x8xf32>
    %302 = vector.multi_reduction <maximumf>, %301, %cst_92 [2] : vector<8x8x8xf32> to vector<8x8xf32>
    %303 = vector.shape_cast %302 : vector<8x8xf32> to vector<8x8x1xf32>
    %304 = vector.broadcast %303 : vector<8x8x1xf32> to vector<8x8x8xf32>
    %305 = arith.subf %301, %304 : vector<8x8x8xf32>
    %306 = math.exp %305 : vector<8x8x8xf32>
    %cst_93 = arith.constant dense<0.000000e+00> : vector<8x8xf32>
    %307 = vector.multi_reduction <add>, %306, %cst_93 [2] : vector<8x8x8xf32> to vector<8x8xf32>
    %308 = vector.shape_cast %307 : vector<8x8xf32> to vector<8x8x1xf32>
    %309 = tpu.reciprocal %308 {approx = true} : vector<8x8x1xf32> -> vector<8x8x1xf32>
    %310 = vector.broadcast %309 : vector<8x8x1xf32> to vector<8x8x8xf32>
    %311 = arith.mulf %306, %310 : vector<8x8x8xf32>
    %312 = arith.truncf %311 : vector<8x8x8xf32> to vector<8x8x8xbf16>
    %313 = arith.truncf %296 : vector<8x8x8xf32> to vector<8x8x8xbf16>
    "tpu.trace_start"() <{level = 10 : i32, message = "gqk,gkd->gqd"}> : () -> ()
    %cst_94 = arith.constant dense<0.000000e+00> : vector<8x8x8xf32>
    %314 = tpu.matmul %312, %313, %cst_94 {dimension_numbers = #tpu.dot_dimension_numbers<[2], [1], [1], [2], [0, 0, 0, 1, 1, 2], [0], [0]>} : vector<8x8x8xbf16>, vector<8x8x8xbf16>, vector<8x8x8xf32> -> vector<8x8x8xf32>
    "tpu.trace_stop"() : () -> ()
    %315 = arith.truncf %314 : vector<8x8x8xf32> to vector<8x8x8xbf16>
    %c1_95 = arith.constant 1 : index
    %c0_96 = arith.constant 0 : index
    %c0_97 = arith.constant 0 : index
    %c0_98 = arith.constant 0 : index
    %316 = vector.load %arg9[%c1_95, %c0_96, %c0_97, %c0_98] : memref<2x4x8x32xbf16, #tpu.memory_space<vmem>>, vector<1x4x8x32xbf16>
    %317 = vector.shape_cast %316 : vector<1x4x8x32xbf16> to vector<4x8x32xbf16>
    %318 = vector.shape_cast %317 : vector<4x8x32xbf16> to vector<1x4x8x32xbf16>
    %319 = vector.shape_cast %318 : vector<1x4x8x32xbf16> to vector<1x4x8x32xbf16>
    %320 = vector.broadcast %319 : vector<1x4x8x32xbf16> to vector<2x4x8x32xbf16>
    %321 = vector.shape_cast %320 : vector<2x4x8x32xbf16> to vector<8x8x32xbf16>
    "tpu.trace_start"() <{level = 10 : i32, message = "gsk,gkd->gsd"}> : () -> ()
    %cst_99 = arith.constant dense<0.000000e+00> : vector<8x8x32xf32>
    %322 = tpu.matmul %315, %321, %cst_99 {dimension_numbers = #tpu.dot_dimension_numbers<[2], [1], [1], [2], [0, 0, 0, 1, 1, 2], [0], [0]>} : vector<8x8x8xbf16>, vector<8x8x32xbf16>, vector<8x8x32xf32> -> vector<8x8x32xf32>
    "tpu.trace_stop"() : () -> ()
    %323 = vector.shape_cast %322 : vector<8x8x32xf32> to vector<2x4x8x32xf32>
    %cst_100 = arith.constant dense<0.000000e+00> : vector<2x8x32xf32>
    %324 = vector.multi_reduction <add>, %323, %cst_100 [1] : vector<2x4x8x32xf32> to vector<2x8x32xf32>
    %c1_101 = arith.constant 1 : index
    %c0_102 = arith.constant 0 : index
    %325 = vector.load %arg10[%c1_101, %c0_102] : memref<2x32xf32, #tpu.memory_space<vmem>>, vector<1x32xf32>
    %326 = vector.shape_cast %325 : vector<1x32xf32> to vector<32xf32>
    %327 = vector.shape_cast %326 : vector<32xf32> to vector<1x1x32xf32>
    %328 = vector.broadcast %327 : vector<1x1x32xf32> to vector<2x8x32xf32>
    %329 = arith.addf %324, %328 : vector<2x8x32xf32>
    %330 = arith.addf %242, %329 : vector<2x8x32xf32>
    %c1_103 = arith.constant 1 : index
    %c0_104 = arith.constant 0 : index
    %331 = vector.load %arg11[%c1_103, %c0_104] : memref<2x32xf32, #tpu.memory_space<vmem>>, vector<1x32xf32>
    %332 = vector.shape_cast %331 : vector<1x32xf32> to vector<32xf32>
    %c1_105 = arith.constant 1 : index
    %c0_106 = arith.constant 0 : index
    %333 = vector.load %arg12[%c1_105, %c0_106] : memref<2x32xf32, #tpu.memory_space<vmem>>, vector<1x32xf32>
    %334 = vector.shape_cast %333 : vector<1x32xf32> to vector<32xf32>
    %cst_107 = arith.constant dense<0.000000e+00> : vector<2x8xf32>
    %335 = vector.multi_reduction <add>, %330, %cst_107 [2] : vector<2x8x32xf32> to vector<2x8xf32>
    %336 = vector.shape_cast %335 : vector<2x8xf32> to vector<2x8x1xf32>
    %cst_108 = arith.constant 3.200000e+01 : f32
    %337 = vector.broadcast %cst_108 : f32 to vector<2x8x1xf32>
    %338 = arith.divf %336, %337 : vector<2x8x1xf32>
    %339 = vector.broadcast %338 : vector<2x8x1xf32> to vector<2x8x32xf32>
    %340 = arith.subf %330, %339 : vector<2x8x32xf32>
    %341 = arith.mulf %340, %340 : vector<2x8x32xf32>
    %cst_109 = arith.constant dense<0.000000e+00> : vector<2x8xf32>
    %342 = vector.multi_reduction <add>, %341, %cst_109 [2] : vector<2x8x32xf32> to vector<2x8xf32>
    %343 = vector.shape_cast %342 : vector<2x8xf32> to vector<2x8x1xf32>
    %cst_110 = arith.constant 3.200000e+01 : f32
    %344 = vector.broadcast %cst_110 : f32 to vector<2x8x1xf32>
    %345 = arith.divf %343, %344 : vector<2x8x1xf32>
    %346 = vector.broadcast %338 : vector<2x8x1xf32> to vector<2x8x32xf32>
    %347 = arith.subf %330, %346 : vector<2x8x32xf32>
    %cst_111 = arith.constant 9.99999974E-6 : f32
    %348 = vector.broadcast %cst_111 : f32 to vector<2x8x1xf32>
    %349 = arith.addf %345, %348 : vector<2x8x1xf32>
    %350 = math.rsqrt %349 : vector<2x8x1xf32>
    %351 = vector.broadcast %350 : vector<2x8x1xf32> to vector<2x8x32xf32>
    %352 = arith.mulf %347, %351 : vector<2x8x32xf32>
    %353 = vector.shape_cast %332 : vector<32xf32> to vector<1x1x32xf32>
    %354 = vector.broadcast %353 : vector<1x1x32xf32> to vector<2x8x32xf32>
    %355 = arith.mulf %352, %354 : vector<2x8x32xf32>
    %356 = vector.shape_cast %334 : vector<32xf32> to vector<1x1x32xf32>
    %357 = vector.broadcast %356 : vector<1x1x32xf32> to vector<2x8x32xf32>
    %358 = arith.addf %355, %357 : vector<2x8x32xf32>
    %359 = arith.truncf %358 : vector<2x8x32xf32> to vector<2x8x32xbf16>
    %c1_112 = arith.constant 1 : index
    %c0_113 = arith.constant 0 : index
    %c0_114 = arith.constant 0 : index
    %360 = vector.load %arg13[%c1_112, %c0_113, %c0_114] : memref<2x32x128xbf16, #tpu.memory_space<vmem>>, vector<1x32x128xbf16>
    %361 = vector.shape_cast %360 : vector<1x32x128xbf16> to vector<32x128xbf16>
    %362 = vector.shape_cast %361 : vector<32x128xbf16> to vector<1x32x128xbf16>
    %363 = vector.shape_cast %362 : vector<1x32x128xbf16> to vector<1x32x128xbf16>
    %364 = vector.broadcast %363 : vector<1x32x128xbf16> to vector<2x32x128xbf16>
    "tpu.trace_start"() <{level = 10 : i32, message = "bsd,bdf->bsf"}> : () -> ()
    %cst_115 = arith.constant dense<0.000000e+00> : vector<2x8x128xf32>
    %365 = tpu.matmul %359, %364, %cst_115 {dimension_numbers = #tpu.dot_dimension_numbers<[2], [1], [1], [2], [0, 0, 0, 1, 1, 2], [0], [0]>} : vector<2x8x32xbf16>, vector<2x32x128xbf16>, vector<2x8x128xf32> -> vector<2x8x128xf32>
    "tpu.trace_stop"() : () -> ()
    %c1_116 = arith.constant 1 : index
    %c0_117 = arith.constant 0 : index
    %366 = vector.load %arg14[%c1_116, %c0_117] : memref<2x128xf32, #tpu.memory_space<vmem>>, vector<1x128xf32>
    %367 = vector.shape_cast %366 : vector<1x128xf32> to vector<128xf32>
    %368 = vector.shape_cast %367 : vector<128xf32> to vector<1x1x128xf32>
    %369 = vector.broadcast %368 : vector<1x1x128xf32> to vector<2x8x128xf32>
    %370 = arith.addf %365, %369 : vector<2x8x128xf32>
    %371 = arith.mulf %370, %370 : vector<2x8x128xf32>
    %372 = arith.mulf %370, %371 : vector<2x8x128xf32>
    %cst_118 = arith.constant 4.471500e-02 : f32
    %373 = vector.broadcast %cst_118 : f32 to vector<2x8x128xf32>
    %374 = arith.mulf %373, %372 : vector<2x8x128xf32>
    %375 = arith.addf %370, %374 : vector<2x8x128xf32>
    %cst_119 = arith.constant 0.797884583 : f32
    %376 = vector.broadcast %cst_119 : f32 to vector<2x8x128xf32>
    %377 = arith.mulf %376, %375 : vector<2x8x128xf32>
    %378 = math.tanh %377 : vector<2x8x128xf32>
    %cst_120 = arith.constant 1.000000e+00 : f32
    %379 = vector.broadcast %cst_120 : f32 to vector<2x8x128xf32>
    %380 = arith.addf %379, %378 : vector<2x8x128xf32>
    %cst_121 = arith.constant 5.000000e-01 : f32
    %381 = vector.broadcast %cst_121 : f32 to vector<2x8x128xf32>
    %382 = arith.mulf %381, %380 : vector<2x8x128xf32>
    %383 = arith.mulf %370, %382 : vector<2x8x128xf32>
    %384 = arith.truncf %383 : vector<2x8x128xf32> to vector<2x8x128xbf16>
    %c1_122 = arith.constant 1 : index
    %c0_123 = arith.constant 0 : index
    %c0_124 = arith.constant 0 : index
    %385 = vector.load %arg15[%c1_122, %c0_123, %c0_124] : memref<2x128x32xbf16, #tpu.memory_space<vmem>>, vector<1x128x32xbf16>
    %386 = vector.shape_cast %385 : vector<1x128x32xbf16> to vector<128x32xbf16>
    %387 = vector.shape_cast %386 : vector<128x32xbf16> to vector<1x128x32xbf16>
    %388 = vector.shape_cast %387 : vector<1x128x32xbf16> to vector<1x128x32xbf16>
    %389 = vector.broadcast %388 : vector<1x128x32xbf16> to vector<2x128x32xbf16>
    "tpu.trace_start"() <{level = 10 : i32, message = "bsf,bfd->bsd"}> : () -> ()
    %cst_125 = arith.constant dense<0.000000e+00> : vector<2x8x32xf32>
    %390 = tpu.matmul %384, %389, %cst_125 {dimension_numbers = #tpu.dot_dimension_numbers<[2], [1], [1], [2], [0, 0, 0, 1, 1, 2], [0], [0]>} : vector<2x8x128xbf16>, vector<2x128x32xbf16>, vector<2x8x32xf32> -> vector<2x8x32xf32>
    "tpu.trace_stop"() : () -> ()
    %c1_126 = arith.constant 1 : index
    %c0_127 = arith.constant 0 : index
    %391 = vector.load %arg16[%c1_126, %c0_127] : memref<2x32xf32, #tpu.memory_space<vmem>>, vector<1x32xf32>
    %392 = vector.shape_cast %391 : vector<1x32xf32> to vector<32xf32>
    %393 = vector.shape_cast %392 : vector<32xf32> to vector<1x1x32xf32>
    %394 = vector.broadcast %393 : vector<1x1x32xf32> to vector<2x8x32xf32>
    %395 = arith.addf %390, %394 : vector<2x8x32xf32>
    %396 = arith.addf %330, %395 : vector<2x8x32xf32>
    %c0_128 = arith.constant 0 : index
    %c0_129 = arith.constant 0 : index
    %397 = vector.load %arg17[%c0_128, %c0_129] : memref<1x32xf32, #tpu.memory_space<vmem>>, vector<1x32xf32>
    %398 = vector.shape_cast %397 : vector<1x32xf32> to vector<32xf32>
    %c0_130 = arith.constant 0 : index
    %c0_131 = arith.constant 0 : index
    %399 = vector.load %arg18[%c0_130, %c0_131] : memref<1x32xf32, #tpu.memory_space<vmem>>, vector<1x32xf32>
    %400 = vector.shape_cast %399 : vector<1x32xf32> to vector<32xf32>
    %cst_132 = arith.constant dense<0.000000e+00> : vector<2x8xf32>
    %401 = vector.multi_reduction <add>, %396, %cst_132 [2] : vector<2x8x32xf32> to vector<2x8xf32>
    %402 = vector.shape_cast %401 : vector<2x8xf32> to vector<2x8x1xf32>
    %cst_133 = arith.constant 3.200000e+01 : f32
    %403 = vector.broadcast %cst_133 : f32 to vector<2x8x1xf32>
    %404 = arith.divf %402, %403 : vector<2x8x1xf32>
    %405 = vector.broadcast %404 : vector<2x8x1xf32> to vector<2x8x32xf32>
    %406 = arith.subf %396, %405 : vector<2x8x32xf32>
    %407 = arith.mulf %406, %406 : vector<2x8x32xf32>
    %cst_134 = arith.constant dense<0.000000e+00> : vector<2x8xf32>
    %408 = vector.multi_reduction <add>, %407, %cst_134 [2] : vector<2x8x32xf32> to vector<2x8xf32>
    %409 = vector.shape_cast %408 : vector<2x8xf32> to vector<2x8x1xf32>
    %cst_135 = arith.constant 3.200000e+01 : f32
    %410 = vector.broadcast %cst_135 : f32 to vector<2x8x1xf32>
    %411 = arith.divf %409, %410 : vector<2x8x1xf32>
    %412 = vector.broadcast %404 : vector<2x8x1xf32> to vector<2x8x32xf32>
    %413 = arith.subf %396, %412 : vector<2x8x32xf32>
    %cst_136 = arith.constant 9.99999974E-6 : f32
    %414 = vector.broadcast %cst_136 : f32 to vector<2x8x1xf32>
    %415 = arith.addf %411, %414 : vector<2x8x1xf32>
    %416 = math.rsqrt %415 : vector<2x8x1xf32>
    %417 = vector.broadcast %416 : vector<2x8x1xf32> to vector<2x8x32xf32>
    %418 = arith.mulf %413, %417 : vector<2x8x32xf32>
    %419 = vector.shape_cast %398 : vector<32xf32> to vector<1x1x32xf32>
    %420 = vector.broadcast %419 : vector<1x1x32xf32> to vector<2x8x32xf32>
    %421 = arith.mulf %418, %420 : vector<2x8x32xf32>
    %422 = vector.shape_cast %400 : vector<32xf32> to vector<1x1x32xf32>
    %423 = vector.broadcast %422 : vector<1x1x32xf32> to vector<2x8x32xf32>
    %424 = arith.addf %421, %423 : vector<2x8x32xf32>
    %c0_137 = arith.constant 0 : index
    %c0_138 = arith.constant 0 : index
    %c0_139 = arith.constant 0 : index
    %425 = vector.load %arg19[%c0_137, %c0_138, %c0_139] : memref<2x8x32xf32, #tpu.memory_space<vmem>>, vector<2x8x32xf32>
    tpu.vector_store %arg19[%c0_137, %c0_138, %c0_139], %424 {strides = array<i32>} : memref<2x8x32xf32, #tpu.memory_space<vmem>>, vector<2x8x32xf32>,
    return
  }
  func.func @transform_0(%arg0: i32, %arg1: memref<16xi32, #tpu.memory_space<smem>>) -> (i32, i32) {
    %c0_i32 = arith.constant 0 : i32
    %c0_i32_0 = arith.constant 0 : i32
    %c0_i32_1 = arith.constant 0 : i32
    return %c0_i32, %c0_i32_0 : i32, i32
  }
  func.func @transform_1(%arg0: i32, %arg1: memref<16xi32, #tpu.memory_space<smem>>) -> (i32, i32) {
    %c0_i32 = arith.constant 0 : i32
    %c0_i32_0 = arith.constant 0 : i32
    %c0_i32_1 = arith.constant 0 : i32
    return %c0_i32, %c0_i32_0 : i32, i32
  }
  func.func @transform_2(%arg0: i32, %arg1: memref<16xi32, #tpu.memory_space<smem>>) -> (i32, i32) {
    %c0_i32 = arith.constant 0 : i32
    %c0_i32_0 = arith.constant 0 : i32
    %c0_i32_1 = arith.constant 0 : i32
    return %c0_i32, %c0_i32_0 : i32, i32
  }
  func.func @transform_3(%arg0: i32, %arg1: memref<16xi32, #tpu.memory_space<smem>>) -> (i32, i32) {
    %c0_i32 = arith.constant 0 : i32
    %c0_i32_0 = arith.constant 0 : i32
    %c0_i32_1 = arith.constant 0 : i32
    return %c0_i32, %c0_i32_0 : i32, i32
  }
  func.func @transform_4(%arg0: i32, %arg1: memref<16xi32, #tpu.memory_space<smem>>) -> (i32, i32, i32, i32) {
    %c0_i32 = arith.constant 0 : i32
    %c0_i32_0 = arith.constant 0 : i32
    %c0_i32_1 = arith.constant 0 : i32
    %c0_i32_2 = arith.constant 0 : i32
    %c0_i32_3 = arith.constant 0 : i32
    return %c0_i32, %c0_i32_0, %c0_i32_1, %c0_i32_2 : i32, i32, i32, i32
  }
  func.func @transform_5(%arg0: i32, %arg1: memref<16xi32, #tpu.memory_space<smem>>) -> (i32, i32, i32, i32) {
    %c0_i32 = arith.constant 0 : i32
    %c0_i32_0 = arith.constant 0 : i32
    %c0_i32_1 = arith.constant 0 : i32
    %c0_i32_2 = arith.constant 0 : i32
    %c0_i32_3 = arith.constant 0 : i32
    return %c0_i32, %c0_i32_0, %c0_i32_1, %c0_i32_2 : i32, i32, i32, i32
  }
  func.func @transform_6(%arg0: i32, %arg1: memref<16xi32, #tpu.memory_space<smem>>) -> (i32, i32, i32, i32) {
    %c0_i32 = arith.constant 0 : i32
    %c0_i32_0 = arith.constant 0 : i32
    %c0_i32_1 = arith.constant 0 : i32
    %c0_i32_2 = arith.constant 0 : i32
    %c0_i32_3 = arith.constant 0 : i32
    return %c0_i32, %c0_i32_0, %c0_i32_1, %c0_i32_2 : i32, i32, i32, i32
  }
  func.func @transform_7(%arg0: i32, %arg1: memref<16xi32, #tpu.memory_space<smem>>) -> (i32, i32, i32, i32) {
    %c0_i32 = arith.constant 0 : i32
    %c0_i32_0 = arith.constant 0 : i32
    %c0_i32_1 = arith.constant 0 : i32
    %c0_i32_2 = arith.constant 0 : i32
    %c0_i32_3 = arith.constant 0 : i32
    return %c0_i32, %c0_i32_0, %c0_i32_1, %c0_i32_2 : i32, i32, i32, i32
  }
  func.func @transform_8(%arg0: i32, %arg1: memref<16xi32, #tpu.memory_space<smem>>) -> (i32, i32) {
    %c0_i32 = arith.constant 0 : i32
    %c0_i32_0 = arith.constant 0 : i32
    %c0_i32_1 = arith.constant 0 : i32
    return %c0_i32, %c0_i32_0 : i32, i32
  }
  func.func @transform_9(%arg0: i32, %arg1: memref<16xi32, #tpu.memory_space<smem>>) -> (i32, i32) {
    %c0_i32 = arith.constant 0 : i32
    %c0_i32_0 = arith.constant 0 : i32
    %c0_i32_1 = arith.constant 0 : i32
    return %c0_i32, %c0_i32_0 : i32, i32
  }
  func.func @transform_10(%arg0: i32, %arg1: memref<16xi32, #tpu.memory_space<smem>>) -> (i32, i32) {
    %c0_i32 = arith.constant 0 : i32
    %c0_i32_0 = arith.constant 0 : i32
    %c0_i32_1 = arith.constant 0 : i32
    return %c0_i32, %c0_i32_0 : i32, i32
  }
  func.func @transform_11(%arg0: i32, %arg1: memref<16xi32, #tpu.memory_space<smem>>) -> (i32, i32, i32) {
    %c0_i32 = arith.constant 0 : i32
    %c0_i32_0 = arith.constant 0 : i32
    %c0_i32_1 = arith.constant 0 : i32
    %c0_i32_2 = arith.constant 0 : i32
    return %c0_i32, %c0_i32_0, %c0_i32_1 : i32, i32, i32
  }
  func.func @transform_12(%arg0: i32, %arg1: memref<16xi32, #tpu.memory_space<smem>>) -> (i32, i32) {
    %c0_i32 = arith.constant 0 : i32
    %c0_i32_0 = arith.constant 0 : i32
    %c0_i32_1 = arith.constant 0 : i32
    return %c0_i32, %c0_i32_0 : i32, i32
  }
  func.func @transform_13(%arg0: i32, %arg1: memref<16xi32, #tpu.memory_space<smem>>) -> (i32, i32, i32) {
    %c0_i32 = arith.constant 0 : i32
    %c0_i32_0 = arith.constant 0 : i32
    %c0_i32_1 = arith.constant 0 : i32
    %c0_i32_2 = arith.constant 0 : i32
    return %c0_i32, %c0_i32_0, %c0_i32_1 : i32, i32, i32
  }
  func.func @transform_14(%arg0: i32, %arg1: memref<16xi32, #tpu.memory_space<smem>>) -> (i32, i32) {
    %c0_i32 = arith.constant 0 : i32
    %c0_i32_0 = arith.constant 0 : i32
    %c0_i32_1 = arith.constant 0 : i32
    return %c0_i32, %c0_i32_0 : i32, i32
  }
  func.func @transform_15(%arg0: i32, %arg1: memref<16xi32, #tpu.memory_space<smem>>) -> (i32, i32) {
    %c0_i32 = arith.constant 0 : i32
    %c0_i32_0 = arith.constant 0 : i32
    %c0_i32_1 = arith.constant 0 : i32
    return %c0_i32, %c0_i32_0 : i32, i32
  }
  func.func @transform_16(%arg0: i32, %arg1: memref<16xi32, #tpu.memory_space<smem>>) -> (i32, i32) {
    %c0_i32 = arith.constant 0 : i32
    %c0_i32_0 = arith.constant 0 : i32
    %c0_i32_1 = arith.constant 0 : i32
    return %c0_i32, %c0_i32_0 : i32, i32
  }
  func.func @transform_17(%arg0: i32, %arg1: memref<16xi32, #tpu.memory_space<smem>>) -> (i32, i32, i32) {
    %c0_i32 = arith.constant 0 : i32
    %c0_i32_0 = arith.constant 0 : i32
    %c0_i32_1 = arith.constant 0 : i32
    %c0_i32_2 = arith.constant 0 : i32
    return %c0_i32, %c0_i32_0, %c0_i32_1 : i32, i32, i32
  }
}

</mosaic_0001>

<bundles_post_ra>
// kernel: tpu_custom_call.1
= control target key start
LH: loop header
LB: loop body
LE: loop exit
PB: predicated region body
PF: predicated region fallthrough
CT: control target
= control target key end

     0   :  { %s10716_s0 = inlined_call_operand.vmem [shape: s32[16], index: 0, kind: input, shape index: {}]   ;;  %s10717_s1 = inlined_call_operand.vmem [shape: f32[1000,32], index: 1, kind: input, shape index: {}]   ;;  %s10718_s2 = inlined_call_operand.vmem [shape: f32[8,32], index: 2, kind: input, shape index: {}]   ;;  %s10719_s3 = inlined_call_operand.vmem [shape: f32[2,32], index: 3, kind: input, shape index: {}]   ;;  %s10720_s4 = inlined_call_operand.vmem [shape: f32[2,32], index: 4, kind: input, shape index: {}]   ;;  %s10721_s5 = inlined_call_operand.vmem [shape: bf16[2,4,32,8], index: 5, kind: input, shape index: {}]   ;;  %s10722_s6 = inlined_call_operand.vmem [shape: bf16[2,4,32,8], index: 6, kind: input, shape index: {}]   ;;  %s10723_s7 = inlined_call_operand.vmem [shape: bf16[2,4,32,8], index: 7, kind: input, shape index: {}]   ;;  %s10724_s8 = inlined_call_operand.vmem [shape: bf16[2,4,8,32], index: 8, kind: input, shape index: {}]   ;;  %s10725_s9 = inlined_call_operand.vmem [shape: f32[2,32], index: 9, kind: input, shape index: {}]   ;;  %s10726_s10 = inlined_call_operand.vmem [shape: f32[2,32], index: 10, kind: input, shape index: {}]   ;;  %s10727_s11 = inlined_call_operand.vmem [shape: f32[2,32], index: 11, kind: input, shape index: {}]   ;;  %s10728_s12 = inlined_call_operand.vmem [shape: bf16[2,32,128], index: 12, kind: input, shape index: {}]   ;;  %s10729_s13 = inlined_call_operand.vmem [shape: f32[2,128], index: 13, kind: input, shape index: {}]   ;;  %s10730_s14 = inlined_call_operand.vmem [shape: bf16[2,128,32], index: 14, kind: input, shape index: {}]   ;;  %s10731_s15 = inlined_call_operand.vmem [shape: f32[2,32], index: 15, kind: input, shape index: {}]   ;;  %s10732_s16 = inlined_call_operand.vmem [shape: f32[1,32], index: 16, kind: input, shape index: {}]   ;;  %s10733_s17 = inlined_call_operand.vmem [shape: f32[1,32], index: 17, kind: input, shape index: {}]   ;;  %s10734_s18 = inlined_call_operand.hbm [shape: f32[2,8,32], index: 18, kind: output, shape index: {}]  }
   0x1   :  { %10737 = sst [smem:[#allocation8_spill]] %s10716_s0 }
   0x2   :  { %10738 = sst [smem:[#allocation9_spill]] %s10717_s1 }
   0x3   :  { %10739 = sst [smem:[#allocation10_spill]] %s10718_s2 }
   0x4   :  { %10740 = sst [smem:[#allocation11_spill]] %s10727_s11 }
   0x5   :  { %s10741_s29 = sld [smem:[#allocation8_spill]] }
   0xb   :  { %s23_s11 = sshll.u32 %s10741_s29, 4  ;;  %s24_s11 = int_to_ptr.vmem [resolvable:$true] %s23_s11 }
   0xc   :  { %s8418_s30 = scalar_lea.vmem %s24_s11, 16  ;;  %p8423_p1 = scmp.lt.s32.totalorder %s24_s11, %s24_s11 }
   0xd   :  { %p8419_p0 = scmp.ne.s32.totalorder %s24_s11, %s8418_s30  ;;  %p8424_p2 = scmp.lt.s32.totalorder %s8418_s30, %s8418_s30 }
   0xf   :  { %p8425_p3 = por %p8424_p2, %p8423_p1 }
  0x11   :  { %p8426_p4 = pnand %p8425_p3, %p8419_p0 }
  0x13   :  { %8429 = shalt.err (!%p8426_p4)  }
  0x14   :  { %s8454_s0 = smov [#allocation3]  }
  0x15   :  { %26 = dma.vmem_to_smem %s24_s11, 16, %s8454_s0, [#allocation2] }
  0x16   :  { %8450 = dma.done.wait [#allocation2], 16 }
  0x17   :  { %8451 = vsyncadd [#allocation2], 4294967280 }
  0x18   :  { %28 = sfence }
  0x19   :  { %s10742_s20 = sld [smem:[#allocation9_spill]]  ;;  %v65_v3 = vlaneseq  ;;  %vm490_vm0 = vcmask 1040384   ;;  %vm499_vm1 = vcmask 1041408   ;;  %vm508_vm2 = vcmask 1042432  }
  0x1a   :  { %s8567_s24 = sld [smem:[#allocation3]]  ;;  %vm517_vm3 = vcmask 1043456   ;;  %vm526_vm5 = vcmask 1044480   ;;  %v8455_v27 = vmov 0.0   ;;  %vm535_vm8 = vcmask 1045504  }
  0x1b   :  { %s8578_s30 = sld [smem:[#allocation3 + $0x1]]  ;;  %v8589_v10 = vand.u32 127, %v65_v3  ;;  %vm544_vm10 = vcmask 1046528  }
  0x1c   :  { %s8591_s23 = sld [smem:[#allocation3 + $0x2]] }
  0x1d   :  { %s8602_s0 = sld [smem:[#allocation3 + $0x3]]  ;;  %v8611_v16 = vadd.s32 128, %v8589_v10  ;;  %v8736_v58 = vadd.s32 384, %v8589_v10 }
  0x1e   :  { %s8613_s2 = sld [smem:[#allocation3 + $0x4]] }
  0x1f   :  { %v640_v0 = vld [vmem:[%s10742_s20 + $0xf8] sm:$0xff]  ;;  %v639_v5 = vld [vmem:[%s10742_s20 + $0xf0] sm:$0xff]  ;;  %v638_v9 = vld [vmem:[%s10742_s20 + $0xe8] sm:$0xff]  ;;  %s8621_s28 = sld [smem:[#allocation3 + $0x5]] }
  0x20   :  { %v672_v1 = vld [vmem:[%s10742_s20 + $0x1f8] sm:$0xff]  ;;  %7066 = vmatprep.subr.mxu0 %v640_v0  ;;  %v671_v6 = vld [vmem:[%s10742_s20 + $0x1f0] sm:$0xff]  ;;  %v670_v11 = vld [vmem:[%s10742_s20 + $0x1e8] sm:$0xff]  ;;  %v8630_v21 = vstv %s8567_s24  ;;  %s8632_s22 = sld [smem:[#allocation3 + $0x6]] }
  0x21   :  { %v624_v2 = vld [vmem:[%s10742_s20 + $0x78] sm:$0xff]  ;;  %7104 = vmatprep.subr.mxu1 %v672_v1  ;;  %v623_v7 = vld [vmem:[%s10742_s20 + $0x70] sm:$0xff]  ;;  %v622_v12 = vld [vmem:[%s10742_s20 + $0x68] sm:$0xff]  ;;  %vm77_vm4 = vcmp.eq.s32.totalorder %v8611_v16, %v8630_v21  ;;  %v8643_v24 = vstv %s8578_s30  ;;  %s8645_s24 = sld [smem:[#allocation3 + $0x7]]  ;;  %vm76_vm6 = vcmp.eq.s32.totalorder %v8589_v10, %v8630_v21 }
  0x22   :  { %v656_v4 = vld [vmem:[%s10742_s20 + $0x178] sm:$0xff]  ;;  %7067 = vmatpush3.msra.mxu0 %v624_v2  ;;  %v655_v8 = vld [vmem:[%s10742_s20 + $0x170] sm:$0xff]  ;;  %v654_v13 = vld [vmem:[%s10742_s20 + $0x168] sm:$0xff]  ;;  %v6666_v28 = vsel %vm77_vm4, 1.0, %v8455_v27  ;;  %vm103_vm7 = vcmp.eq.s32.totalorder %v8611_v16, %v8643_v24  ;;  %v8659_v29 = vstv %s8591_s23  ;;  %vm102_vm4 = vcmp.eq.s32.totalorder %v8589_v10, %v8643_v24  ;;  %s8779_s19 = sld [smem:[#allocation3 + $0x8]] }
  0x23   :  { %7105 = vmatpush3.msra.mxu1 %v656_v4  ;;  %7068 = vmatprep.subr.mxu0 %v639_v5  ;;  %v637_v14 = vld [vmem:[%s10742_s20 + $0xe0] sm:$0xff]  ;;  %v636_v19 = vld [vmem:[%s10742_s20 + $0xd8] sm:$0xff]  ;;  %v635_v25 = vld [vmem:[%s10742_s20 + $0xd0] sm:$0xff]  ;;  %v6675_v32 = vsel %vm103_vm7, 1.0, %v8455_v27  ;;  %vm129_vm9 = vcmp.eq.s32.totalorder %v8611_v16, %v8659_v29  ;;  %v8671_v33 = vstv %s8602_s0  ;;  %vm79_vm7 = vcmp.eq.s32.totalorder %v8736_v58, %v8630_v21  ;;  %s8808_s26 = sld [smem:[#allocation3 + $0x9]] }
  0x24   :  { %7106 = vmatprep.subr.mxu1 %v671_v6  ;;  %7069 = vmatpush3.msra.mxu0 %v623_v7  ;;  %v669_v15 = vld [vmem:[%s10742_s20 + $0x1e0] sm:$0xff]  ;;  %v668_v20 = vld [vmem:[%s10742_s20 + $0x1d8] sm:$0xff]  ;;  %v667_v26 = vld [vmem:[%s10742_s20 + $0x1d0] sm:$0xff]  ;;  %v6684_v36 = vsel %vm129_vm9, 1.0, %v8455_v27  ;;  %vm155_vm11 = vcmp.eq.s32.totalorder %v8611_v16, %v8671_v33  ;;  %v8683_v37 = vstv %s8613_s2  ;;  %v492_v38 = vsel %vm490_vm0, %v6666_v28, %v6675_v32  ;;  %s8883_s25 = sld [smem:[#allocation3 + $0xb]] }
  0x25   :  { %7107 = vmatpush3.msra.mxu1 %v655_v8  ;;  %7070 = vmatprep.subr.mxu0 %v638_v9  ;;  %v621_v17 = vld [vmem:[%s10742_s20 + $0x60] sm:$0xff]  ;;  %v620_v22 = vld [vmem:[%s10742_s20 + $0x58] sm:$0xff]  ;;  %v619_v30 = vld [vmem:[%s10742_s20 + $0x50] sm:$0xff]  ;;  %v6693_v41 = vsel %vm155_vm11, 1.0, %v8455_v27  ;;  %vm181_vm12 = vcmp.eq.s32.totalorder %v8611_v16, %v8683_v37  ;;  %v8696_v42 = vstv %s8621_s28  ;;  %v501_v43 = vsel %vm499_vm1, %v492_v38, %v6684_v36  ;;  %s8915_s30 = sld [smem:[#allocation3 + $0xd]] }
  0x26   :  { %7108 = vmatprep.subr.mxu1 %v670_v11  ;;  %v653_v18 = vld [vmem:[%s10742_s20 + $0x160] sm:$0xff]  ;;  %7071 = vmatpush3.msra.mxu0 %v622_v12  ;;  %v652_v23 = vld [vmem:[%s10742_s20 + $0x158] sm:$0xff]  ;;  %v651_v31 = vld [vmem:[%s10742_s20 + $0x150] sm:$0xff]  ;;  %v6702_v46 = vsel %vm181_vm12, 1.0, %v8455_v27  ;;  %vm207_vm13 = vcmp.eq.s32.totalorder %v8611_v16, %v8696_v42  ;;  %v8709_v47 = vstv %s8632_s22  ;;  %v510_v48 = vsel %vm508_vm2, %v501_v43, %v6693_v41  ;;  %s8939_s22 = sld [smem:[#allocation3 + $0xf]] }
  0x27   :  { %7109 = vmatpush3.msra.mxu1 %v654_v13  ;;  %7072 = vmatprep.subr.mxu0 %v637_v14  ;;  %v634_v34 = vld [vmem:[%s10742_s20 + $0xc8] sm:$0xff]  ;;  %v633_v44 = vld [vmem:[%s10742_s20 + $0xc0] sm:$0xff]  ;;  %v6711_v51 = vsel %vm207_vm13, 1.0, %v8455_v27  ;;  %vm233_vm14 = vcmp.eq.s32.totalorder %v8611_v16, %v8709_v47  ;;  %v8722_v52 = vstv %s8645_s24  ;;  %v519_v53 = vsel %vm517_vm3, %v510_v48, %v6702_v46  ;;  %v632_v54 = vld [vmem:[%s10742_s20 + $0xb8] sm:$0xff]  ;;  %s8867_s24 = sld [smem:[#allocation3 + $0xa]] }
  0x28   :  { %7110 = vmatprep.subr.mxu1 %v669_v15  ;;  %7073 = vmatpush3.msra.mxu0 %v621_v17  ;;  %v666_v35 = vld [vmem:[%s10742_s20 + $0x1c8] sm:$0xff]  ;;  %v665_v45 = vld [vmem:[%s10742_s20 + $0x1c0] sm:$0xff]  ;;  %v664_v55 = vld [vmem:[%s10742_s20 + $0x1b8] sm:$0xff]  ;;  %v6720_v56 = vsel %vm233_vm14, 1.0, %v8455_v27  ;;  %vm259_vm15 = vcmp.eq.s32.totalorder %v8611_v16, %v8722_v52  ;;  %v528_v57 = vsel %vm526_vm5, %v519_v53, %v6711_v51  ;;  %vm105_vm9 = vcmp.eq.s32.totalorder %v8736_v58, %v8643_v24 }
  0x29   :  { %7111 = vmatpush3.msra.mxu1 %v653_v18  ;;  %7074 = vmatprep.subr.mxu0 %v636_v19  ;;  %v618_v39 = vld [vmem:[%s10742_s20 + $0x48] sm:$0xff]  ;;  %v617_v49 = vld [vmem:[%s10742_s20 + $0x40] sm:$0xff]  ;;  %v616_v59 = vld [vmem:[%s10742_s20 + $0x38] sm:$0xff]  ;;  %v6729_v61 = vsel %vm259_vm15, 1.0, %v8455_v27  ;;  %v537_v62 = vsel %vm535_vm8, %v528_v57, %v6720_v56  ;;  %v8765_v2 = vsel %vm76_vm6, 1.0, %v8455_v27  ;;  %v6668_v5 = vsel %vm79_vm7, 1.0, %v8455_v27 }
  0x2a   :  { %7112 = vmatprep.subr.mxu1 %v668_v20  ;;  %7075 = vmatpush3.msra.mxu0 %v620_v22  ;;  %v650_v40 = vld [vmem:[%s10742_s20 + $0x148] sm:$0xff]  ;;  %v649_v50 = vld [vmem:[%s10742_s20 + $0x140] sm:$0xff]  ;;  %v648_v60 = vld [vmem:[%s10742_s20 + $0x138] sm:$0xff]  ;;  %v8755_v1 = vsel %vm544_vm10, %v537_v62, %v6729_v61  ;;  %v6677_v6 = vsel %vm105_vm9, 1.0, %v8455_v27  ;;  %vm131_vm11 = vcmp.eq.s32.totalorder %v8736_v58, %v8659_v29  ;;  %vm157_vm6 = vcmp.eq.s32.totalorder %v8736_v58, %v8671_v33 }
  0x2b   :  { %7113 = vmatpush3.msra.mxu1 %v652_v23  ;;  %7076 = vmatprep.subr.mxu0 %v635_v25  ;;  %v631_v63 = vld [vmem:[%s10742_s20 + $0xb0] sm:$0xff]  ;;  %v630_v7 = vld [vmem:[%s10742_s20 + $0xa8] sm:$0xff]  ;;  %v6686_v9 = vsel %vm131_vm11, 1.0, %v8455_v27  ;;  %vm183_vm12 = vcmp.eq.s32.totalorder %v8736_v58, %v8683_v37  ;;  %vm209_vm13 = vcmp.eq.s32.totalorder %v8736_v58, %v8696_v42  ;;  %v6674_v11 = vsel %vm102_vm4, 1.0, %v8455_v27  ;;  %v629_v17 = vld [vmem:[%s10742_s20 + $0xa0] sm:$0xff] }
  0x2c   :  { %7114 = vmatprep.subr.mxu1 %v667_v26  ;;  %7077 = vmatpush3.msra.mxu0 %v619_v30  ;;  %v663_v0 = vld [vmem:[%s10742_s20 + $0x1b0] sm:$0xff]  ;;  %v662_v8 = vld [vmem:[%s10742_s20 + $0x1a8] sm:$0xff]  ;;  %v6695_v14 = vsel %vm157_vm6, 1.0, %v8455_v27  ;;  %v6704_v15 = vsel %vm183_vm12, 1.0, %v8455_v27  ;;  %vm235_vm14 = vcmp.eq.s32.totalorder %v8736_v58, %v8709_v47  ;;  %vm261_vm15 = vcmp.eq.s32.totalorder %v8736_v58, %v8722_v52  ;;  %v661_v18 = vld [vmem:[%s10742_s20 + $0x1a0] sm:$0xff] }
  0x2d   :  { %7115 = vmatpush3.msra.mxu1 %v651_v31  ;;  %7078 = vmatprep.subr.mxu0 %v634_v34  ;;  %v615_v3 = vld [vmem:[%s10742_s20 + $0x30] sm:$0xff]  ;;  %v614_v12 = vld [vmem:[%s10742_s20 + $0x28] sm:$0xff]  ;;  %v6713_v19 = vsel %vm209_vm13, 1.0, %v8455_v27  ;;  %v6722_v20 = vsel %vm235_vm14, 1.0, %v8455_v27  ;;  %v494_v22 = vsel %vm490_vm0, %v6668_v5, %v6677_v6  ;;  %vm128_vm4 = vcmp.eq.s32.totalorder %v8589_v10, %v8659_v29  ;;  %v613_v23 = vld [vmem:[%s10742_s20 + $0x20] sm:$0xff] }
  0x2e   :  { %7116 = vmatprep.subr.mxu1 %v666_v35  ;;  %7079 = vmatpush3.msra.mxu0 %v618_v39  ;;  %v647_v4 = vld [vmem:[%s10742_s20 + $0x130] sm:$0xff]  ;;  %v646_v13 = vld [vmem:[%s10742_s20 + $0x128] sm:$0xff]  ;;  %v645_v25 = vld [vmem:[%s10742_s20 + $0x120] sm:$0xff]  ;;  %v6731_v26 = vsel %vm261_vm15, 1.0, %v8455_v27  ;;  %v503_v28 = vsel %vm499_vm1, %v494_v22, %v6686_v9  ;;  %vm154_vm7 = vcmp.eq.s32.totalorder %v8589_v10, %v8671_v33  ;;  %vm180_vm9 = vcmp.eq.s32.totalorder %v8589_v10, %v8683_v37 }
  0x2f   :  { %7117 = vmatpush3.msra.mxu1 %v650_v40  ;;  %7080 = vmatprep.subr.mxu0 %v633_v44  ;;  %v628_v30 = vld [vmem:[%s10742_s20 + $0x98] sm:$0xff]  ;;  %v512_v32 = vsel %vm508_vm2, %v503_v28, %v6695_v14  ;;  %v6683_v34 = vsel %vm128_vm4, 1.0, %v8455_v27  ;;  %v6692_v35 = vsel %vm154_vm7, 1.0, %v8455_v27  ;;  %vm206_vm11 = vcmp.eq.s32.totalorder %v8589_v10, %v8696_v42  ;;  %v627_v41 = vld [vmem:[%s10742_s20 + $0x90] sm:$0xff]  ;;  %v626_v56 = vld [vmem:[%s10742_s20 + $0x88] sm:$0xff] }
  0x30   :  { %7118 = vmatprep.subr.mxu1 %v665_v45  ;;  %7081 = vmatpush3.msra.mxu0 %v617_v49  ;;  %v660_v31 = vld [vmem:[%s10742_s20 + $0x198] sm:$0xff]  ;;  %v521_v39 = vsel %vm517_vm3, %v512_v32, %v6704_v15  ;;  %v6701_v40 = vsel %vm180_vm9, 1.0, %v8455_v27  ;;  %vm232_vm6 = vcmp.eq.s32.totalorder %v8589_v10, %v8709_v47  ;;  %vm258_vm12 = vcmp.eq.s32.totalorder %v8589_v10, %v8722_v52  ;;  %v659_v43 = vld [vmem:[%s10742_s20 + $0x190] sm:$0xff]  ;;  %v658_v57 = vld [vmem:[%s10742_s20 + $0x188] sm:$0xff] }
  0x31   :  { %7119 = vmatpush3.msra.mxu1 %v649_v50  ;;  %7082 = vmatprep.subr.mxu0 %v632_v54  ;;  %v612_v36 = vld [vmem:[%s10742_s20 + $0x18] sm:$0xff]  ;;  %v530_v44 = vsel %vm526_vm5, %v521_v39, %v6713_v19  ;;  %v6710_v45 = vsel %vm206_vm11, 1.0, %v8455_v27  ;;  %v6719_v46 = vsel %vm232_vm6, 1.0, %v8455_v27  ;;  %v491_v48 = vsel %vm490_vm0, %v8765_v2, %v6674_v11  ;;  %v611_v49 = vld [vmem:[%s10742_s20 + $0x10] sm:$0xff]  ;;  %v610_v62 = vld [vmem:[%s10742_s20 + $0x8] sm:$0xff] }
  0x32   :  { %7120 = vmatprep.subr.mxu1 %v664_v55  ;;  %7083 = vmatpush3.msra.mxu0 %v616_v59  ;;  %v644_v38 = vld [vmem:[%s10742_s20 + $0x118] sm:$0xff]  ;;  %v643_v50 = vld [vmem:[%s10742_s20 + $0x110] sm:$0xff]  ;;  %v539_v51 = vsel %vm535_vm8, %v530_v44, %v6722_v20  ;;  %v500_v53 = vsel %vm499_vm1, %v491_v48, %v6683_v34  ;;  %v8878_v54 = vadd.s32 256, %v8589_v10  ;;  %v8881_v55 = vstv %s8779_s19  ;;  %s8899_s19 = sld [smem:[#allocation3 + $0xc]] }
  0x33   :  { %7121 = vmatpush3.msra.mxu1 %v648_v60  ;;  %7084 = vmatprep.subr.mxu0 %v631_v63  ;;  %v548_v59 = vsel %vm544_vm10, %v539_v51, %v6731_v26  ;;  %v6728_v60 = vsel %vm258_vm12, 1.0, %v8455_v27  ;;  %v509_v61 = vsel %vm508_vm2, %v500_v53, %v6692_v35  ;;  %vm285_vm13 = vcmp.eq.s32.totalorder %v8611_v16, %v8881_v55  ;;  %v642_v63 = vld [vmem:[%s10742_s20 + $0x108] sm:$0xff]  ;;  %v704_v19 = vld [vmem:[%s10742_s20 + $0x2f8] sm:$0xff]  ;;  %v703_v28 = vld [vmem:[%s10742_s20 + $0x2f0] sm:$0xff] }
  0x34   :  { %7122 = vmatprep.subr.mxu1 %v663_v0  ;;  %7085 = vmatpush3.msra.mxu0 %v615_v3  ;;  %v518_v0 = vsel %vm517_vm3, %v509_v61, %v6701_v40  ;;  %vm78_vm14 = vcmp.eq.s32.totalorder %v8878_v54, %v8630_v21  ;;  %vm104_vm15 = vcmp.eq.s32.totalorder %v8878_v54, %v8643_v24  ;;  %v8913_v2 = vstv %s8808_s26  ;;  %v625_v3 = vld [vmem:[%s10742_s20 + $0x80] sm:$0xff]  ;;  %s8928_s26 = sld [smem:[#allocation3 + $0xe]]  ;;  %v687_v32 = vld [vmem:[%s10742_s20 + $0x270] sm:$0xff] }
  0x35   :  { %7123 = vmatpush3.msra.mxu1 %v647_v4  ;;  %7086 = vmatprep.subr.mxu0 %v630_v7  ;;  %v657_v4 = vld [vmem:[%s10742_s20 + $0x180] sm:$0xff]  ;;  %v527_v5 = vsel %vm526_vm5, %v518_v0, %v6710_v45  ;;  %v6667_v6 = vsel %vm78_vm14, 1.0, %v8455_v27  ;;  %v6676_v7 = vsel %vm104_vm15, 1.0, %v8455_v27  ;;  %vm130_vm4 = vcmp.eq.s32.totalorder %v8878_v54, %v8659_v29  ;;  %v719_v53 = vld [vmem:[%s10742_s20 + $0x370] sm:$0xff] }
  0x36   :  { %7124 = vmatprep.subr.mxu1 %v662_v8  ;;  %7087 = vmatpush3.msra.mxu0 %v614_v12  ;;  %v609_v8 = vld [vmem:[%s10742_s20] sm:$0xff]  ;;  %v536_v9 = vsel %vm535_vm8, %v527_v5, %v6719_v46  ;;  %v6685_v11 = vsel %vm130_vm4, 1.0, %v8455_v27  ;;  %vm156_vm7 = vcmp.eq.s32.totalorder %v8878_v54, %v8671_v33  ;;  %vm182_vm9 = vcmp.eq.s32.totalorder %v8878_v54, %v8683_v37 }
  0x37   :  { %7125 = vmatpush3.msra.mxu1 %v646_v13  ;;  %7088 = vmatprep.subr.mxu0 %v629_v17  ;;  %v641_v12 = vld [vmem:[%s10742_s20 + $0x100] sm:$0xff]  ;;  %v545_v13 = vsel %vm544_vm10, %v536_v9, %v6728_v60  ;;  %v6694_v14 = vsel %vm156_vm7, 1.0, %v8455_v27  ;;  %vm208_vm11 = vcmp.eq.s32.totalorder %v8878_v54, %v8696_v42  ;;  %v6738_v15 = vsel %vm285_vm13, 1.0, %v8455_v27  ;;  %v700_v60 = vld [vmem:[%s10742_s20 + $0x2d8] sm:$0xff]  ;;  %v698_v9 = vld [vmem:[%s10742_s20 + $0x2c8] sm:$0xff] }
  0x38   :  { %7126 = vmatprep.subr.mxu1 %v661_v18  ;;  %7089 = vmatpush3.msra.mxu0 %v613_v23  ;;  %v6703_v17 = vsel %vm182_vm9, 1.0, %v8455_v27  ;;  %vm234_vm6 = vcmp.eq.s32.totalorder %v8878_v54, %v8709_v47  ;;  %vm260_vm12 = vcmp.eq.s32.totalorder %v8878_v54, %v8722_v52  ;;  %v493_v18 = vsel %vm490_vm0, %v6667_v6, %v6676_v7  ;;  %v699_v7 = vld [vmem:[%s10742_s20 + $0x2d0] sm:$0xff] }
  0x39   :  { %7127 = vmatpush3.msra.mxu1 %v645_v25  ;;  %7090 = vmatprep.subr.mxu0 %v628_v30  ;;  %v6712_v20 = vsel %vm208_vm11, 1.0, %v8455_v27  ;;  %v6721_v22 = vsel %vm234_vm6, 1.0, %v8455_v27  ;;  %v502_v23 = vsel %vm499_vm1, %v493_v18, %v6685_v11  ;;  %v688_v25 = vld [vmem:[%s10742_s20 + $0x278] sm:$0xff]  ;;  %vm311_vm13 = vcmp.eq.s32.totalorder %v8611_v16, %v8913_v2 }
  0x3a   :  { %7128 = vmatprep.subr.mxu1 %v660_v31  ;;  %7091 = vmatpush3.msra.mxu0 %v612_v36  ;;  %v6730_v26 = vsel %vm260_vm12, 1.0, %v8455_v27  ;;  %v8976_v30 = vstv %s8867_s24  ;;  %vm284_vm14 = vcmp.eq.s32.totalorder %v8589_v10, %v8881_v55  ;;  %v8987_v34 = vstv %s8883_s25 }
  0x3b   :  { %7129 = vmatpush3.msra.mxu1 %v644_v38  ;;  %7092 = vmatprep.subr.mxu0 %v627_v41  ;;  %vm337_vm15 = vcmp.eq.s32.totalorder %v8611_v16, %v8976_v30  ;;  %v8990_v35 = vstv %s8899_s19  ;;  %v702_v38 = vld [vmem:[%s10742_s20 + $0x2e8] sm:$0xff]  ;;  %v6747_v39 = vsel %vm311_vm13, 1.0, %v8455_v27  ;;  %vm363_vm4 = vcmp.eq.s32.totalorder %v8611_v16, %v8987_v34  ;;  %v720_v41 = vld [vmem:[%s10742_s20 + $0x378] sm:$0xff] }
  0x3c   :  { %7130 = vmatprep.subr.mxu1 %v659_v43  ;;  %7093 = vmatpush3.msra.mxu0 %v611_v49  ;;  %vm389_vm7 = vcmp.eq.s32.totalorder %v8611_v16, %v8990_v35  ;;  %v686_v43 = vld [vmem:[%s10742_s20 + $0x268] sm:$0xff]  ;;  %v6756_v44 = vsel %vm337_vm15, 1.0, %v8455_v27  ;;  %v6765_v45 = vsel %vm363_vm4, 1.0, %v8455_v27  ;;  %v9015_v46 = vstv %s8915_s30  ;;  %v701_v49 = vld [vmem:[%s10742_s20 + $0x2e0] sm:$0xff] }
  0x3d   :  { %7131 = vmatpush3.msra.mxu1 %v643_v50  ;;  %7094 = vmatprep.subr.mxu0 %v626_v56  ;;  %vm415_vm9 = vcmp.eq.s32.totalorder %v8611_v16, %v9015_v46  ;;  %v9024_v50 = vstv %s8928_s26  ;;  %v9027_v51 = vstv %s8939_s22  ;;  %v685_v56 = vld [vmem:[%s10742_s20 + $0x260] sm:$0xff]  ;;  %v6737_v6 = vsel %vm284_vm14, 1.0, %v8455_v27 }
  0x3e   :  { %7132 = vmatprep.subr.mxu1 %v658_v57  ;;  %7095 = vmatpush3.msra.mxu0 %v610_v62  ;;  %v6774_v57 = vsel %vm389_vm7, 1.0, %v8455_v27  ;;  %vm441_vm11 = vcmp.eq.s32.totalorder %v8611_v16, %v9024_v50  ;;  %vm467_vm6 = vcmp.eq.s32.totalorder %v8611_v16, %v9027_v51  ;;  %v6783_v61 = vsel %vm415_vm9, 1.0, %v8455_v27  ;;  %v718_v16 = vld [vmem:[%s10742_s20 + $0x368] sm:$0xff] }
  0x3f   :  { %7133 = vmatpush3.msra.mxu1 %v642_v63  ;;  %7096 = vmatprep.subr.mxu0 %v625_v3  ;;  %v6792_v62 = vsel %vm441_vm11, 1.0, %v8455_v27  ;;  %v6801_v63 = vsel %vm467_vm6, 1.0, %v8455_v27  ;;  %v717_v3 = vld [vmem:[%s10742_s20 + $0x360] sm:$0xff]  ;;  %vm310_vm12 = vcmp.eq.s32.totalorder %v8589_v10, %v8913_v2  ;;  %vm336_vm13 = vcmp.eq.s32.totalorder %v8589_v10, %v8976_v30 }
  0x40   :  { %7134 = vmatprep.subr.mxu1 %v657_v4  ;;  %7097 = vmatpush3.msra.mxu0 %v609_v8  ;;  %v684_v4 = vld [vmem:[%s10742_s20 + $0x258] sm:$0xff]  ;;  %v683_v8 = vld [vmem:[%s10742_s20 + $0x250] sm:$0xff]  ;;  %vm362_vm14 = vcmp.eq.s32.totalorder %v8589_v10, %v8987_v34  ;;  %v6755_v18 = vsel %vm336_vm13, 1.0, %v8455_v27  ;;  %vm388_vm15 = vcmp.eq.s32.totalorder %v8589_v10, %v8990_v35  ;;  %vm414_vm4 = vcmp.eq.s32.totalorder %v8589_v10, %v9015_v46 }
  0x41   :  { %805 = vmatprep.mubr.f32.mxu0 %v8755_v1  ;;  %7135 = vmatpush3.msra.mxu1 %v641_v12  ;;  %v511_v1 = vsel %vm508_vm2, %v502_v23, %v6694_v14  ;;  %v6746_v12 = vsel %vm310_vm12, 1.0, %v8455_v27  ;;  %v716_v14 = vld [vmem:[%s10742_s20 + $0x358] sm:$0xff]  ;;  %v6773_v23 = vsel %vm388_vm15, 1.0, %v8455_v27  ;;  %vm440_vm7 = vcmp.eq.s32.totalorder %v8589_v10, %v9024_v50 }
  0x42   :  { %880 = vmatprep.mubr.f32.mxu1 %v548_v59  ;;  %806 = vmatmul.mubr.f32.vlgmr.msra.gmra.mxu0 %v545_v13  ;;  %v520_v31 = vsel %vm517_vm3, %v511_v1, %v6703_v17  ;;  %v554_v59 = vsel %vm490_vm0, %v6738_v15, %v6747_v39  ;;  %v9084_v13 = vadd.s32 640, %v8589_v10  ;;  %v682_v15 = vld [vmem:[%s10742_s20 + $0x248] sm:$0xff]  ;;  %vm466_vm9 = vcmp.eq.s32.totalorder %v8589_v10, %v9027_v51 }
  0x43   :  { %7142 = vmatprep.subr.mxu0 %v704_v19  ;;  %v529_v36 = vsel %vm526_vm5, %v520_v31, %v6712_v20  ;;  %966 = vmatprep.subr.mxu1 %v8455_v27  ;;  %v562_v0 = vsel %vm499_vm1, %v554_v59, %v6756_v44  ;;  %v697_v19 = vld [vmem:[%s10742_s20 + $0x2c0] sm:$0xff]  ;;  %v553_v31 = vsel %vm490_vm0, %v6737_v6, %v6746_v12  ;;  %v714_v39 = vld [vmem:[%s10742_s20 + $0x348] sm:$0xff] }
  0x44   :  { %7143 = vmatpush3.msra.mxu0 %v688_v25  ;;  %v538_v40 = vsel %vm535_vm8, %v529_v36, %v6721_v22  ;;  %v570_v5 = vsel %vm508_vm2, %v562_v0, %v6765_v45  ;;  %v6764_v22 = vsel %vm362_vm14, 1.0, %v8455_v27  ;;  %v715_v25 = vld [vmem:[%s10742_s20 + $0x350] sm:$0xff]  ;;  %v6791_v36 = vsel %vm440_vm7, 1.0, %v8455_v27  ;;  %v712_v0 = vld [vmem:[%s10742_s20 + $0x338] sm:$0xff]  ;;  %v677_v12 = vld [vmem:[%s10742_s20 + $0x220] sm:$0xff] }
  0x45   :  { %7144 = vmatprep.subr.mxu0 %v703_v28  ;;  %v547_v48 = vsel %vm544_vm10, %v538_v40, %v6730_v26  ;;  %v578_v11 = vsel %vm517_vm3, %v570_v5, %v6774_v57  ;;  %v681_v26 = vld [vmem:[%s10742_s20 + $0x240] sm:$0xff]  ;;  %v6782_v28 = vsel %vm414_vm4, 1.0, %v8455_v27  ;;  %vm81_vm11 = vcmp.eq.s32.totalorder %v9084_v13, %v8630_v21  ;;  %v680_v40 = vld [vmem:[%s10742_s20 + $0x238] sm:$0xff]  ;;  %v695_v45 = vld [vmem:[%s10742_s20 + $0x2b0] sm:$0xff] }
  0x46   :  { %7145 = vmatpush3.msra.mxu0 %v687_v32  ;;  %881 = vmatmul.mubr.f32.vlgmr.msra.gmra.mxu1 %v547_v48  ;;  %v586_v17 = vsel %vm526_vm5, %v578_v11, %v6783_v61  ;;  %v696_v32 = vld [vmem:[%s10742_s20 + $0x2b8] sm:$0xff]  ;;  %vm107_vm6 = vcmp.eq.s32.totalorder %v9084_v13, %v8643_v24  ;;  %v6670_v44 = vsel %vm81_vm11, 1.0, %v8455_v27  ;;  %vm133_vm12 = vcmp.eq.s32.totalorder %v9084_v13, %v8659_v29  ;;  %v694_v61 = vld [vmem:[%s10742_s20 + $0x2a8] sm:$0xff]  ;;  %v711_v11 = vld [vmem:[%s10742_s20 + $0x330] sm:$0xff] }
  0x47   :  { %7146 = vmatprep.subr.mxu0 %v702_v38  ;;  %967 = vmatpush1.msra.mxu1 %v720_v41  ;;  %v594_v20 = vsel %vm535_vm8, %v586_v17, %v6792_v62  ;;  %v561_v38 = vsel %vm499_vm1, %v553_v31, %v6755_v18  ;;  %v6800_v41 = vsel %vm466_vm9, 1.0, %v8455_v27  ;;  %vm159_vm13 = vcmp.eq.s32.totalorder %v9084_v13, %v8671_v33  ;;  %v692_v18 = vld [vmem:[%s10742_s20 + $0x298] sm:$0xff]  ;;  %v691_v31 = vld [vmem:[%s10742_s20 + $0x290] sm:$0xff] }
  0x48   :  { %7147 = vmatpush3.msra.mxu0 %v686_v43  ;;  %968 = vmatprep.subr.mxu1 %v8455_v27  ;;  %v9115_v1 = vsel %vm544_vm10, %v594_v20, %v6801_v63  ;;  %v569_v43 = vsel %vm508_vm2, %v561_v38, %v6764_v22  ;;  %vm185_vm14 = vcmp.eq.s32.totalorder %v9084_v13, %v8683_v37  ;;  %v6688_v59 = vsel %vm133_vm12, 1.0, %v8455_v27  ;;  %v710_v22 = vld [vmem:[%s10742_s20 + $0x328] sm:$0xff]  ;;  %v709_v38 = vld [vmem:[%s10742_s20 + $0x320] sm:$0xff] }
  0x49   :  { %7148 = vmatprep.subr.mxu0 %v701_v49  ;;  %969 = vmatpush1.msra.mxu1 %v719_v53  ;;  %v577_v48 = vsel %vm517_vm3, %v569_v43, %v6773_v23  ;;  %v6679_v49 = vsel %vm107_vm6, 1.0, %v8455_v27  ;;  %v713_v53 = vld [vmem:[%s10742_s20 + $0x340] sm:$0xff]  ;;  %vm211_vm15 = vcmp.eq.s32.totalorder %v9084_v13, %v8696_v42  ;;  %v6706_v63 = vsel %vm185_vm14, 1.0, %v8455_v27  ;;  %v676_v23 = vld [vmem:[%s10742_s20 + $0x218] sm:$0xff]  ;;  %v675_v43 = vld [vmem:[%s10742_s20 + $0x210] sm:$0xff] }
  0x4a   :  { %7149 = vmatpush3.msra.mxu0 %v685_v56  ;;  %970 = vmatprep.subr.mxu1 %v8455_v27  ;;  %v679_v56 = vld [vmem:[%s10742_s20 + $0x230] sm:$0xff]  ;;  %v585_v57 = vsel %vm526_vm5, %v577_v48, %v6782_v28  ;;  %vm237_vm4 = vcmp.eq.s32.totalorder %v9084_v13, %v8709_v47  ;;  %vm263_vm7 = vcmp.eq.s32.totalorder %v9084_v13, %v8722_v52  ;;  %v708_v48 = vld [vmem:[%s10742_s20 + $0x318] sm:$0xff] }
  0x4b   :  { %7150 = vmatprep.subr.mxu0 %v700_v60  ;;  %971 = vmatpush1.msra.mxu1 %v718_v16  ;;  %v6697_v60 = vsel %vm159_vm13, 1.0, %v8455_v27  ;;  %v593_v62 = vsel %vm535_vm8, %v585_v57, %v6791_v36  ;;  %v678_v16 = vld [vmem:[%s10742_s20 + $0x228] sm:$0xff]  ;;  %v6724_v5 = vsel %vm237_vm4, 1.0, %v8455_v27  ;;  %v496_v6 = vsel %vm490_vm0, %v6670_v44, %v6679_v49 }
  0x4c   :  { %7151 = vmatpush3.msra.mxu0 %v684_v4  ;;  %972 = vmatprep.subr.mxu1 %v8455_v27  ;;  %v6715_v4 = vsel %vm211_vm15, 1.0, %v8455_v27  ;;  %vm287_vm9 = vcmp.eq.s32.totalorder %v8736_v58, %v8881_v55  ;;  %vm313_vm11 = vcmp.eq.s32.totalorder %v8736_v58, %v8913_v2  ;;  %vm339_vm6 = vcmp.eq.s32.totalorder %v8736_v58, %v8976_v30  ;;  %v690_v57 = vld [vmem:[%s10742_s20 + $0x288] sm:$0xff] }
  0x4d   :  { %7152 = vmatprep.subr.mxu0 %v699_v7  ;;  %973 = vmatpush1.msra.mxu1 %v717_v3  ;;  %v9180_v3 = vsel %vm544_vm10, %v593_v62, %v6800_v41  ;;  %v693_v7 = vld [vmem:[%s10742_s20 + $0x2a0] sm:$0xff]  ;;  %v9209_v17 = vsel %vm287_vm9, 1.0, %v8455_v27  ;;  %v6749_v20 = vsel %vm313_vm11, 1.0, %v8455_v27  ;;  %v6758_v41 = vsel %vm339_vm6, 1.0, %v8455_v27 }
  0x4e   :  { %7153 = vmatpush3.msra.mxu0 %v683_v8  ;;  %974 = vmatprep.subr.mxu1 %v8455_v27  ;;  %v505_v8 = vsel %vm499_vm1, %v496_v6, %v6688_v59  ;;  %vm365_vm6 = vcmp.eq.s32.totalorder %v8736_v58, %v8987_v34  ;;  %v556_v6 = vsel %vm490_vm0, %v9209_v17, %v6749_v20 }
  0x4f   :  { %7154 = vmatprep.subr.mxu0 %v698_v9  ;;  %975 = vmatpush1.msra.mxu1 %v716_v14  ;;  %v9190_v9 = vadd.s32 512, %v8589_v10  ;;  %v6733_v14 = vsel %vm263_vm7, 1.0, %v8455_v27 }
  0x50   :  { %7155 = vmatpush3.msra.mxu0 %v682_v15  ;;  %976 = vmatprep.subr.mxu1 %v8455_v27  ;;  %v514_v15 = vsel %vm508_vm2, %v505_v8, %v6697_v60 }
  0x51   :  { %7156 = vmatprep.subr.mxu0 %v697_v19  ;;  %977 = vmatpush1.msra.mxu1 %v715_v25  ;;  %v523_v19 = vsel %vm517_vm3, %v514_v15, %v6706_v63  ;;  %vm80_vm12 = vcmp.eq.s32.totalorder %v9190_v9, %v8630_v21  ;;  %vm106_vm13 = vcmp.eq.s32.totalorder %v9190_v9, %v8643_v24  ;;  %v6767_v63 = vsel %vm365_vm6, 1.0, %v8455_v27 }
  0x52   :  { %7157 = vmatpush3.msra.mxu0 %v681_v26  ;;  %978 = vmatprep.subr.mxu1 %v8455_v27  ;;  %v532_v25 = vsel %vm526_vm5, %v523_v19, %v6715_v4  ;;  %v6669_v26 = vsel %vm80_vm12, 1.0, %v8455_v27  ;;  %v6678_v28 = vsel %vm106_vm13, 1.0, %v8455_v27  ;;  %vm132_vm14 = vcmp.eq.s32.totalorder %v9190_v9, %v8659_v29 }
  0x53   :  { %7158 = vmatprep.subr.mxu0 %v696_v32  ;;  %979 = vmatpush1.msra.mxu1 %v714_v39  ;;  %v541_v32 = vsel %vm535_vm8, %v532_v25, %v6724_v5  ;;  %v6687_v36 = vsel %vm132_vm14, 1.0, %v8455_v27  ;;  %vm158_vm15 = vcmp.eq.s32.totalorder %v9190_v9, %v8671_v33  ;;  %vm184_vm4 = vcmp.eq.s32.totalorder %v9190_v9, %v8683_v37  ;;  %v733_v25 = vld [vmem:[%s10742_s20 + $0x3e0] sm:$0xff] }
  0x54   :  { %7159 = vmatpush3.msra.mxu0 %v680_v40  ;;  %980 = vmatprep.subr.mxu1 %v8455_v27  ;;  %v9248_v39 = vsel %vm544_vm10, %v541_v32, %v6733_v14  ;;  %v6696_v40 = vsel %vm158_vm15, 1.0, %v8455_v27  ;;  %vm210_vm7 = vcmp.eq.s32.totalorder %v9190_v9, %v8696_v42  ;;  %v6705_v44 = vsel %vm184_vm4, 1.0, %v8455_v27 }
  0x55   :  { %7160 = vmatprep.subr.mxu0 %v695_v45  ;;  %981 = vmatpush1.msra.mxu1 %v713_v53  ;;  %vm236_vm9 = vcmp.eq.s32.totalorder %v9190_v9, %v8709_v47  ;;  %vm262_vm11 = vcmp.eq.s32.totalorder %v9190_v9, %v8722_v52  ;;  %v495_v45 = vsel %vm490_vm0, %v6669_v26, %v6678_v28  ;;  %v6714_v49 = vsel %vm210_vm7, 1.0, %v8455_v27 }
  0x56   :  { %7161 = vmatpush3.msra.mxu0 %v679_v56  ;;  %982 = vmatprep.subr.mxu1 %v8455_v27  ;;  %v6723_v53 = vsel %vm236_vm9, 1.0, %v8455_v27  ;;  %v504_v56 = vsel %vm499_vm1, %v495_v45, %v6687_v36  ;;  %v6732_v59 = vsel %vm262_vm11, 1.0, %v8455_v27  ;;  %vm391_vm12 = vcmp.eq.s32.totalorder %v8736_v58, %v8990_v35 }
  0x57   :  { %7162 = vmatprep.subr.mxu0 %v694_v61  ;;  %983 = vmatpush1.msra.mxu1 %v712_v0  ;;  %v513_v60 = vsel %vm508_vm2, %v504_v56, %v6696_v40  ;;  %vm417_vm13 = vcmp.eq.s32.totalorder %v8736_v58, %v9015_v46  ;;  %v707_v61 = vld [vmem:[%s10742_s20 + $0x310] sm:$0xff]  ;;  %v6776_v0 = vsel %vm391_vm12, 1.0, %v8455_v27  ;;  %vm443_vm14 = vcmp.eq.s32.totalorder %v8736_v58, %v9024_v50 }
  0x58   :  { %7163 = vmatpush3.msra.mxu0 %v678_v16  ;;  %984 = vmatprep.subr.mxu1 %v8455_v27  ;;  %v522_v62 = vsel %vm517_vm3, %v513_v60, %v6705_v44  ;;  %v674_v16 = vld [vmem:[%s10742_s20 + $0x208] sm:$0xff]  ;;  %v6785_v5 = vsel %vm417_vm13, 1.0, %v8455_v27  ;;  %vm469_vm15 = vcmp.eq.s32.totalorder %v8736_v58, %v9027_v51  ;;  %v564_v58 = vsel %vm499_vm1, %v556_v6, %v6758_v41  ;;  %v731_v44 = vld [vmem:[%s10742_s20 + $0x3d0] sm:$0xff] }
  0x59   :  { %7164 = vmatprep.subr.mxu0 %v693_v7  ;;  %985 = vmatpush1.msra.mxu1 %v711_v11  ;;  %v531_v4 = vsel %vm526_vm5, %v522_v62, %v6714_v49  ;;  %v689_v7 = vld [vmem:[%s10742_s20 + $0x280] sm:$0xff]  ;;  %v6794_v11 = vsel %vm443_vm14, 1.0, %v8455_v27  ;;  %vm286_vm4 = vcmp.eq.s32.totalorder %v8878_v54, %v8881_v55  ;;  %v6803_v15 = vsel %vm469_vm15, 1.0, %v8455_v27 }
  0x5a   :  { %7165 = vmatpush3.msra.mxu0 %v677_v12  ;;  %986 = vmatprep.subr.mxu1 %v8455_v27  ;;  %v540_v8 = vsel %vm535_vm8, %v531_v4, %v6723_v53  ;;  %v673_v12 = vld [vmem:[%s10742_s20 + $0x200] sm:$0xff]  ;;  %v572_v17 = vsel %vm508_vm2, %v564_v58, %v6767_v63  ;;  %vm312_vm7 = vcmp.eq.s32.totalorder %v8878_v54, %v8913_v2  ;;  %v6739_v19 = vsel %vm286_vm4, 1.0, %v8455_v27 }
  0x5b   :  { %7166 = vmatprep.subr.mxu0 %v692_v18  ;;  %987 = vmatpush1.msra.mxu1 %v710_v22  ;;  %v549_v14 = vsel %vm544_vm10, %v540_v8, %v6732_v59  ;;  %v580_v18 = vsel %vm517_vm3, %v572_v17, %v6776_v0  ;;  %vm338_vm9 = vcmp.eq.s32.totalorder %v8878_v54, %v8976_v30  ;;  %v6748_v22 = vsel %vm312_vm7, 1.0, %v8455_v27 }
  0x5c   :  { %7167 = vmatpush3.msra.mxu0 %v676_v23  ;;  %988 = vmatprep.subr.mxu1 %v8455_v27  ;;  %vm364_vm11 = vcmp.eq.s32.totalorder %v8878_v54, %v8987_v34  ;;  %v588_v20 = vsel %vm526_vm5, %v580_v18, %v6785_v5  ;;  %v6757_v23 = vsel %vm338_vm9, 1.0, %v8455_v27  ;;  %vm390_vm6 = vcmp.eq.s32.totalorder %v8878_v54, %v8990_v35 }
  0x5d   :  { %7168 = vmatprep.subr.mxu0 %v691_v31  ;;  %989 = vmatpush1.msra.mxu1 %v709_v38  ;;  %v596_v26 = vsel %vm535_vm8, %v588_v20, %v6794_v11  ;;  %v6766_v28 = vsel %vm364_vm11, 1.0, %v8455_v27  ;;  %vm416_vm12 = vcmp.eq.s32.totalorder %v8878_v54, %v9015_v46  ;;  %vm442_vm13 = vcmp.eq.s32.totalorder %v8878_v54, %v9024_v50  ;;  %v732_v38 = vld [vmem:[%s10742_s20 + $0x3d8] sm:$0xff] }
  0x5e   :  { %810 = vmatprep.mubr.f32.mxu0 %v9115_v1  ;;  %990 = vmatprep.subr.mxu1 %v8455_v27  ;;  %v706_v1 = vld [vmem:[%s10742_s20 + $0x308] sm:$0xff]  ;;  %v604_v31 = vsel %vm544_vm10, %v596_v26, %v6803_v15  ;;  %v6775_v32 = vsel %vm390_vm6, 1.0, %v8455_v27  ;;  %v6784_v36 = vsel %vm416_vm12, 1.0, %v8455_v27  ;;  %vm468_vm14 = vcmp.eq.s32.totalorder %v8878_v54, %v9027_v51  ;;  %v727_v15 = vld [vmem:[%s10742_s20 + $0x3b0] sm:$0xff] }
  0x5f   :  { %7169 = vmatpush3.msra.mxu0 %v675_v43  ;;  %991 = vmatpush1.msra.mxu1 %v708_v48  ;;  %v6793_v40 = vsel %vm442_vm13, 1.0, %v8455_v27  ;;  %v555_v41 = vsel %vm490_vm0, %v6739_v19, %v6748_v22  ;;  %vm289_vm15 = vcmp.eq.s32.totalorder %v9084_v13, %v8881_v55  ;;  %vm315_vm4 = vcmp.eq.s32.totalorder %v9084_v13, %v8913_v2 }
  0x60   :  { %811 = vmatmul.mubr.f32.gmra.mxu0 %v9180_v3  ;;  %992 = vmatprep.subr.mxu1 %v8455_v27  ;;  %v705_v3 = vld [vmem:[%s10742_s20 + $0x300] sm:$0xff]  ;;  %v6802_v54 = vsel %vm468_vm14, 1.0, %v8455_v27  ;;  %v6742_v43 = vsel %vm289_vm15, 1.0, %v8455_v27  ;;  %vm341_vm7 = vcmp.eq.s32.totalorder %v9084_v13, %v8976_v30  ;;  %v6751_v48 = vsel %vm315_vm4, 1.0, %v8455_v27 }
  0x61   :  { %7170 = vmatprep.subr.mxu0 %v690_v57  ;;  %993 = vmatpush1.msra.mxu1 %v707_v61  ;;  %vm367_vm9 = vcmp.eq.s32.totalorder %v9084_v13, %v8987_v34  ;;  %vm393_vm11 = vcmp.eq.s32.totalorder %v9084_v13, %v8990_v35  ;;  %v6760_v53 = vsel %vm341_vm7, 1.0, %v8455_v27  ;;  %vm419_vm6 = vcmp.eq.s32.totalorder %v9084_v13, %v9015_v46  ;;  %v730_v57 = vld [vmem:[%s10742_s20 + $0x3c8] sm:$0xff] }
  0x62   :  { %7171 = vmatpush3.msra.mxu0 %v674_v16  ;;  %994 = vmatprep.subr.mxu1 %v8455_v27  ;;  %v6769_v56 = vsel %vm367_vm9, 1.0, %v8455_v27  ;;  %v6778_v60 = vsel %vm393_vm11, 1.0, %v8455_v27  ;;  %vm445_vm12 = vcmp.eq.s32.totalorder %v9084_v13, %v9024_v50  ;;  %vm471_vm13 = vcmp.eq.s32.totalorder %v9084_v13, %v9027_v51  ;;  %v729_v16 = vld [vmem:[%s10742_s20 + $0x3c0] sm:$0xff] }
  0x63   :  { %7172 = vmatprep.subr.mxu0 %v689_v7  ;;  %995 = vmatpush1.msra.mxu1 %v706_v1  ;;  %v6787_v62 = vsel %vm419_vm6, 1.0, %v8455_v27  ;;  %v6796_v63 = vsel %vm445_vm12, 1.0, %v8455_v27  ;;  %v558_v0 = vsel %vm490_vm0, %v6742_v43, %v6751_v48  ;;  %vm288_vm14 = vcmp.eq.s32.totalorder %v9190_v9, %v8881_v55  ;;  %v728_v7 = vld [vmem:[%s10742_s20 + $0x3b8] sm:$0xff] }
  0x64   :  { %7173 = vmatpush3.msra.mxu0 %v673_v12  ;;  %996 = vmatprep.subr.mxu1 %v8455_v27  ;;  %v566_v5 = vsel %vm499_vm1, %v558_v0, %v6760_v53  ;;  %vm314_vm15 = vcmp.eq.s32.totalorder %v9190_v9, %v8913_v2  ;;  %v6805_v13 = vsel %vm471_vm13, 1.0, %v8455_v27  ;;  %v6741_v1 = vsel %vm288_vm14, 1.0, %v8455_v27  ;;  %v724_v43 = vld [vmem:[%s10742_s20 + $0x398] sm:$0xff]  ;;  %v722_v0 = vld [vmem:[%s10742_s20 + $0x388] sm:$0xff] }
  0x65   :  { %955 = vmatprep.mubr.f32.mxu0 %v9248_v39  ;;  %997 = vmatpush1.msra.mxu1 %v705_v3  ;;  %v563_v39 = vsel %vm499_vm1, %v555_v41, %v6757_v23  ;;  %v574_v6 = vsel %vm508_vm2, %v566_v5, %v6769_v56  ;;  %vm340_vm4 = vcmp.eq.s32.totalorder %v9190_v9, %v8976_v30  ;;  %v6750_v11 = vsel %vm314_vm15, 1.0, %v8455_v27  ;;  %v726_v23 = vld [vmem:[%s10742_s20 + $0x3a8] sm:$0xff]  ;;  %v721_v5 = vld [vmem:[%s10742_s20 + $0x380] sm:$0xff] }
  0x66   :  { %956 = vmatmul.mubr.f32.vlgmr.msra.gmra.mxu0 %v549_v14  ;;  %1004 = vmatprep.subr.mxu1 %v8455_v27  ;;  %v571_v45 = vsel %vm508_vm2, %v563_v39, %v6766_v28  ;;  %v582_v8 = vsel %vm517_vm3, %v574_v6, %v6778_v60  ;;  %vm366_vm7 = vcmp.eq.s32.totalorder %v9190_v9, %v8987_v34  ;;  %v6759_v12 = vsel %vm340_vm4, 1.0, %v8455_v27 }
  0x67   :  { %885 = vmatprep.mubr.f32.mxu1 %v604_v31  ;;  %1005 = vmatpush2.msra.mxu1 %v733_v25  ;;  %v579_v49 = vsel %vm517_vm3, %v571_v45, %v6775_v32  ;;  %vm392_vm9 = vcmp.eq.s32.totalorder %v9190_v9, %v8990_v35  ;;  %v590_v58 = vsel %vm526_vm5, %v582_v8, %v6787_v62  ;;  %v6768_v14 = vsel %vm366_vm7, 1.0, %v8455_v27 }
  0x68   :  { %7468 = vmatprep.subr.bf16.mxu0 %v8455_v27  ;;  %1006 = vmatprep.subr.mxu1 %v8455_v27  ;;  %v587_v59 = vsel %vm526_vm5, %v579_v49, %v6784_v36  ;;  %vm418_vm11 = vcmp.eq.s32.totalorder %v9190_v9, %v9015_v46  ;;  %v598_v17 = vsel %vm535_vm8, %v590_v58, %v6796_v63  ;;  %v6777_v3 = vsel %vm392_vm9, 1.0, %v8455_v27  ;;  %v725_v36 = vld [vmem:[%s10742_s20 + $0x3a0] sm:$0xff] }
  0x69   :  { %1007 = vmatpush2.msra.mxu1 %v732_v38  ;;  %v595_v61 = vsel %vm535_vm8, %v587_v59, %v6793_v40  ;;  %vm444_vm6 = vcmp.eq.s32.totalorder %v9190_v9, %v9024_v50  ;;  %vm470_vm12 = vcmp.eq.s32.totalorder %v9190_v9, %v9027_v51  ;;  %v606_v18 = vsel %vm544_vm10, %v598_v17, %v6805_v13  ;;  %v723_v59 = vld [vmem:[%s10742_s20 + $0x390] sm:$0xff] }
  0x6a   :  { %1008 = vmatprep.subr.mxu1 %v8455_v27  ;;  %v603_v4 = vsel %vm544_vm10, %v595_v61, %v6802_v54  ;;  %v6786_v19 = vsel %vm418_vm11, 1.0, %v8455_v27  ;;  %v6795_v20 = vsel %vm444_vm6, 1.0, %v8455_v27  ;;  %v557_v22 = vsel %vm490_vm0, %v6741_v1, %v6750_v11  ;;  %960 = vmatprep.mubr.f32.mxu0 %v606_v18 }
  0x6b   :  { %1009 = vmatpush2.msra.mxu1 %v731_v44  ;;  %v6804_v25 = vsel %vm470_vm12, 1.0, %v8455_v27  ;;  %v565_v9 = vsel %vm499_vm1, %v557_v22, %v6759_v12  ;;  %v9451_v26 = vadd.s32 896, %v8589_v10  ;;  %v9454_v28 = vadd.s32 768, %v8589_v10 }
  0x6c   :  { %1010 = vmatprep.subr.mxu1 %v8455_v27  ;;  %886 = vmatmul.mubr.f32.gmra.mxu1 %v603_v4  ;;  %v573_v31 = vsel %vm508_vm2, %v565_v9, %v6768_v14  ;;  %vm734_vm4 = vcmask 850944  }
  0x6d   :  { %1011 = vmatpush2.msra.mxu1 %v730_v57  ;;  %v581_v32 = vsel %vm517_vm3, %v573_v31, %v6777_v3  ;;  %vm83_vm13 = vcmp.eq.s32.totalorder %v9451_v26, %v8630_v21  ;;  %vm109_vm14 = vcmp.eq.s32.totalorder %v9451_v26, %v8643_v24  ;;  %vm135_vm15 = vcmp.eq.s32.totalorder %v9451_v26, %v8659_v29 }
  0x6e   :  { %1012 = vmatprep.subr.mxu1 %v8455_v27  ;;  %v589_v10 = vsel %vm526_vm5, %v581_v32, %v6786_v19  ;;  %v6672_v38 = vsel %vm83_vm13, 1.0, %v8455_v27  ;;  %v6681_v40 = vsel %vm109_vm14, 1.0, %v8455_v27  ;;  %v6690_v41 = vsel %vm135_vm15, 1.0, %v8455_v27 }
  0x6f   :  { %1013 = vmatpush2.msra.mxu1 %v729_v16  ;;  %v597_v54 = vsel %vm535_vm8, %v589_v10, %v6795_v20  ;;  %vm161_vm7 = vcmp.eq.s32.totalorder %v9451_v26, %v8671_v33  ;;  %vm187_vm9 = vcmp.eq.s32.totalorder %v9451_v26, %v8683_v37  ;;  %vm213_vm11 = vcmp.eq.s32.totalorder %v9451_v26, %v8696_v42 }
  0x70   :  { %1014 = vmatprep.subr.mxu1 %v8455_v27  ;;  %v605_v39 = vsel %vm544_vm10, %v597_v54, %v6804_v25  ;;  %v6699_v44 = vsel %vm161_vm7, 1.0, %v8455_v27  ;;  %v6708_v45 = vsel %vm187_vm9, 1.0, %v8455_v27  ;;  %v6717_v48 = vsel %vm213_vm11, 1.0, %v8455_v27 }
  0x71   :  { %1015 = vmatpush2.msra.mxu1 %v728_v7  ;;  %961 = vmatmul.mubr.f32.gmra.mxu0 %v605_v39  ;;  %vm239_vm6 = vcmp.eq.s32.totalorder %v9451_v26, %v8709_v47  ;;  %vm265_vm12 = vcmp.eq.s32.totalorder %v9451_v26, %v8722_v52  ;;  %v498_v49 = vsel %vm490_vm0, %v6672_v38, %v6681_v40 }
  0x72   :  { %1016 = vmatprep.subr.mxu1 %v8455_v27  ;;  %v6726_v53 = vsel %vm239_vm6, 1.0, %v8455_v27  ;;  %v6735_v56 = vsel %vm265_vm12, 1.0, %v8455_v27  ;;  %v507_v57 = vsel %vm499_vm1, %v498_v49, %v6690_v41  ;;  %vm82_vm13 = vcmp.eq.s32.totalorder %v9454_v28, %v8630_v21 }
  0x73   :  { %1017 = vmatpush2.msra.mxu1 %v727_v15  ;;  %v516_v60 = vsel %vm508_vm2, %v507_v57, %v6699_v44  ;;  %v6671_v61 = vsel %vm82_vm13, 1.0, %v8455_v27  ;;  %vm108_vm14 = vcmp.eq.s32.totalorder %v9454_v28, %v8643_v24  ;;  %vm134_vm15 = vcmp.eq.s32.totalorder %v9454_v28, %v8659_v29 }
  0x74   :  { %1018 = vmatprep.subr.mxu1 %v8455_v27  ;;  %v525_v62 = vsel %vm517_vm3, %v516_v60, %v6708_v45  ;;  %v6680_v21 = vsel %vm108_vm14, 1.0, %v8455_v27  ;;  %v6689_v63 = vsel %vm134_vm15, 1.0, %v8455_v27  ;;  %vm160_vm7 = vcmp.eq.s32.totalorder %v9454_v28, %v8671_v33 }
  0x75   :  { %1019 = vmatpush2.msra.mxu1 %v726_v23  ;;  %v534_v24 = vsel %vm526_vm5, %v525_v62, %v6717_v48  ;;  %v6698_v29 = vsel %vm160_vm7, 1.0, %v8455_v27  ;;  %vm186_vm9 = vcmp.eq.s32.totalorder %v9454_v28, %v8683_v37  ;;  %vm212_vm11 = vcmp.eq.s32.totalorder %v9454_v28, %v8696_v42 }
  0x76   :  { %1020 = vmatprep.subr.mxu1 %v8455_v27  ;;  %v543_v16 = vsel %vm535_vm8, %v534_v24, %v6726_v53  ;;  %v6707_v33 = vsel %vm186_vm9, 1.0, %v8455_v27  ;;  %v6716_v4 = vsel %vm212_vm11, 1.0, %v8455_v27  ;;  %vm238_vm6 = vcmp.eq.s32.totalorder %v9454_v28, %v8709_v47 }
  0x77   :  { %1021 = vmatpush2.msra.mxu1 %v725_v36  ;;  %v552_v37 = vsel %vm544_vm10, %v543_v16, %v6735_v56  ;;  %v6725_v42 = vsel %vm238_vm6, 1.0, %v8455_v27  ;;  %vm264_vm12 = vcmp.eq.s32.totalorder %v9454_v28, %v8722_v52  ;;  %v497_v13 = vsel %vm490_vm0, %v6671_v61, %v6680_v21 }
  0x78   :  { %1022 = vmatprep.subr.mxu1 %v8455_v27  ;;  %6808 = vmatprep.mubr.msk.f32.mxu1 %vm734_vm4, %v552_v37  ;;  %v6734_v47 = vsel %vm264_vm12, 1.0, %v8455_v27  ;;  %v506_v6 = vsel %vm499_vm1, %v497_v13, %v6689_v63  ;;  %vm291_vm13 = vcmp.eq.s32.totalorder %v9451_v26, %v8881_v55  ;;  %vm317_vm14 = vcmp.eq.s32.totalorder %v9451_v26, %v8913_v2 }
  0x79   :  { %1023 = vmatpush2.msra.mxu1 %v724_v43  ;;  %v515_v1 = vsel %vm508_vm2, %v506_v6, %v6698_v29  ;;  %v6744_v52 = vsel %vm291_vm13, 1.0, %v8455_v27  ;;  %v6753_v7 = vsel %vm317_vm14, 1.0, %v8455_v27  ;;  %vm343_vm15 = vcmp.eq.s32.totalorder %v9451_v26, %v8976_v30 }
  0x7a   :  { %1024 = vmatprep.subr.mxu1 %v8455_v27  ;;  %v524_v8 = vsel %vm517_vm3, %v515_v1, %v6707_v33  ;;  %v6762_v11 = vsel %vm343_vm15, 1.0, %v8455_v27  ;;  %vm369_vm7 = vcmp.eq.s32.totalorder %v9451_v26, %v8987_v34  ;;  %vm395_vm9 = vcmp.eq.s32.totalorder %v9451_v26, %v8990_v35 }
  0x7b   :  { %1025 = vmatpush2.msra.mxu1 %v723_v59  ;;  %v533_v58 = vsel %vm526_vm5, %v524_v8, %v6716_v4  ;;  %v6771_v12 = vsel %vm369_vm7, 1.0, %v8455_v27  ;;  %v6780_v14 = vsel %vm395_vm9, 1.0, %v8455_v27  ;;  %vm421_vm11 = vcmp.eq.s32.totalorder %v9451_v26, %v9015_v46 }
  0x7c   :  { %1026 = vmatprep.subr.mxu1 %v8455_v27  ;;  %v542_v15 = vsel %vm535_vm8, %v533_v58, %v6725_v42  ;;  %v6789_v17 = vsel %vm421_vm11, 1.0, %v8455_v27  ;;  %vm447_vm6 = vcmp.eq.s32.totalorder %v9451_v26, %v9024_v50  ;;  %vm473_vm12 = vcmp.eq.s32.totalorder %v9451_v26, %v9027_v51 }
  0x7d   :  { %1027 = vmatpush2.msra.mxu1 %v722_v0  ;;  %v551_v3 = vsel %vm544_vm10, %v542_v15, %v6734_v47  ;;  %v6798_v18 = vsel %vm447_vm6, 1.0, %v8455_v27  ;;  %v6807_v19 = vsel %vm473_vm12, 1.0, %v8455_v27  ;;  %v560_v20 = vsel %vm490_vm0, %v6744_v52, %v6753_v7 }
  0x7e   :  { %1028 = vmatprep.subr.mxu1 %v8455_v27  ;;  %v568_v22 = vsel %vm499_vm1, %v560_v20, %v6762_v11  ;;  %vm290_vm13 = vcmp.eq.s32.totalorder %v9454_v28, %v8881_v55  ;;  %vm316_vm14 = vcmp.eq.s32.totalorder %v9454_v28, %v8913_v2  ;;  %vm342_vm15 = vcmp.eq.s32.totalorder %v9454_v28, %v8976_v30 }
  0x7f   :  { %1029 = vmatpush2.msra.mxu1 %v721_v5  ;;  %v576_v23 = vsel %vm508_vm2, %v568_v22, %v6771_v12  ;;  %v6743_v25 = vsel %vm290_vm13, 1.0, %v8455_v27  ;;  %v6752_v9 = vsel %vm316_vm14, 1.0, %v8455_v27  ;;  %v6761_v26 = vsel %vm342_vm15, 1.0, %v8455_v27 }
  0x80   :  { %7500 = vmatprep.subr.bf16.mxu1 %v8455_v27  ;;  %1031 = vmatmul.mubr.f32.vlgmr.msra.gmra.mxu1 %v551_v3  ;;  %v584_v31 = vsel %vm517_vm3, %v576_v23, %v6780_v14  ;;  %vm368_vm7 = vcmp.eq.s32.totalorder %v9454_v28, %v8987_v34  ;;  %vm394_vm9 = vcmp.eq.s32.totalorder %v9454_v28, %v8990_v35 }
  0x81   :  { %vm420_vm11 = vcmp.eq.s32.totalorder %v9454_v28, %v9015_v46  ;;  %v592_v55 = vsel %vm526_vm5, %v584_v31, %v6789_v17  ;;  %v6770_v2 = vsel %vm368_vm7, 1.0, %v8455_v27  ;;  %v6779_v30 = vsel %vm394_vm9, 1.0, %v8455_v27 }
  0x82   :  { %v6788_v32 = vsel %vm420_vm11, 1.0, %v8455_v27  ;;  %v600_v10 = vsel %vm535_vm8, %v592_v55, %v6798_v18  ;;  %vm446_vm6 = vcmp.eq.s32.totalorder %v9454_v28, %v9024_v50  ;;  %vm472_vm12 = vcmp.eq.s32.totalorder %v9454_v28, %v9027_v51 }
  0x83   :  { %v559_v34 = vsel %vm490_vm0, %v6743_v25, %v6752_v9  ;;  %v608_v35 = vsel %vm544_vm10, %v600_v10, %v6807_v19  ;;  %v6797_v46 = vsel %vm446_vm6, 1.0, %v8455_v27  ;;  %v6806_v36 = vsel %vm472_vm12, 1.0, %v8455_v27 }
  0x84   :  { %v567_v38 = vsel %vm499_vm1, %v559_v34, %v6761_v26  ;;  %6809 = vmatprep.mubr.msk.f32.mxu1 %vm734_vm4, %v608_v35 }
  0x85   :  { %v575_v40 = vsel %vm508_vm2, %v567_v38, %v6770_v2 }
  0x86   :  { %v583_v41 = vsel %vm517_vm3, %v575_v40, %v6779_v30 }
  0x87   :  { %v591_v50 = vsel %vm526_vm5, %v583_v41, %v6788_v32 }
  0x88   :  { %29 = vsyncpa [#allocation5], 0  ;;  %v599_v51 = vsel %vm535_vm8, %v591_v50, %v6797_v46  ;;  %s10743_s30 = sld [smem:[#allocation10_spill]]  ;;  %vm1046_vm0 = vcmask 261120   ;;  %v8258_v23 = vld [vmem:[%s10721_s5 + $0x8] sm:$0xff]   ;;  %v8259_v25 = vld [vmem:[%s10721_s5] sm:$0xff]  }
  0x89   :  { %v607_v28 = vsel %vm544_vm10, %v599_v51, %v6806_v36  ;;  %7469 = vmatpush3.bf16.msra.mxu0 %v8258_v23  ;;  %7501 = vmatpush3.bf16.msra.mxu1 %v8258_v23  ;;  %vm8456_vm1 = vmmov 0   ;;  %v6810_v10 = vld [vmem:[%s10719_s3] ss:$0 sm:$0xff]  ;;  %v8260_v38 = vld [vmem:[%s10721_s5 + $0x18] sm:$0xff]   ;;  %v8261_v41 = vld [vmem:[%s10721_s5 + $0x10] sm:$0xff]   ;;  %vm2262_vm2 = vcmask 64512  }
  0x8a   :  { %1036 = vmatmul.mubr.f32.gmra.mxu1 %v607_v28  ;;  %7470 = vmatprep.subr.bf16.mxu0 %v8455_v27  ;;  %v6811_v35 = vld [vmem:[%s10720_s4] ss:$0 sm:$0xff]  ;;  %s10744_s25 = sld [smem:[#allocation11_spill]]  ;;  %s8457_s0 = smov [#allocation4]  }
  0x8b   :  { %7502 = vmatprep.subr.bf16.mxu1 %v8455_v27  ;;  %7472 = vmatprep.mubr.msk.bf16.mxu0 %vm8456_vm1, %v8455_v27  ;;  %s6654_s24 = sshll.u32 %s8457_s0, 4  ;;  %s6655_s24 = int_to_ptr.vmem [resolvable:$true] %s6654_s24 }
  0x8c   :  { %7504 = vmatprep.mubr.msk.bf16.mxu1 %vm8456_vm1, %v8455_v27  ;;  %p8435_p6 = scmp.lt.s32.totalorder %s6655_s24, %s6655_s24 }
  0x8d   :  { %7471 = vmatpush3.bf16.msra.mxu0 %v8259_v25  ;;  %7503 = vmatpush3.bf16.msra.mxu1 %v8259_v25 }
  0x8e   :  { %v1041_v24 = vld [vmem:[%s10743_s30] sm:$0xff]  ;;  %7476 = vmatprep.subr.bf16.mxu0 %v8455_v27  ;;  %7516 = vmatprep.subr.bf16.mxu1 %v8455_v27 }
 0x102   :  { %v7098_v54 = vpop.f32.mrf.mxu0 }
 0x104   :  { %v7099_v39 = vpop.f32.mrf.mxu0 }
 0x105   :  { %v7100_v56 = vadd.f32 %v7099_v39, %v7098_v54  ;;  %v8262_v39 = vld [vmem:[%s10721_s5 + $0x28] sm:$0xff]  }
 0x106   :  { %v7136_v45 = vpop.f32.mrf.mxu1 }
 0x108   :  { %v7137_v49 = vpop.f32.mrf.mxu1 }
 0x109   :  { %v7138_v57 = vadd.f32 %v7137_v49, %v7136_v45  ;;  %v8265_v45 = vld [vmem:[%s10721_s5 + $0x38] sm:$0xff]   ;;  %v8267_v49 = vld [vmem:[%s10721_s5 + $0x30] sm:$0xff]  }
 0x10b   :  { %v883_v61 = vadd.f32 %v7138_v57, %v7100_v56  ;;  %v8268_v56 = vld [vmem:[%s10722_s6 + $0x28] sm:$0xff]   ;;  %v8269_v57 = vld [vmem:[%s10722_s6 + $0x20] sm:$0xff]  }
 0x120   :  { %v7101_v43 = vpop.f32.mrf.mxu0 }
 0x122   :  { %v7102_v44 = vpop.f32.mrf.mxu0 }
 0x123   :  { %v7103_v16 = vadd.f32 %v7102_v44, %v7101_v43  ;;  %v8263_v44 = vld [vmem:[%s10721_s5 + $0x20] sm:$0xff]  }
 0x126   :  { %v7174_v48 = vpop.f32.mrf.mxu0 }
 0x128   :  { %v7175_v53 = vpop.f32.mrf.mxu0 }
 0x129   :  { %v7176_v60 = vadd.f32 %v7175_v53, %v7174_v48  ;;  %v8264_v48 = vld [vmem:[%s10722_s6 + $0x8] sm:$0xff]   ;;  %v8266_v53 = vld [vmem:[%s10722_s6] sm:$0xff]  }
 0x12b   :  { %v958_v63 = vadd.f32 %v7176_v60, %v883_v61  ;;  %v8271_v60 = vld [vmem:[%s10722_s6 + $0x10] sm:$0xff]   ;;  %v8273_v61 = vld [vmem:[%s10722_s6 + $0x38] sm:$0xff]  }
 0x12c   :  { %v7139_v59 = vpop.f32.mrf.mxu1 }
 0x12e   :  { %v7140_v62 = vpop.f32.mrf.mxu1 }
 0x12f   :  { %v7141_v33 = vadd.f32 %v7140_v62, %v7139_v59  ;;  %v8270_v59 = vld [vmem:[%s10722_s6 + $0x18] sm:$0xff]   ;;  %v8272_v62 = vld [vmem:[%s10723_s7 + $0x8] sm:$0xff]  }
 0x131   :  { %v7177_v21 = vpop.f32.mrf.mxu0  ;;  %v888_v13 = vadd.f32 %v7141_v33, %v7103_v16  ;;  %v8279_v16 = vld [vmem:[%s10723_s7 + $0x10] sm:$0xff]   ;;  %v8280_v33 = vld [vmem:[%s10723_s7 + $0x38] sm:$0xff]  }
 0x133   :  { %v7178_v5 = vpop.f32.mrf.mxu0 }
 0x134   :  { %v7179_v47 = vadd.f32 %v7178_v5, %v7177_v21  ;;  %v8275_v21 = vld [vmem:[%s10722_s6 + $0x30] sm:$0xff]  }
 0x136   :  { %v963_v6 = vadd.f32 %v7179_v47, %v888_v13 }
 0x140   :  { %v1032_v0 = vpop.f32.mrf.mxu1 }
 0x141   :  { %v1033_v29 = vadd.f32 %v1032_v0, %v958_v63  ;;  %v8274_v63 = vld [vmem:[%s10723_s7] sm:$0xff]   ;;  %v8276_v0 = vld [vmem:[%s10723_s7 + $0x28] sm:$0xff]  }
 0x142   :  { %v1034_v4 = vpop.f32.mrf.mxu1 }
 0x143   :  { %v9613_v37 = vadd.f32 %v1041_v24, %v1033_v29  ;;  %v8278_v29 = vld [vmem:[%s10723_s7 + $0x18] sm:$0xff]   ;;  %v8281_v4 = vld [vmem:[%s10723_s7 + $0x30] sm:$0xff]  }
 0x145   :  { %v1047_v42 = vsel %vm1046_vm0, %v9613_v37, 0.0 }
 0x146   :  { %1048 = vadd.xlane.f32.xlu0 %v1047_v42 }
 0x14a   :  { %v1037_v1 = vpop.f32.mrf.mxu1 }
 0x14b   :  { %v1038_v52 = vadd.f32 %v1037_v1, %v963_v6 }
 0x14c   :  { %v1039_v7 = vpop.f32.mrf.mxu1 }
 0x14d   :  { %v9617_v8 = vadd.f32 %v1041_v24, %v1038_v52  ;;  %v8277_v24 = vld [vmem:[%s10723_s7 + $0x20] sm:$0xff]  }
 0x14f   :  { %v1050_v11 = vsel %vm1046_vm0, %v9617_v8, 0.0 }
 0x150   :  { %1051 = vadd.xlane.f32.xlu0 %v1050_v11 }
 0x1cf   :  { %v1049_v58 = vpop.xlane.xlu0 %1048 }
 0x1d0   :  { %v1054_v12 = vmul.f32 0.03125, %v1049_v58 }
 0x1d2   :  { %v1056_v14 = vsub.f32 %v9613_v37, %v1054_v12 }
 0x1d4   :  { %v1058_v15 = vmul.f32 %v1056_v14, %v1056_v14 }
 0x1d6   :  { %v1060_v17 = vsel %vm1046_vm0, %v1058_v15, 0.0 }
 0x1d7   :  { %1061 = vadd.xlane.f32.xlu1 %v1060_v17 }
 0x1d9   :  { %v1052_v3 = vpop.xlane.xlu0 %1051 }
 0x1da   :  { %v1055_v18 = vmul.f32 0.03125, %v1052_v3 }
 0x1dc   :  { %v1057_v19 = vsub.f32 %v9617_v8, %v1055_v18 }
 0x1de   :  { %v1059_v20 = vmul.f32 %v1057_v19, %v1057_v19 }
 0x1e0   :  { %v1063_v22 = vsel %vm1046_vm0, %v1059_v20, 0.0 }
 0x1e1   :  { %1064 = vadd.xlane.f32.xlu1 %v1063_v22 }
 0x260   :  { %v1062_v9 = vpop.xlane.xlu1 %1061 }
 0x261   :  { %v1066_v26 = vmul.f32 0.03125, %v1062_v9 }
 0x263   :  { %v1068_v31 = vadd.f32 1e-05, %v1066_v26 }
 0x265   :  { %8326 = vrsqrt.f32 %v1068_v31 }
 0x26a   :  { %v1065_v55 = vpop.xlane.xlu1 %1064 }
 0x26b   :  { %v1067_v2 = vmul.f32 0.03125, %v1065_v55 }
 0x26d   :  { %v1069_v30 = vadd.f32 1e-05, %v1067_v2 }
 0x26f   :  { %8328 = vrsqrt.f32 %v1069_v30 }
 0x272   :  { %v8327_v32 = vpop.eup %8326 }
 0x273   :  { %v1072_v34 = vmul.f32 %v8327_v32, %v1056_v14 }
 0x275   :  { %v1078_v46 = vmul.f32 %v6810_v10, %v1072_v34 }
 0x277   :  { %v1084_v36 = vadd.f32 %v6811_v35, %v1078_v46 }
 0x279   :  { %v9648_v40 = vpack.c.bf16 %v1084_v36, %v1084_v36 }
 0x27b   :  { %7473 = vmatmul.mubr.msk.bf16.vlgmr.msra.gmra.mxu0 %vm1046_vm0, %v9648_v40 }
 0x27c   :  { %7477 = vmatpush3.bf16.msra.mxu0 %v8260_v38  ;;  %7480 = vmatprep.mubr.msk.bf16.mxu0 %vm8456_vm1, %v8455_v27  ;;  %v8329_v50 = vpop.eup %8328 }
 0x27d   :  { %7478 = vmatprep.subr.bf16.mxu0 %v8455_v27  ;;  %v1073_v51 = vmul.f32 %v8329_v50, %v1057_v19 }
 0x27f   :  { %v1079_v28 = vmul.f32 %v6810_v10, %v1073_v51 }
 0x280   :  { %7479 = vmatpush3.bf16.msra.mxu0 %v8261_v41 }
 0x281   :  { %7484 = vmatprep.subr.bf16.mxu0 %v8455_v27  ;;  %v1085_v54 = vadd.f32 %v6811_v35, %v1079_v28 }
 0x283   :  { %7481 = vmatmul.mubr.msk.bf16.vlgmr.msra.gmra.mxu0 %vm1046_vm0, %v9648_v40  ;;  %v9664_v43 = vpack.c.bf16 %v1085_v54, %v1085_v54 }
 0x284   :  { %7485 = vmatpush3.bf16.msra.mxu0 %v8262_v39  ;;  %7488 = vmatprep.mubr.msk.bf16.mxu0 %vm8456_vm1, %v8455_v27 }
 0x285   :  { %7486 = vmatprep.subr.bf16.mxu0 %v8455_v27  ;;  %7505 = vmatmul.mubr.msk.bf16.vlgmr.msra.gmra.mxu1 %vm1046_vm0, %v9664_v43 }
 0x286   :  { %7517 = vmatpush3.bf16.msra.mxu1 %v8262_v39  ;;  %7520 = vmatprep.mubr.msk.bf16.mxu1 %vm8456_vm1, %v8455_v27 }
 0x287   :  { %7518 = vmatprep.subr.bf16.mxu1 %v8455_v27 }
 0x288   :  { %7487 = vmatpush3.bf16.msra.mxu0 %v8263_v44 }
 0x289   :  { %7492 = vmatprep.subr.bf16.mxu0 %v8455_v27 }
 0x28a   :  { %7519 = vmatpush3.bf16.msra.mxu1 %v8263_v44 }
 0x28b   :  { %7489 = vmatmul.mubr.msk.bf16.vlgmr.msra.gmra.mxu0 %vm1046_vm0, %v9648_v40  ;;  %7532 = vmatprep.subr.bf16.mxu1 %v8455_v27 }
 0x28c   :  { %7493 = vmatpush3.bf16.msra.mxu0 %v8265_v45  ;;  %7496 = vmatprep.mubr.msk.bf16.mxu0 %vm8456_vm1, %v8455_v27 }
 0x28d   :  { %7494 = vmatprep.subr.bf16.mxu0 %v8455_v27  ;;  %7521 = vmatmul.mubr.msk.bf16.vlgmr.msra.gmra.mxu1 %vm1046_vm0, %v9664_v43 }
 0x28e   :  { %7533 = vmatpush3.bf16.msra.mxu1 %v8264_v48  ;;  %7536 = vmatprep.mubr.msk.bf16.mxu1 %vm8456_vm1, %v8455_v27 }
 0x28f   :  { %7534 = vmatprep.subr.bf16.mxu1 %v8455_v27 }
 0x290   :  { %7495 = vmatpush3.bf16.msra.mxu0 %v8267_v49 }
 0x291   :  { %7508 = vmatprep.subr.bf16.mxu0 %v8455_v27 }
 0x292   :  { %7535 = vmatpush3.bf16.msra.mxu1 %v8266_v53 }
 0x293   :  { %7497 = vmatmul.mubr.msk.bf16.vlgmr.msra.gmra.mxu0 %vm1046_vm0, %v9648_v40  ;;  %7548 = vmatprep.subr.bf16.mxu1 %v8455_v27 }
 0x294   :  { %7509 = vmatpush3.bf16.msra.mxu0 %v8260_v38  ;;  %7512 = vmatprep.mubr.msk.bf16.mxu0 %vm8456_vm1, %v8455_v27 }
 0x295   :  { %7510 = vmatprep.subr.bf16.mxu0 %v8455_v27  ;;  %7537 = vmatmul.mubr.msk.bf16.vlgmr.msra.gmra.mxu1 %vm1046_vm0, %v9648_v40 }
 0x296   :  { %7549 = vmatpush3.bf16.msra.mxu1 %v8268_v56  ;;  %7552 = vmatprep.mubr.msk.bf16.mxu1 %vm8456_vm1, %v8455_v27 }
 0x297   :  { %7550 = vmatprep.subr.bf16.mxu1 %v8455_v27 }
 0x298   :  { %7511 = vmatpush3.bf16.msra.mxu0 %v8261_v41 }
 0x299   :  { %7524 = vmatprep.subr.bf16.mxu0 %v8455_v27 }
 0x29a   :  { %7551 = vmatpush3.bf16.msra.mxu1 %v8269_v57 }
 0x29b   :  { %7513 = vmatmul.mubr.msk.bf16.vlgmr.msra.gmra.mxu0 %vm1046_vm0, %v9664_v43  ;;  %7564 = vmatprep.subr.bf16.mxu1 %v8455_v27 }
 0x29c   :  { %7525 = vmatpush3.bf16.msra.mxu0 %v8265_v45  ;;  %7528 = vmatprep.mubr.msk.bf16.mxu0 %vm8456_vm1, %v8455_v27 }
 0x29d   :  { %7526 = vmatprep.subr.bf16.mxu0 %v8455_v27  ;;  %7553 = vmatmul.mubr.msk.bf16.vlgmr.msra.gmra.mxu1 %vm1046_vm0, %v9648_v40 }
 0x29e   :  { %7565 = vmatpush3.bf16.msra.mxu1 %v8264_v48  ;;  %7568 = vmatprep.mubr.msk.bf16.mxu1 %vm8456_vm1, %v8455_v27 }
 0x29f   :  { %7566 = vmatprep.subr.bf16.mxu1 %v8455_v27 }
 0x2a0   :  { %7527 = vmatpush3.bf16.msra.mxu0 %v8267_v49 }
 0x2a1   :  { %7540 = vmatprep.subr.bf16.mxu0 %v8455_v27 }
 0x2a2   :  { %7567 = vmatpush3.bf16.msra.mxu1 %v8266_v53 }
 0x2a3   :  { %7529 = vmatmul.mubr.msk.bf16.vlgmr.msra.gmra.mxu0 %vm1046_vm0, %v9664_v43  ;;  %7580 = vmatprep.subr.bf16.mxu1 %v8455_v27 }
 0x2a4   :  { %7541 = vmatpush3.bf16.msra.mxu0 %v8270_v59  ;;  %7544 = vmatprep.mubr.msk.bf16.mxu0 %vm8456_vm1, %v8455_v27 }
 0x2a5   :  { %7542 = vmatprep.subr.bf16.mxu0 %v8455_v27  ;;  %7569 = vmatmul.mubr.msk.bf16.vlgmr.msra.gmra.mxu1 %vm1046_vm0, %v9664_v43 }
 0x2a6   :  { %7581 = vmatpush3.bf16.msra.mxu1 %v8268_v56  ;;  %7584 = vmatprep.mubr.msk.bf16.mxu1 %vm8456_vm1, %v8455_v27 }
 0x2a7   :  { %7582 = vmatprep.subr.bf16.mxu1 %v8455_v27 }
 0x2a8   :  { %7543 = vmatpush3.bf16.msra.mxu0 %v8271_v60 }
 0x2a9   :  { %7556 = vmatprep.subr.bf16.mxu0 %v8455_v27 }
 0x2aa   :  { %7583 = vmatpush3.bf16.msra.mxu1 %v8269_v57 }
 0x2ab   :  { %7545 = vmatmul.mubr.msk.bf16.vlgmr.msra.gmra.mxu0 %vm1046_vm0, %v9648_v40  ;;  %7596 = vmatprep.subr.bf16.mxu1 %v8455_v27 }
 0x2ac   :  { %7557 = vmatpush3.bf16.msra.mxu0 %v8273_v61  ;;  %7560 = vmatprep.mubr.msk.bf16.mxu0 %vm8456_vm1, %v8455_v27 }
 0x2ad   :  { %7558 = vmatprep.subr.bf16.mxu0 %v8455_v27  ;;  %7585 = vmatmul.mubr.msk.bf16.vlgmr.msra.gmra.mxu1 %vm1046_vm0, %v9664_v43 }
 0x2ae   :  { %7597 = vmatpush3.bf16.msra.mxu1 %v8272_v62  ;;  %7600 = vmatprep.mubr.msk.bf16.mxu1 %vm8456_vm1, %v8455_v27 }
 0x2af   :  { %7598 = vmatprep.subr.bf16.mxu1 %v8455_v27 }
 0x2b0   :  { %7559 = vmatpush3.bf16.msra.mxu0 %v8275_v21 }
 0x2b1   :  { %7572 = vmatprep.subr.bf16.mxu0 %v8455_v27 }
 0x2b2   :  { %7599 = vmatpush3.bf16.msra.mxu1 %v8274_v63 }
 0x2b3   :  { %7561 = vmatmul.mubr.msk.bf16.vlgmr.msra.gmra.mxu0 %vm1046_vm0, %v9648_v40  ;;  %7612 = vmatprep.subr.bf16.mxu1 %v8455_v27 }
 0x2b4   :  { %7573 = vmatpush3.bf16.msra.mxu0 %v8270_v59  ;;  %7576 = vmatprep.mubr.msk.bf16.mxu0 %vm8456_vm1, %v8455_v27 }
 0x2b5   :  { %7574 = vmatprep.subr.bf16.mxu0 %v8455_v27  ;;  %7601 = vmatmul.mubr.msk.bf16.vlgmr.msra.gmra.mxu1 %vm1046_vm0, %v9648_v40 }
 0x2b6   :  { %7613 = vmatpush3.bf16.msra.mxu1 %v8276_v0  ;;  %7616 = vmatprep.mubr.msk.bf16.mxu1 %vm8456_vm1, %v8455_v27 }
 0x2b7   :  { %7614 = vmatprep.subr.bf16.mxu1 %v8455_v27 }
 0x2b8   :  { %7575 = vmatpush3.bf16.msra.mxu0 %v8271_v60 }
 0x2b9   :  { %7588 = vmatprep.subr.bf16.mxu0 %v8455_v27 }
 0x2ba   :  { %7615 = vmatpush3.bf16.msra.mxu1 %v8277_v24 }
 0x2bb   :  { %7577 = vmatmul.mubr.msk.bf16.vlgmr.msra.gmra.mxu0 %vm1046_vm0, %v9664_v43  ;;  %7628 = vmatprep.subr.bf16.mxu1 %v8455_v27 }
 0x2bc   :  { %7589 = vmatpush3.bf16.msra.mxu0 %v8273_v61  ;;  %7592 = vmatprep.mubr.msk.bf16.mxu0 %vm8456_vm1, %v8455_v27 }
 0x2bd   :  { %7590 = vmatprep.subr.bf16.mxu0 %v8455_v27  ;;  %7617 = vmatmul.mubr.msk.bf16.vlgmr.msra.gmra.mxu1 %vm1046_vm0, %v9648_v40 }
 0x2be   :  { %7629 = vmatpush3.bf16.msra.mxu1 %v8272_v62  ;;  %7632 = vmatprep.mubr.msk.bf16.mxu1 %vm8456_vm1, %v8455_v27 }
 0x2bf   :  { %7630 = vmatprep.subr.bf16.mxu1 %v8455_v27 }
 0x2c0   :  { %7591 = vmatpush3.bf16.msra.mxu0 %v8275_v21 }
 0x2c1   :  { %7604 = vmatprep.subr.bf16.mxu0 %v8455_v27 }
 0x2c2   :  { %7631 = vmatpush3.bf16.msra.mxu1 %v8274_v63 }
 0x2c3   :  { %7593 = vmatmul.mubr.msk.bf16.vlgmr.msra.gmra.mxu0 %vm1046_vm0, %v9664_v43  ;;  %7644 = vmatprep.subr.bf16.mxu1 %v8455_v27 }
 0x2c4   :  { %7605 = vmatpush3.bf16.msra.mxu0 %v8278_v29  ;;  %7608 = vmatprep.mubr.msk.bf16.mxu0 %vm8456_vm1, %v8455_v27 }
 0x2c5   :  { %7606 = vmatprep.subr.bf16.mxu0 %v8455_v27  ;;  %7633 = vmatmul.mubr.msk.bf16.vlgmr.msra.gmra.mxu1 %vm1046_vm0, %v9664_v43 }
 0x2c6   :  { %7645 = vmatpush3.bf16.msra.mxu1 %v8276_v0  ;;  %7648 = vmatprep.mubr.msk.bf16.mxu1 %vm8456_vm1, %v8455_v27 }
 0x2c7   :  { %7646 = vmatprep.subr.bf16.mxu1 %v8455_v27 }
 0x2c8   :  { %7607 = vmatpush3.bf16.msra.mxu0 %v8279_v16 }
 0x2c9   :  { %7620 = vmatprep.subr.bf16.mxu0 %v8455_v27 }
 0x2ca   :  { %7647 = vmatpush3.bf16.msra.mxu1 %v8277_v24 }
 0x2cb   :  { %7609 = vmatmul.mubr.msk.bf16.vlgmr.msra.gmra.mxu0 %vm1046_vm0, %v9648_v40  ;;  %7660 = vmatprep.subr.bf16.mxu1 %v8455_v27 }
 0x2cc   :  { %7621 = vmatpush3.bf16.msra.mxu0 %v8280_v33  ;;  %7624 = vmatprep.mubr.msk.bf16.mxu0 %vm8456_vm1, %v8455_v27 }
 0x2cd   :  { %7622 = vmatprep.subr.bf16.mxu0 %v8455_v27  ;;  %7649 = vmatmul.mubr.msk.bf16.vlgmr.msra.gmra.mxu1 %vm1046_vm0, %v9664_v43 }
 0x2ce   :  { %7662 = vmatprep.mubr.msk.bf16.mxu1 %vm8456_vm1, %v8455_v27 }
 0x2d0   :  { %7623 = vmatpush3.bf16.msra.mxu0 %v8281_v4 }
 0x2d1   :  { %7636 = vmatprep.subr.bf16.mxu0 %v8455_v27 }
 0x2d3   :  { %7625 = vmatmul.mubr.msk.bf16.vlgmr.msra.gmra.mxu0 %vm1046_vm0, %v9648_v40 }
 0x2d4   :  { %7637 = vmatpush3.bf16.msra.mxu0 %v8278_v29  ;;  %7640 = vmatprep.mubr.msk.bf16.mxu0 %vm8456_vm1, %v8455_v27 }
 0x2d5   :  { %7638 = vmatprep.subr.bf16.mxu0 %v8455_v27 }
 0x2d8   :  { %7639 = vmatpush3.bf16.msra.mxu0 %v8279_v16 }
 0x2d9   :  { %7652 = vmatprep.subr.bf16.mxu0 %v8455_v27 }
 0x2db   :  { %7641 = vmatmul.mubr.msk.bf16.vlgmr.msra.gmra.mxu0 %vm1046_vm0, %v9664_v43 }
 0x2dc   :  { %7653 = vmatpush3.bf16.msra.mxu0 %v8280_v33  ;;  %7656 = vmatprep.mubr.msk.bf16.mxu0 %vm8456_vm1, %v8455_v27 }
 0x2dd   :  { %7654 = vmatprep.subr.bf16.mxu0 %v8455_v27 }
 0x2e0   :  { %7655 = vmatpush3.bf16.msra.mxu0 %v8281_v4 }
 0x2e1   :  { %7666 = vmatprep.subr.bf16.mxu0 %v8455_v27 }
 0x2e3   :  { %7657 = vmatmul.mubr.msk.bf16.vlgmr.msra.gmra.mxu0 %vm1046_vm0, %v9664_v43 }
 0x2e4   :  { %7668 = vmatprep.mubr.msk.bf16.mxu0 %vm8456_vm1, %v8455_v27 }
 0x33b   :  { %v1153_v5 = vpop.f32.mrf.mxu0 }
 0x33c   :  { %v2246_v38 = vpack.c.bf16 %v1153_v5, %v1153_v5 }
 0x33d   :  { %v7474_v42 = vpop.f32.mrf.mxu0 }
 0x33f   :  { %v1156_v13 = vpop.f32.mrf.mxu0 }
 0x341   :  { %v7475_v47 = vpop.f32.mrf.mxu0 }
 0x343   :  { %v9855_v6 = vpop.f32.mrf.mxu0 }
 0x345   :  { %v7482_v1 = vpop.f32.mrf.mxu0  ;;  %v9857_v52 = vpop.f32.mrf.mxu1 }
 0x346   :  { %v2250_v29 = vpack.c.bf16 %v9857_v52, %v9857_v52  ;;  %v2247_v1 = vpack.c.bf16 %v9855_v6, %v9855_v6 }
 0x347   :  { %v1208_v7 = vpop.f32.mrf.mxu0  ;;  %v7506_v11 = vpop.f32.mrf.mxu1 }
 0x349   :  { %v7483_v58 = vpop.f32.mrf.mxu0  ;;  %v1355_v12 = vpop.f32.mrf.mxu1 }
 0x34b   :  { %v1257_v14 = vpop.f32.mrf.mxu0  ;;  %v7507_v15 = vpop.f32.mrf.mxu1 }
 0x34c   :  { %v2248_v48 = vpack.c.bf16 %v1257_v14, %v1257_v14 }
 0x34d   :  { %v7490_v17 = vpop.f32.mrf.mxu0  ;;  %v9859_v3 = vpop.f32.mrf.mxu1 }
 0x34e   :  { %v2252_v14 = vpack.c.bf16 %v9859_v3, %v9859_v3 }
 0x34f   :  { %v1260_v18 = vpop.f32.mrf.mxu0  ;;  %v7522_v19 = vpop.f32.mrf.mxu1 }
 0x351   :  { %v7491_v20 = vpop.f32.mrf.mxu0  ;;  %v1435_v22 = vpop.f32.mrf.mxu1 }
 0x353   :  { %v9861_v23 = vpop.f32.mrf.mxu0  ;;  %v7523_v25 = vpop.f32.mrf.mxu1 }
 0x354   :  { %v2249_v22 = vpack.c.bf16 %v9861_v23, %v9861_v23 }
 0x355   :  { %v7498_v9 = vpop.f32.mrf.mxu0  ;;  %v1540_v26 = vpop.f32.mrf.mxu1 }
 0x356   :  { %v2254_v31 = vpack.c.bf16 %v1540_v26, %v1540_v26 }
 0x357   :  { %v1312_v55 = vpop.f32.mrf.mxu0  ;;  %v7538_v2 = vpop.f32.mrf.mxu1 }
 0x358   :  { %v2267_v30 = vsel %vm2262_vm2, %v2254_v31, 0 }
 0x359   :  { %v7499_v32 = vpop.f32.mrf.mxu0  ;;  %v1543_v10 = vpop.f32.mrf.mxu1  ;;  %7661 = vmatpush3.bf16.xpose.msra.mxu1 %v2267_v30 }
 0x35a   :  { %7672 = vmatprep.subr.bf16.mxu1 %v8455_v27 }
 0x35b   :  { %v9865_v34 = vpop.f32.mrf.mxu0  ;;  %v7539_v35 = vpop.f32.mrf.mxu1 }
 0x35c   :  { %v2251_v35 = vpack.c.bf16 %v9865_v34, %v9865_v34 }
 0x35d   :  { %v7514_v46 = vpop.f32.mrf.mxu0  ;;  %v1644_v36 = vpop.f32.mrf.mxu1 }
 0x35e   :  { %v2256_v40 = vpack.c.bf16 %v1644_v36, %v1644_v36 }
 0x35f   :  { %v1395_v41 = vpop.f32.mrf.mxu0  ;;  %v7554_v50 = vpop.f32.mrf.mxu1 }
 0x360   :  { %v2359_v51 = vsel %vm2262_vm2, %v2256_v40, 0  ;;  %7663 = vmatmul.mubr.msk.bf16.vlgmr.msra.gmra.mxu1 %vm2262_vm2, %v2246_v38 }
 0x361   :  { %v7515_v28 = vpop.f32.mrf.mxu0  ;;  %v1647_v54 = vpop.f32.mrf.mxu1  ;;  %7673 = vmatpush3.bf16.xpose.msra.mxu1 %v2359_v51  ;;  %7674 = vmatprep.mubr.msk.bf16.mxu1 %vm8456_vm1, %v8455_v27 }
 0x362   :  { %7684 = vmatprep.subr.bf16.mxu1 %v8455_v27 }
 0x363   :  { %v9872_v39 = vpop.f32.mrf.mxu0  ;;  %v7555_v43 = vpop.f32.mrf.mxu1 }
 0x364   :  { %v2253_v43 = vpack.c.bf16 %v9872_v39, %v9872_v39 }
 0x365   :  { %v7530_v44 = vpop.f32.mrf.mxu0  ;;  %v1736_v45 = vpop.f32.mrf.mxu1 }
 0x366   :  { %v2258_v49 = vpack.c.bf16 %v1736_v45, %v1736_v45 }
 0x367   :  { %v1475_v53 = vpop.f32.mrf.mxu0  ;;  %v7570_v56 = vpop.f32.mrf.mxu1 }
 0x368   :  { %v2451_v57 = vsel %vm2262_vm2, %v2258_v49, 0  ;;  %7675 = vmatmul.mubr.msk.bf16.vlgmr.msra.gmra.mxu1 %vm2262_vm2, %v2248_v48 }
 0x369   :  { %v7531_v59 = vpop.f32.mrf.mxu0  ;;  %v1739_v60 = vpop.f32.mrf.mxu1  ;;  %7685 = vmatpush3.bf16.xpose.msra.mxu1 %v2451_v57  ;;  %7686 = vmatprep.mubr.msk.bf16.mxu1 %vm8456_vm1, %v8455_v27 }
 0x36a   :  { %7696 = vmatprep.subr.bf16.mxu1 %v8455_v27 }
 0x36b   :  { %v1592_v61 = vpop.f32.mrf.mxu0  ;;  %v7571_v62 = vpop.f32.mrf.mxu1 }
 0x36c   :  { %v2255_v21 = vpack.c.bf16 %v1592_v61, %v1592_v61 }
 0x36d   :  { %v7546_v63 = vpop.f32.mrf.mxu0  ;;  %v1816_v0 = vpop.f32.mrf.mxu1 }
 0x36e   :  { %v2313_v24 = vsel %vm2262_vm2, %v2255_v21, 0  ;;  %v2260_v16 = vpack.c.bf16 %v1816_v0, %v1816_v0 }
 0x36f   :  { %v1595_v33 = vpop.f32.mrf.mxu0  ;;  %7667 = vmatpush3.bf16.xpose.msra.mxu0 %v2313_v24  ;;  %v7586_v4 = vpop.f32.mrf.mxu1 }
 0x370   :  { %7678 = vmatprep.subr.bf16.mxu0 %v8455_v27  ;;  %v2543_v5 = vsel %vm2262_vm2, %v2260_v16, 0  ;;  %7687 = vmatmul.mubr.msk.bf16.vlgmr.msra.gmra.mxu1 %vm2262_vm2, %v2250_v29 }
 0x371   :  { %v7547_v42 = vpop.f32.mrf.mxu0  ;;  %v1819_v13 = vpop.f32.mrf.mxu1  ;;  %7697 = vmatpush3.bf16.xpose.msra.mxu1 %v2543_v5  ;;  %7698 = vmatprep.mubr.msk.bf16.mxu1 %vm8456_vm1, %v8455_v27 }
 0x372   :  { %7708 = vmatprep.subr.bf16.mxu1 %v8455_v27 }
 0x373   :  { %v1696_v47 = vpop.f32.mrf.mxu0  ;;  %v7587_v52 = vpop.f32.mrf.mxu1 }
 0x374   :  { %v2257_v7 = vpack.c.bf16 %v1696_v47, %v1696_v47 }
 0x375   :  { %v7562_v11 = vpop.f32.mrf.mxu0  ;;  %v1924_v58 = vpop.f32.mrf.mxu1 }
 0x376   :  { %v2405_v12 = vsel %vm2262_vm2, %v2257_v7, 0  ;;  %7669 = vmatmul.mubr.msk.bf16.vlgmr.msra.gmra.mxu0 %vm2262_vm2, %v2247_v1  ;;  %v2735_v15 = vpack.c.bf16 %v1924_v58, %v1924_v58 }
 0x377   :  { %v1699_v17 = vpop.f32.mrf.mxu0  ;;  %7679 = vmatpush3.bf16.xpose.msra.mxu0 %v2405_v12  ;;  %7680 = vmatprep.mubr.msk.bf16.mxu0 %vm8456_vm1, %v8455_v27  ;;  %v7602_v18 = vpop.f32.mrf.mxu1 }
 0x378   :  { %7690 = vmatprep.subr.bf16.mxu0 %v8455_v27  ;;  %v2747_v6 = vsel %vm517_vm3, %v2735_v15, 0  ;;  %7699 = vmatmul.mubr.msk.bf16.vlgmr.msra.gmra.mxu1 %vm2262_vm2, %v2252_v14 }
 0x379   :  { %v7563_v19 = vpop.f32.mrf.mxu0  ;;  %v1927_v20 = vpop.f32.mrf.mxu1  ;;  %7709 = vmatpush3.bf16.msra.mxu1 %v2747_v6  ;;  %7710 = vmatprep.mubr.msk.bf16.mxu1 %vm8456_vm1, %v8455_v27 }
 0x37a   :  { %7720 = vmatprep.subr.bf16.mxu1 %v8455_v27 }
 0x37b   :  { %v1776_v3 = vpop.f32.mrf.mxu0  ;;  %v7603_v25 = vpop.f32.mrf.mxu1 }
 0x37c   :  { %v2259_v9 = vpack.c.bf16 %v1776_v3, %v1776_v3 }
 0x37d   :  { %v7578_v26 = vpop.f32.mrf.mxu0  ;;  %v9904_v31 = vpop.f32.mrf.mxu1 }
 0x37e   :  { %v2497_v55 = vsel %vm2262_vm2, %v2259_v9, 0  ;;  %7681 = vmatmul.mubr.msk.bf16.vlgmr.msra.gmra.mxu0 %vm2262_vm2, %v2249_v22 }
 0x37f   :  { %v1779_v2 = vpop.f32.mrf.mxu0  ;;  %7691 = vmatpush3.bf16.xpose.msra.mxu0 %v2497_v55  ;;  %7692 = vmatprep.mubr.msk.bf16.mxu0 %vm8456_vm1, %v8455_v27  ;;  %v7618_v30 = vpop.f32.mrf.mxu1 }
 0x380   :  { %7702 = vmatprep.subr.bf16.mxu0 %v8455_v27 }
 0x381   :  { %v7579_v32 = vpop.f32.mrf.mxu0  ;;  %v2031_v10 = vpop.f32.mrf.mxu1 }
 0x383   :  { %v1856_v23 = vpop.f32.mrf.mxu0  ;;  %v7619_v46 = vpop.f32.mrf.mxu1 }
 0x384   :  { %v2261_v36 = vpack.c.bf16 %v1856_v23, %v1856_v23 }
 0x385   :  { %v7594_v38 = vpop.f32.mrf.mxu0  ;;  %v9913_v40 = vpop.f32.mrf.mxu1 }
 0x386   :  { %v2589_v41 = vsel %vm2262_vm2, %v2261_v36, 0  ;;  %7693 = vmatmul.mubr.msk.bf16.vlgmr.msra.gmra.mxu0 %vm2262_vm2, %v2251_v35 }
 0x387   :  { %v1859_v50 = vpop.f32.mrf.mxu0  ;;  %7703 = vmatpush3.bf16.xpose.msra.mxu0 %v2589_v41  ;;  %7704 = vmatprep.mubr.msk.bf16.mxu0 %vm8456_vm1, %v8455_v27  ;;  %v7634_v51 = vpop.f32.mrf.mxu1 }
 0x388   :  { %7714 = vmatprep.subr.bf16.mxu0 %v8455_v27 }
 0x389   :  { %v7595_v28 = vpop.f32.mrf.mxu0  ;;  %v2123_v54 = vpop.f32.mrf.mxu1 }
 0x38b   :  { %v1976_v34 = vpop.f32.mrf.mxu0  ;;  %v7635_v44 = vpop.f32.mrf.mxu1 }
 0x38c   :  { %v2736_v45 = vpack.c.bf16 %v1976_v34, %v1976_v34 }
 0x38d   :  { %v7610_v48 = vpop.f32.mrf.mxu0  ;;  %v9922_v49 = vpop.f32.mrf.mxu1 }
 0x38e   :  { %v2793_v53 = vsel %vm517_vm3, %v2736_v45, 0  ;;  %7705 = vmatmul.mubr.msk.bf16.vlgmr.msra.gmra.mxu0 %vm2262_vm2, %v2253_v43 }
 0x38f   :  { %v1979_v56 = vpop.f32.mrf.mxu0  ;;  %7715 = vmatpush3.bf16.msra.mxu0 %v2793_v53  ;;  %7716 = vmatprep.mubr.msk.bf16.mxu0 %vm8456_vm1, %v8455_v27  ;;  %v7650_v57 = vpop.f32.mrf.mxu1 }
 0x390   :  { %7726 = vmatprep.subr.bf16.mxu0 %v8455_v27 }
 0x391   :  { %v7611_v59 = vpop.f32.mrf.mxu0  ;;  %v2203_v60 = vpop.f32.mrf.mxu1 }
 0x393   :  { %v9929_v39 = vpop.f32.mrf.mxu0  ;;  %v7651_v61 = vpop.f32.mrf.mxu1 }
 0x395   :  { %v7626_v62 = vpop.f32.mrf.mxu0 }
 0x397   :  { %v2083_v21 = vpop.f32.mrf.mxu0 }
 0x399   :  { %v7627_v63 = vpop.f32.mrf.mxu0 }
 0x39b   :  { %v9931_v0 = vpop.f32.mrf.mxu0 }
 0x39d   :  { %v7642_v24 = vpop.f32.mrf.mxu0 }
 0x39f   :  { %v2163_v29 = vpop.f32.mrf.mxu0 }
 0x3a1   :  { %v7643_v16 = vpop.f32.mrf.mxu0 }
 0x3a3   :  { %v9933_v33 = vpop.f32.mrf.mxu0 }
 0x3a5   :  { %v7658_v4 = vpop.f32.mrf.mxu0 }
 0x3a7   :  { %v2243_v5 = vpop.f32.mrf.mxu0 }
 0x3a9   :  { %v7659_v42 = vpop.f32.mrf.mxu0 }
 0x420   :  { %v2303_v13 = vpop.f32.mrf.mxu1 }
 0x421   :  { %v2631_v47 = vmul.f32 0.35355338, %v2303_v13 }
 0x422   :  { %v7664_v1 = vpop.f32.mrf.mxu1 }
 0x423   :  { %v2639_v52 = vsel %vm2262_vm2, %v2631_v47, -inf }
 0x424   :  { %2640 = vmax.xlane.f32.xlu0 %v2639_v52  ;;  %v2306_v7 = vpop.f32.mrf.mxu1 }
 0x426   :  { %v7665_v11 = vpop.f32.mrf.mxu1 }
 0x428   :  { %v2395_v58 = vpop.f32.mrf.mxu1 }
 0x429   :  { %v2633_v12 = vmul.f32 0.35355338, %v2395_v58 }
 0x42a   :  { %v7676_v14 = vpop.f32.mrf.mxu1 }
 0x42b   :  { %v2645_v15 = vsel %vm2262_vm2, %v2633_v12, -inf }
 0x42c   :  { %2646 = vmax.xlane.f32.xlu0 %v2645_v15  ;;  %v2398_v17 = vpop.f32.mrf.mxu1 }
 0x42e   :  { %v7677_v18 = vpop.f32.mrf.mxu1 }
 0x430   :  { %v2487_v6 = vpop.f32.mrf.mxu1 }
 0x431   :  { %v2635_v19 = vmul.f32 0.35355338, %v2487_v6 }
 0x432   :  { %v7688_v20 = vpop.f32.mrf.mxu1 }
 0x433   :  { %v2651_v3 = vsel %vm2262_vm2, %v2635_v19, -inf }
 0x434   :  { %2652 = vmax.xlane.f32.xlu0 %v2651_v3  ;;  %v2490_v22 = vpop.f32.mrf.mxu1 }
 0x436   :  { %v2349_v25 = vpop.f32.mrf.mxu0  ;;  %v7689_v9 = vpop.f32.mrf.mxu1 }
 0x437   :  { %v2632_v26 = vmul.f32 0.35355338, %v2349_v25 }
 0x438   :  { %v7670_v55 = vpop.f32.mrf.mxu0  ;;  %v2579_v2 = vpop.f32.mrf.mxu1 }
 0x439   :  { %v2642_v30 = vsel %vm2262_vm2, %v2632_v26, -inf  ;;  %v2637_v32 = vmul.f32 0.35355338, %v2579_v2 }
 0x43a   :  { %2643 = vmax.xlane.f32.xlu1 %v2642_v30  ;;  %v2352_v10 = vpop.f32.mrf.mxu0  ;;  %v7700_v23 = vpop.f32.mrf.mxu1 }
 0x43b   :  { %v2657_v35 = vsel %vm2262_vm2, %v2637_v32, -inf }
 0x43c   :  { %v7671_v46 = vpop.f32.mrf.mxu0  ;;  %2658 = vmax.xlane.f32.xlu0 %v2657_v35  ;;  %v2582_v36 = vpop.f32.mrf.mxu1 }
 0x43e   :  { %v2441_v38 = vpop.f32.mrf.mxu0  ;;  %v7701_v41 = vpop.f32.mrf.mxu1 }
 0x43f   :  { %v2634_v50 = vmul.f32 0.35355338, %v2441_v38 }
 0x440   :  { %v7682_v51 = vpop.f32.mrf.mxu0 }
 0x441   :  { %v2648_v28 = vsel %vm2262_vm2, %v2634_v50, -inf }
 0x442   :  { %2649 = vmax.xlane.f32.xlu1 %v2648_v28  ;;  %v2444_v54 = vpop.f32.mrf.mxu0 }
 0x444   :  { %v7683_v34 = vpop.f32.mrf.mxu0 }
 0x446   :  { %v2533_v43 = vpop.f32.mrf.mxu0 }
 0x447   :  { %v2636_v44 = vmul.f32 0.35355338, %v2533_v43  ;;  %v2737_v43 = vpack.c.bf16 %v9904_v31, %v9904_v31  ;;  %v2739_v31 = vpack.c.bf16 %v9913_v40, %v9913_v40  ;;  %v2741_v40 = vpack.c.bf16 %v9922_v49, %v9922_v49 }
 0x448   :  { %v7694_v45 = vpop.f32.mrf.mxu0 }
 0x449   :  { %v2654_v48 = vsel %vm2262_vm2, %v2636_v44, -inf }
 0x44a   :  { %2655 = vmax.xlane.f32.xlu1 %v2654_v48  ;;  %v2536_v53 = vpop.f32.mrf.mxu0 }
 0x44b   :  { %v2839_v53 = vsel %vm517_vm3, %v2737_v43, 0 }
 0x44c   :  { %v7695_v56 = vpop.f32.mrf.mxu0 }
 0x44e   :  { %v2625_v57 = vpop.f32.mrf.mxu0 }
 0x44f   :  { %v2638_v59 = vmul.f32 0.35355338, %v2625_v57 }
 0x450   :  { %v7706_v60 = vpop.f32.mrf.mxu0 }
 0x451   :  { %v2660_v61 = vsel %vm2262_vm2, %v2638_v59, -inf }
 0x452   :  { %2661 = vmax.xlane.f32.xlu1 %v2660_v61  ;;  %v2628_v62 = vpop.f32.mrf.mxu0 }
 0x453   :  { %v2931_v62 = vsel %vm517_vm3, %v2739_v31, 0 }
 0x454   :  { %v7707_v21 = vpop.f32.mrf.mxu0 }
 0x4ad   :  { %v2641_v63 = vpop.xlane.xlu0 %2640 }
 0x4ae   :  { %v2663_v24 = vsub.f32 %v2631_v47, %v2641_v63 }
 0x4b0   :  { %v2671_v29 = vmul.f32 1.442695, %v2663_v24 }
 0x4b2   :  { %8330 = vpow2.f32 %v2671_v29 }
 0x4b5   :  { %v2647_v16 = vpop.xlane.xlu0 %2646 }
 0x4b6   :  { %v2665_v4 = vsub.f32 %v2633_v12, %v2647_v16 }
 0x4b8   :  { %v2675_v5 = vmul.f32 1.442695, %v2665_v4  ;;  %v3023_v4 = vsel %vm517_vm3, %v2741_v40, 0 }
 0x4ba   :  { %8332 = vpow2.f32 %v2675_v5  ;;  %v2738_v5 = vpack.c.bf16 %v9929_v39, %v9929_v39 }
 0x4bd   :  { %v2653_v42 = vpop.xlane.xlu0 %2652 }
 0x4be   :  { %v2667_v13 = vsub.f32 %v2635_v19, %v2653_v42 }
 0x4bf   :  { %v8331_v1 = vpop.eup %8330 }
 0x4c0   :  { %v2679_v52 = vmul.f32 1.442695, %v2667_v13  ;;  %v2687_v7 = vsel %vm2262_vm2, %v8331_v1, 0.0 }
 0x4c1   :  { %2688 = vadd.xlane.f32.xlu0 %v2687_v7  ;;  %v2885_v7 = vsel %vm517_vm3, %v2738_v5, 0 }
 0x4c2   :  { %8334 = vpow2.f32 %v2679_v52 }
 0x4c3   :  { %v2644_v11 = vpop.xlane.xlu1 %2643 }
 0x4c4   :  { %v2664_v58 = vsub.f32 %v2632_v26, %v2644_v11 }
 0x4c5   :  { %v2659_v14 = vpop.xlane.xlu0 %2658 }
 0x4c6   :  { %v2673_v15 = vmul.f32 1.442695, %v2664_v58  ;;  %v2669_v17 = vsub.f32 %v2637_v32, %v2659_v14  ;;  %v2740_v58 = vpack.c.bf16 %v9931_v0, %v9931_v0  ;;  %v2742_v0 = vpack.c.bf16 %v9933_v33, %v9933_v33  ;;  %v3119_v33 = vld [vmem:[%s10724_s8] sm:$0xf] }
 0x4c7   :  { %v8333_v47 = vpop.eup %8332 }
 0x4c8   :  { %8336 = vpow2.f32 %v2673_v15  ;;  %v2683_v18 = vmul.f32 1.442695, %v2669_v17  ;;  %v2693_v12 = vsel %vm2262_vm2, %v8333_v47, 0.0 }
 0x4c9   :  { %2694 = vadd.xlane.f32.xlu0 %v2693_v12 }
 0x4ca   :  { %8338 = vpow2.f32 %v2683_v18 }
 0x4cb   :  { %v2650_v6 = vpop.xlane.xlu1 %2649 }
 0x4cc   :  { %v2666_v19 = vsub.f32 %v2634_v50, %v2650_v6 }
 0x4ce   :  { %v2677_v20 = vmul.f32 1.442695, %v2666_v19  ;;  %v3069_v19 = vsel %vm517_vm3, %v2742_v0, 0 }
 0x4cf   :  { %v8335_v3 = vpop.eup %8334 }
 0x4d0   :  { %8340 = vpow2.f32 %v2677_v20  ;;  %v2699_v22 = vsel %vm2262_vm2, %v8335_v3, 0.0 }
 0x4d1   :  { %2700 = vadd.xlane.f32.xlu0 %v2699_v22 }
 0x4d3   :  { %v2656_v25 = vpop.xlane.xlu1 %2655 }
 0x4d4   :  { %v2668_v9 = vsub.f32 %v2636_v44, %v2656_v25  ;;  %v3127_v25 = vsel %vm517_vm3, %v3119_v33, 0 }
 0x4d5   :  { %v8337_v26 = vpop.eup %8336 }
 0x4d6   :  { %v2681_v55 = vmul.f32 1.442695, %v2668_v9  ;;  %v2690_v2 = vsel %vm2262_vm2, %v8337_v26, 0.0  ;;  %v3120_v9 = vld [vmem:[%s10724_s8 + $0x4] sm:$0xf] }
 0x4d7   :  { %2691 = vadd.xlane.f32.xlu1 %v2690_v2  ;;  %v9947_v30 = vpop.eup %8338 }
 0x4d8   :  { %8342 = vpow2.f32 %v2681_v55  ;;  %v2705_v32 = vsel %vm2262_vm2, %v9947_v30, 0.0  ;;  %v3121_v55 = vld [vmem:[%s10724_s8 + $0x8] sm:$0xf] }
 0x4d9   :  { %2706 = vadd.xlane.f32.xlu0 %v2705_v32  ;;  %v3219_v32 = vsel %vm517_vm3, %v3121_v55, 0 }
 0x4db   :  { %v2662_v10 = vpop.xlane.xlu1 %2661 }
 0x4dc   :  { %v2670_v23 = vsub.f32 %v2638_v59, %v2662_v10 }
 0x4dd   :  { %v9951_v35 = vpop.eup %8340 }
 0x4de   :  { %v2685_v46 = vmul.f32 1.442695, %v2670_v23  ;;  %v2696_v36 = vsel %vm2262_vm2, %v9951_v35, 0.0 }
 0x4df   :  { %2697 = vadd.xlane.f32.xlu1 %v2696_v36 }
 0x4e0   :  { %8344 = vpow2.f32 %v2685_v46 }
 0x4e5   :  { %v9955_v38 = vpop.eup %8342 }
 0x4e6   :  { %v2702_v41 = vsel %vm2262_vm2, %v9955_v38, 0.0 }
 0x4e7   :  { %2703 = vadd.xlane.f32.xlu1 %v2702_v41 }
 0x4ed   :  { %v9959_v50 = vpop.eup %8344 }
 0x4ee   :  { %v2708_v51 = vsel %vm2262_vm2, %v9959_v50, 0.0 }
 0x4ef   :  { %2709 = vadd.xlane.f32.xlu1 %v2708_v51 }
 0x54a   :  { %v2689_v28 = vpop.xlane.xlu0 %2688 }
 0x54b   :  { %8346 = vrcp.f32 %v2689_v28 }
 0x552   :  { %v2695_v54 = vpop.xlane.xlu0 %2694 }
 0x553   :  { %8348 = vrcp.f32 %v2695_v54 }
 0x558   :  { %v8347_v34 = vpop.eup %8346 }
 0x559   :  { %v2719_v44 = vmul.f32 %v8347_v34, %v8331_v1  ;;  %v3122_v34 = vld [vmem:[%s10724_s8 + $0xc] sm:$0xf] }
 0x55a   :  { %v2701_v45 = vpop.xlane.xlu0 %2700 }
 0x55b   :  { %8350 = vrcp.f32 %v2701_v45  ;;  %v2727_v48 = vpack.c.bf16 %v2719_v44, %v2719_v44 }
 0x55d   :  { %7711 = vmatmul.mubr.msk.bf16.vlgmr.msra.gmra.mxu1 %vm2262_vm2, %v2727_v48 }
 0x55e   :  { %7721 = vmatpush3.bf16.msra.mxu1 %v2839_v53  ;;  %7722 = vmatprep.mubr.msk.bf16.mxu1 %vm8456_vm1, %v8455_v27  ;;  %v3265_v53 = vsel %vm517_vm3, %v3122_v34, 0 }
 0x55f   :  { %7732 = vmatprep.subr.bf16.mxu1 %v8455_v27 }
 0x560   :  { %v2692_v56 = vpop.xlane.xlu1 %2691  ;;  %v8349_v57 = vpop.eup %8348 }
 0x561   :  { %8352 = vrcp.f32 %v2692_v56  ;;  %v2721_v59 = vmul.f32 %v8349_v57, %v8333_v47  ;;  %v2977_v47 = vsel %vm517_vm3, %v2740_v58, 0 }
 0x562   :  { %v2707_v60 = vpop.xlane.xlu0 %2706 }
 0x563   :  { %8354 = vrcp.f32 %v2707_v60  ;;  %v2729_v61 = vpack.c.bf16 %v2721_v59, %v2721_v59 }
 0x565   :  { %7723 = vmatmul.mubr.msk.bf16.vlgmr.msra.gmra.mxu1 %vm2262_vm2, %v2729_v61 }
 0x566   :  { %7733 = vmatpush3.bf16.msra.mxu1 %v2931_v62  ;;  %7734 = vmatprep.mubr.msk.bf16.mxu1 %vm8456_vm1, %v8455_v27 }
 0x567   :  { %7744 = vmatprep.subr.bf16.mxu1 %v8455_v27 }
 0x568   :  { %v2698_v21 = vpop.xlane.xlu1 %2697  ;;  %v8351_v63 = vpop.eup %8350 }
 0x569   :  { %8356 = vrcp.f32 %v2698_v21  ;;  %v2723_v24 = vmul.f32 %v8351_v63, %v8335_v3 }
 0x56b   :  { %v2731_v29 = vpack.c.bf16 %v2723_v24, %v2723_v24 }
 0x56d   :  { %7735 = vmatmul.mubr.msk.bf16.vlgmr.msra.gmra.mxu1 %vm2262_vm2, %v2731_v29 }
 0x56e   :  { %v8353_v16 = vpop.eup %8352  ;;  %7745 = vmatpush3.bf16.msra.mxu1 %v3023_v4  ;;  %7746 = vmatprep.mubr.msk.bf16.mxu1 %vm8456_vm1, %v8455_v27 }
 0x56f   :  { %v2720_v42 = vmul.f32 %v8353_v16, %v8337_v26  ;;  %7756 = vmatprep.subr.bf16.mxu1 %v8455_v27  ;;  %v3173_v26 = vsel %vm517_vm3, %v3120_v9, 0 }
 0x570   :  { %v2704_v13 = vpop.xlane.xlu1 %2703  ;;  %v8355_v1 = vpop.eup %8354 }
 0x571   :  { %8358 = vrcp.f32 %v2704_v13  ;;  %v2728_v49 = vpack.c.bf16 %v2720_v42, %v2720_v42  ;;  %v2725_v52 = vmul.f32 %v8355_v1, %v9947_v30 }
 0x573   :  { %7717 = vmatmul.mubr.msk.bf16.vlgmr.msra.gmra.mxu0 %vm2262_vm2, %v2728_v49  ;;  %v2733_v11 = vpack.c.bf16 %v2725_v52, %v2725_v52 }
 0x574   :  { %7727 = vmatpush3.bf16.msra.mxu0 %v2885_v7  ;;  %7728 = vmatprep.mubr.msk.bf16.mxu0 %vm8456_vm1, %v8455_v27 }
 0x575   :  { %7738 = vmatprep.subr.bf16.mxu0 %v8455_v27  ;;  %7747 = vmatmul.mubr.msk.bf16.vlgmr.msra.gmra.mxu1 %vm2262_vm2, %v2733_v11 }
 0x576   :  { %v8357_v39 = vpop.eup %8356  ;;  %7758 = vmatprep.mubr.msk.bf16.mxu1 %vm8456_vm1, %v8455_v27  ;;  %7757 = vmatpush3.bf16.msra.mxu1 %v3127_v25 }
 0x577   :  { %v2722_v14 = vmul.f32 %v8357_v39, %v9951_v35  ;;  %7768 = vmatprep.subr.bf16.mxu1 %v8455_v27 }
 0x578   :  { %v2710_v15 = vpop.xlane.xlu1 %2709 }
 0x579   :  { %8360 = vrcp.f32 %v2710_v15  ;;  %v2730_v17 = vpack.c.bf16 %v2722_v14, %v2722_v14 }
 0x57b   :  { %7729 = vmatmul.mubr.msk.bf16.vlgmr.msra.gmra.mxu0 %vm2262_vm2, %v2730_v17 }
 0x57c   :  { %7739 = vmatpush3.bf16.msra.mxu0 %v2977_v47  ;;  %7740 = vmatprep.mubr.msk.bf16.mxu0 %vm8456_vm1, %v8455_v27 }
 0x57d   :  { %7750 = vmatprep.subr.bf16.mxu0 %v8455_v27 }
 0x57e   :  { %v8359_v18 = vpop.eup %8358 }
 0x57f   :  { %v2724_v12 = vmul.f32 %v8359_v18, %v9955_v38 }
 0x581   :  { %v2732_v6 = vpack.c.bf16 %v2724_v12, %v2724_v12 }
 0x583   :  { %7741 = vmatmul.mubr.msk.bf16.vlgmr.msra.gmra.mxu0 %vm2262_vm2, %v2732_v6 }
 0x584   :  { %7751 = vmatpush3.bf16.msra.mxu0 %v3069_v19  ;;  %7752 = vmatprep.mubr.msk.bf16.mxu0 %vm8456_vm1, %v8455_v27 }
 0x585   :  { %7762 = vmatprep.subr.bf16.mxu0 %v8455_v27 }
 0x586   :  { %v8361_v20 = vpop.eup %8360 }
 0x587   :  { %v2726_v3 = vmul.f32 %v8361_v20, %v9959_v50 }
 0x589   :  { %v2734_v22 = vpack.c.bf16 %v2726_v3, %v2726_v3 }
 0x58b   :  { %7753 = vmatmul.mubr.msk.bf16.vlgmr.msra.gmra.mxu0 %vm2262_vm2, %v2734_v22 }
 0x58c   :  { %7764 = vmatprep.mubr.msk.bf16.mxu0 %vm8456_vm1, %v8455_v27  ;;  %7763 = vmatpush3.bf16.msra.mxu0 %v3173_v26 }
 0x58d   :  { %7774 = vmatprep.subr.bf16.mxu0 %v8455_v27 }
 0x61d   :  { %v2783_v2 = vpop.f32.mrf.mxu1 }
 0x61e   :  { %v3111_v30 = vpack.c.bf16 %v2783_v2, %v2783_v2 }
 0x61f   :  { %v7712_v10 = vpop.f32.mrf.mxu1 }
 0x620   :  { %7759 = vmatmul.mubr.msk.bf16.vlgmr.msra.gmra.mxu1 %vm2262_vm2, %v3111_v30 }
 0x621   :  { %v2786_v23 = vpop.f32.mrf.mxu1  ;;  %7769 = vmatpush3.bf16.msra.mxu1 %v3219_v32  ;;  %7770 = vmatprep.mubr.msk.bf16.mxu1 %vm8456_vm1, %v8455_v27 }
 0x622   :  { %7780 = vmatprep.subr.bf16.mxu1 %v8455_v27 }
 0x623   :  { %v7713_v35 = vpop.f32.mrf.mxu1 }
 0x625   :  { %v2875_v46 = vpop.f32.mrf.mxu1 }
 0x626   :  { %v3113_v36 = vpack.c.bf16 %v2875_v46, %v2875_v46 }
 0x627   :  { %v7724_v38 = vpop.f32.mrf.mxu1 }
 0x628   :  { %7771 = vmatmul.mubr.msk.bf16.vlgmr.msra.gmra.mxu1 %vm2262_vm2, %v3113_v36 }
 0x629   :  { %v2878_v41 = vpop.f32.mrf.mxu1  ;;  %7781 = vmatpush3.bf16.msra.mxu1 %v3127_v25  ;;  %7782 = vmatprep.mubr.msk.bf16.mxu1 %vm8456_vm1, %v8455_v27 }
 0x62a   :  { %7792 = vmatprep.subr.bf16.mxu1 %v8455_v27  ;;  %v6884_v41 = vld [vmem:[%s10725_s9] ss:$0 sm:$0xff] }
 0x62b   :  { %v7725_v50 = vpop.f32.mrf.mxu1 }
 0x62d   :  { %v2967_v51 = vpop.f32.mrf.mxu1 }
 0x62e   :  { %v3115_v28 = vpack.c.bf16 %v2967_v51, %v2967_v51 }
 0x62f   :  { %v7736_v54 = vpop.f32.mrf.mxu1 }
 0x630   :  { %7783 = vmatmul.mubr.msk.bf16.vlgmr.msra.gmra.mxu1 %vm2262_vm2, %v3115_v28 }
 0x631   :  { %v2970_v43 = vpop.f32.mrf.mxu1  ;;  %7793 = vmatpush3.bf16.msra.mxu1 %v3219_v32  ;;  %7794 = vmatprep.mubr.msk.bf16.mxu1 %vm8456_vm1, %v8455_v27 }
 0x632   :  { %7804 = vmatprep.subr.bf16.mxu1 %v8455_v27 }
 0x633   :  { %v2829_v44 = vpop.f32.mrf.mxu0  ;;  %v7737_v45 = vpop.f32.mrf.mxu1 }
 0x634   :  { %v3112_v48 = vpack.c.bf16 %v2829_v44, %v2829_v44 }
 0x635   :  { %v7718_v56 = vpop.f32.mrf.mxu0  ;;  %v3059_v57 = vpop.f32.mrf.mxu1 }
 0x636   :  { %7765 = vmatmul.mubr.msk.bf16.vlgmr.msra.gmra.mxu0 %vm2262_vm2, %v3112_v48  ;;  %v3117_v31 = vpack.c.bf16 %v3059_v57, %v3059_v57 }
 0x637   :  { %v2832_v59 = vpop.f32.mrf.mxu0  ;;  %7775 = vmatpush3.bf16.msra.mxu0 %v3265_v53  ;;  %7776 = vmatprep.mubr.msk.bf16.mxu0 %vm8456_vm1, %v8455_v27  ;;  %v7748_v60 = vpop.f32.mrf.mxu1 }
 0x638   :  { %7786 = vmatprep.subr.bf16.mxu0 %v8455_v27  ;;  %7795 = vmatmul.mubr.msk.bf16.vlgmr.msra.gmra.mxu1 %vm2262_vm2, %v3117_v31 }
 0x639   :  { %v7719_v61 = vpop.f32.mrf.mxu0  ;;  %v3062_v62 = vpop.f32.mrf.mxu1  ;;  %7808 = vmatprep.mubr.msk.bf16.mxu1 %vm8456_vm1, %v8455_v27 }
 0x63b   :  { %v2921_v21 = vpop.f32.mrf.mxu0  ;;  %v7749_v63 = vpop.f32.mrf.mxu1 }
 0x63c   :  { %v3114_v40 = vpack.c.bf16 %v2921_v21, %v2921_v21 }
 0x63d   :  { %v7730_v24 = vpop.f32.mrf.mxu0 }
 0x63e   :  { %7777 = vmatmul.mubr.msk.bf16.vlgmr.msra.gmra.mxu0 %vm2262_vm2, %v3114_v40 }
 0x63f   :  { %v2924_v29 = vpop.f32.mrf.mxu0  ;;  %7787 = vmatpush3.bf16.msra.mxu0 %v3173_v26  ;;  %7788 = vmatprep.mubr.msk.bf16.mxu0 %vm8456_vm1, %v8455_v27 }
 0x640   :  { %7798 = vmatprep.subr.bf16.mxu0 %v8455_v27 }
 0x641   :  { %v7731_v16 = vpop.f32.mrf.mxu0 }
 0x643   :  { %v3013_v4 = vpop.f32.mrf.mxu0 }
 0x644   :  { %v3116_v5 = vpack.c.bf16 %v3013_v4, %v3013_v4 }
 0x645   :  { %v7742_v42 = vpop.f32.mrf.mxu0 }
 0x646   :  { %7789 = vmatmul.mubr.msk.bf16.vlgmr.msra.gmra.mxu0 %vm2262_vm2, %v3116_v5 }
 0x647   :  { %v3016_v13 = vpop.f32.mrf.mxu0  ;;  %7799 = vmatpush3.bf16.msra.mxu0 %v3265_v53  ;;  %7800 = vmatprep.mubr.msk.bf16.mxu0 %vm8456_vm1, %v8455_v27 }
 0x648   :  { %7812 = vmatprep.subr.bf16.mxu0 %v8455_v27 }
 0x649   :  { %v7743_v1 = vpop.f32.mrf.mxu0 }
 0x64b   :  { %v3105_v49 = vpop.f32.mrf.mxu0 }
 0x64c   :  { %v3118_v52 = vpack.c.bf16 %v3105_v49, %v3105_v49 }
 0x64d   :  { %v7754_v7 = vpop.f32.mrf.mxu0 }
 0x64e   :  { %7801 = vmatmul.mubr.msk.bf16.vlgmr.msra.gmra.mxu0 %vm2262_vm2, %v3118_v52 }
 0x64f   :  { %v3108_v11 = vpop.f32.mrf.mxu0  ;;  %7816 = vmatprep.mubr.msk.bf16.mxu0 %vm8456_vm1, %v8455_v27 }
 0x651   :  { %v7755_v39 = vpop.f32.mrf.mxu0 }
 0x6e0   :  { %v3163_v58 = vpop.f32.mrf.mxu1 }
 0x6e1   :  { %v3479_v9 = vsel %vm1046_vm0, %v3163_v58, 0.0  ;;  %v8282_v58 = vld [vmem:[%s10728_s12 + $0x8] sm:$0xff]  }
 0x6e2   :  { %v7760_v14 = vpop.f32.mrf.mxu1  ;;  %7805 = vmatpush3.bf16.msra.mxu1 %v8282_v58  ;;  %7813 = vmatpush3.bf16.msra.mxu0 %v8282_v58 }
 0x6e3   :  { %7806 = vmatprep.subr.bf16.mxu1 %v8455_v27  ;;  %7814 = vmatprep.subr.bf16.mxu0 %v8455_v27  ;;  %v8283_v14 = vld [vmem:[%s10728_s12] sm:$0xff]  }
 0x6e4   :  { %v3166_v15 = vpop.f32.mrf.mxu1 }
 0x6e6   :  { %v7761_v17 = vpop.f32.mrf.mxu1  ;;  %7807 = vmatpush3.bf16.msra.mxu1 %v8283_v14  ;;  %7815 = vmatpush3.bf16.msra.mxu0 %v8283_v14 }
 0x6e7   :  { %7820 = vmatprep.subr.bf16.mxu1 %v8455_v27  ;;  %7840 = vmatprep.subr.bf16.mxu0 %v8455_v27 }
 0x6e8   :  { %v3255_v47 = vpop.f32.mrf.mxu1 }
 0x6e9   :  { %v3482_v10 = vsel %vm1046_vm0, %v3255_v47, 0.0 }
 0x6ea   :  { %v7772_v18 = vpop.f32.mrf.mxu1 }
 0x6ec   :  { %v3258_v0 = vpop.f32.mrf.mxu1 }
 0x6ee   :  { %v7773_v12 = vpop.f32.mrf.mxu1 }
 0x6f0   :  { %v3344_v6 = vpop.f32.mrf.mxu1 }
 0x6f1   :  { %v3486_v56 = vsel %vm1046_vm0, %v3344_v6, 0.0  ;;  %v6885_v6 = vld [vmem:[%s10726_s10] ss:$0 sm:$0xff] }
 0x6f2   :  { %v7784_v19 = vpop.f32.mrf.mxu1 }
 0x6f4   :  { %v3347_v20 = vpop.f32.mrf.mxu1 }
 0x6f6   :  { %v3209_v3 = vpop.f32.mrf.mxu0  ;;  %v7785_v22 = vpop.f32.mrf.mxu1 }
 0x6f7   :  { %v3480_v33 = vsel %vm1046_vm0, %v3209_v3, 0.0  ;;  %v6886_v3 = vld [vmem:[%s10744_s25] ss:$0 sm:$0xff] }
 0x6f8   :  { %v7766_v25 = vpop.f32.mrf.mxu0  ;;  %v3430_v26 = vpop.f32.mrf.mxu1  ;;  %v3481_v55 = vadd.f32 %v3480_v33, %v3479_v9 }
 0x6f9   :  { %v3489_v60 = vsel %vm1046_vm0, %v3430_v26, 0.0 }
 0x6fa   :  { %v3212_v2 = vpop.f32.mrf.mxu0  ;;  %v7796_v30 = vpop.f32.mrf.mxu1  ;;  %v3483_v46 = vadd.f32 %v3482_v10, %v3481_v55  ;;  %v8285_v10 = vld [vmem:[%s10730_s14 + $0x30] sm:$0xff]  }
 0x6fc   :  { %v7767_v32 = vpop.f32.mrf.mxu0  ;;  %v3433_v23 = vpop.f32.mrf.mxu1 }
 0x6fd   :  { %v8284_v32 = vld [vmem:[%s10730_s14 + $0x38] sm:$0xff]   ;;  %v8286_v23 = vld [vmem:[%s10730_s14 + $0x28] sm:$0xff]  }
 0x6fe   :  { %v3301_v35 = vpop.f32.mrf.mxu0  ;;  %v7797_v36 = vpop.f32.mrf.mxu1 }
 0x6ff   :  { %v3484_v38 = vsel %vm1046_vm0, %v3301_v35, 0.0  ;;  %v8287_v35 = vld [vmem:[%s10730_s14 + $0x20] sm:$0xff]   ;;  %v8289_v36 = vld [vmem:[%s10730_s14 + $0x10] sm:$0xff]  }
 0x700   :  { %v3485_v50 = vadd.f32 %v3484_v38, %v3483_v46  ;;  %v7778_v51 = vpop.f32.mrf.mxu0  ;;  %v8288_v46 = vld [vmem:[%s10730_s14 + $0x18] sm:$0xff]   ;;  %v8290_v38 = vld [vmem:[%s10730_s14 + $0x8] sm:$0xff]  }
 0x702   :  { %v3498_v28 = vadd.f32 %v6884_v41, %v3485_v50  ;;  %v3304_v54 = vpop.f32.mrf.mxu0  ;;  %v6887_v50 = vld [vmem:[%s10729_s13] ss:$0 sm:$0xff] }
 0x704   :  { %v7779_v34 = vpop.f32.mrf.mxu0  ;;  %v10071_v43 = vadd.f32 %v3498_v28, %v9613_v37 }
 0x706   :  { %v3387_v44 = vpop.f32.mrf.mxu0  ;;  %v3504_v45 = vsel %vm1046_vm0, %v10071_v43, 0.0 }
 0x707   :  { %v3487_v48 = vsel %vm1046_vm0, %v3387_v44, 0.0  ;;  %3505 = vadd.xlane.f32.xlu0 %v3504_v45 }
 0x708   :  { %v7790_v53 = vpop.f32.mrf.mxu0  ;;  %v3488_v57 = vadd.f32 %v3487_v48, %v3486_v56 }
 0x70a   :  { %v3390_v31 = vpop.f32.mrf.mxu0  ;;  %v3490_v62 = vadd.f32 %v3489_v60, %v3488_v57 }
 0x70c   :  { %v7791_v59 = vpop.f32.mrf.mxu0 }
 0x70e   :  { %v3473_v61 = vpop.f32.mrf.mxu0 }
 0x70f   :  { %v3491_v37 = vsel %vm1046_vm0, %v3473_v61, 0.0 }
 0x710   :  { %v3492_v21 = vadd.f32 %v3491_v37, %v3490_v62  ;;  %v7802_v63 = vpop.f32.mrf.mxu0 }
 0x712   :  { %v3499_v40 = vadd.f32 %v6884_v41, %v3492_v21  ;;  %v3476_v24 = vpop.f32.mrf.mxu0  ;;  %v8291_v41 = vld [vmem:[%s10730_s14] sm:$0xff]  }
 0x714   :  { %v7803_v29 = vpop.f32.mrf.mxu0  ;;  %v10080_v16 = vadd.f32 %v3499_v40, %v9617_v8 }
 0x716   :  { %v3507_v4 = vsel %vm1046_vm0, %v10080_v16, 0.0 }
 0x717   :  { %3508 = vadd.xlane.f32.xlu1 %v3507_v4 }
 0x790   :  { %v3506_v5 = vpop.xlane.xlu0 %3505 }
 0x791   :  { %v3510_v42 = vmul.f32 0.03125, %v3506_v5 }
 0x793   :  { %v3512_v13 = vsub.f32 %v10071_v43, %v3510_v42 }
 0x795   :  { %v3514_v1 = vmul.f32 %v3512_v13, %v3512_v13 }
 0x797   :  { %v3516_v49 = vsel %vm1046_vm0, %v3514_v1, 0.0 }
 0x798   :  { %3517 = vadd.xlane.f32.xlu0 %v3516_v49 }
 0x7a0   :  { %v3509_v52 = vpop.xlane.xlu1 %3508 }
 0x7a1   :  { %v3511_v7 = vmul.f32 0.03125, %v3509_v52 }
 0x7a3   :  { %v3513_v11 = vsub.f32 %v10080_v16, %v3511_v7 }
 0x7a5   :  { %v3515_v39 = vmul.f32 %v3513_v11, %v3513_v11 }
 0x7a7   :  { %v3519_v8 = vsel %vm1046_vm0, %v3515_v39, 0.0  ;;  %v6892_v39 = vld [vmem:[%s10731_s15] ss:$0 sm:$0xff] }
 0x7a8   :  { %3520 = vadd.xlane.f32.xlu1 %v3519_v8 }
 0x821   :  { %v3518_v15 = vpop.xlane.xlu0 %3517 }
 0x822   :  { %v3522_v17 = vmul.f32 0.03125, %v3518_v15 }
 0x824   :  { %v3524_v47 = vadd.f32 1e-05, %v3522_v17 }
 0x826   :  { %8362 = vrsqrt.f32 %v3524_v47 }
 0x831   :  { %v3521_v18 = vpop.xlane.xlu1 %3520 }
 0x832   :  { %v3523_v0 = vmul.f32 0.03125, %v3521_v18 }
 0x833   :  { %v8363_v12 = vpop.eup %8362 }
 0x834   :  { %v3528_v19 = vmul.f32 %v8363_v12, %v3512_v13  ;;  %v3525_v20 = vadd.f32 1e-05, %v3523_v0 }
 0x836   :  { %8364 = vrsqrt.f32 %v3525_v20  ;;  %v3534_v22 = vmul.f32 %v6885_v6, %v3528_v19 }
 0x838   :  { %v3540_v33 = vadd.f32 %v6886_v3, %v3534_v22 }
 0x83a   :  { %v3542_v25 = vpack.c.bf16 %v3540_v33, %v3540_v33 }
 0x83c   :  { %7809 = vmatmul.mubr.msk.bf16.vlgmr.msra.gmra.mxu1 %vm1046_vm0, %v3542_v25 }
 0x83d   :  { %7836 = vmatprep.mubr.msk.bf16.mxu1 %vm8456_vm1, %v8455_v27  ;;  %7821 = vmatpush3.bf16.msra.mxu1 %v8284_v32 }
 0x83e   :  { %7822 = vmatprep.subr.bf16.mxu1 %v8455_v27 }
 0x841   :  { %7823 = vmatpush3.bf16.msra.mxu1 %v8285_v10 }
 0x842   :  { %7824 = vmatprep.subr.bf16.mxu1 %v8455_v27 }
 0x843   :  { %v8365_v9 = vpop.eup %8364 }
 0x844   :  { %v3529_v26 = vmul.f32 %v8365_v9, %v3513_v11 }
 0x845   :  { %7825 = vmatpush3.bf16.msra.mxu1 %v8286_v23 }
 0x846   :  { %v3535_v55 = vmul.f32 %v6885_v6, %v3529_v26  ;;  %7826 = vmatprep.subr.bf16.mxu1 %v8455_v27 }
 0x848   :  { %v3541_v2 = vadd.f32 %v6886_v3, %v3535_v55 }
 0x849   :  { %7827 = vmatpush3.bf16.msra.mxu1 %v8287_v35 }
 0x84a   :  { %v3543_v30 = vpack.c.bf16 %v3541_v2, %v3541_v2  ;;  %7828 = vmatprep.subr.bf16.mxu1 %v8455_v27 }
 0x84c   :  { %7817 = vmatmul.mubr.msk.bf16.vlgmr.msra.gmra.mxu0 %vm1046_vm0, %v3543_v30 }
 0x84d   :  { %7856 = vmatprep.mubr.msk.bf16.mxu0 %vm8456_vm1, %v8455_v27  ;;  %7841 = vmatpush3.bf16.msra.mxu0 %v8284_v32 }
 0x84e   :  { %7842 = vmatprep.subr.bf16.mxu0 %v8455_v27  ;;  %7829 = vmatpush3.bf16.msra.mxu1 %v8288_v46 }
 0x84f   :  { %7830 = vmatprep.subr.bf16.mxu1 %v8455_v27 }
 0x851   :  { %7843 = vmatpush3.bf16.msra.mxu0 %v8285_v10  ;;  %v8292_v10 = vld [vmem:[%s10721_s5 + $0x48] sm:$0xff]  }
 0x852   :  { %7844 = vmatprep.subr.bf16.mxu0 %v8455_v27  ;;  %7831 = vmatpush3.bf16.msra.mxu1 %v8289_v36 }
 0x853   :  { %7832 = vmatprep.subr.bf16.mxu1 %v8455_v27 }
 0x855   :  { %7845 = vmatpush3.bf16.msra.mxu0 %v8286_v23  ;;  %v8293_v23 = vld [vmem:[%s10721_s5 + $0x58] sm:$0xff]  }
 0x856   :  { %7846 = vmatprep.subr.bf16.mxu0 %v8455_v27  ;;  %7833 = vmatpush3.bf16.msra.mxu1 %v8290_v38 }
 0x857   :  { %7834 = vmatprep.subr.bf16.mxu1 %v8455_v27 }
 0x859   :  { %7847 = vmatpush3.bf16.msra.mxu0 %v8287_v35  ;;  %v8294_v35 = vld [vmem:[%s10721_s5 + $0x40] sm:$0xff]  }
 0x85a   :  { %7848 = vmatprep.subr.bf16.mxu0 %v8455_v27  ;;  %7835 = vmatpush3.bf16.msra.mxu1 %v8291_v41 }
 0x85b   :  { %7860 = vmatprep.subr.bf16.mxu1 %v8455_v27 }
 0x85d   :  { %7849 = vmatpush3.bf16.msra.mxu0 %v8288_v46  ;;  %v8295_v46 = vld [vmem:[%s10721_s5 + $0x50] sm:$0xff]  }
 0x85e   :  { %7850 = vmatprep.subr.bf16.mxu0 %v8455_v27 }
 0x861   :  { %7851 = vmatpush3.bf16.msra.mxu0 %v8289_v36 }
 0x862   :  { %7852 = vmatprep.subr.bf16.mxu0 %v8455_v27 }
 0x865   :  { %7853 = vmatpush3.bf16.msra.mxu0 %v8290_v38 }
 0x866   :  { %7854 = vmatprep.subr.bf16.mxu0 %v8455_v27 }
 0x869   :  { %7855 = vmatpush3.bf16.msra.mxu0 %v8291_v41 }
 0x86a   :  { %7868 = vmatprep.subr.bf16.mxu0 %v8455_v27 }
 0x8fc   :  { %v3602_v51 = vpop.f32.mrf.mxu1 }
 0x8fd   :  { %v3603_v28 = vadd.f32 %v6887_v50, %v3602_v51 }
 0x8fe   :  { %v7810_v54 = vpop.f32.mrf.mxu1 }
 0x8ff   :  { %v3651_v34 = vmul.f32 %v3603_v28, %v3603_v28  ;;  %v6901_v54 = vld [vmem:[%s10719_s3 + $0x1] ss:$0 sm:$0xff] }
 0x900   :  { %v3605_v44 = vpop.f32.mrf.mxu1 }
 0x901   :  { %v3653_v45 = vmul.f32 %v3651_v34, %v3603_v28 }
 0x902   :  { %v7811_v48 = vpop.f32.mrf.mxu1 }
 0x903   :  { %v3655_v53 = vmul.f32 0.044715, %v3653_v45  ;;  %v6902_v45 = vld [vmem:[%s10720_s4 + $0x1] ss:$0 sm:$0xff] }
 0x905   :  { %v3657_v56 = vadd.f32 %v3655_v53, %v3603_v28 }
 0x907   :  { %v3659_v57 = vmul.f32 0.7978846, %v3657_v56  ;;  %v8296_v56 = vld [vmem:[%s10721_s5 + $0x68] sm:$0xff]  }
 0x909   :  { %8366 = vtanh.f32 %v3659_v57  ;;  %v8297_v57 = vld [vmem:[%s10721_s5 + $0x78] sm:$0xff]  }
 0x90c   :  { %v3645_v31 = vpop.f32.mrf.mxu0 }
 0x90d   :  { %v3646_v59 = vadd.f32 %v6887_v50, %v3645_v31 }
 0x90e   :  { %v7818_v60 = vpop.f32.mrf.mxu0 }
 0x90f   :  { %v3652_v61 = vmul.f32 %v3646_v59, %v3646_v59  ;;  %v8299_v60 = vld [vmem:[%s10721_s5 + $0x70] sm:$0xff]  }
 0x910   :  { %v3648_v62 = vpop.f32.mrf.mxu0 }
 0x911   :  { %v3654_v37 = vmul.f32 %v3652_v61, %v3646_v59 }
 0x912   :  { %v7819_v21 = vpop.f32.mrf.mxu0 }
 0x913   :  { %v3656_v63 = vmul.f32 0.044715, %v3654_v37 }
 0x915   :  { %v3658_v40 = vadd.f32 %v3656_v63, %v3646_v59 }
 0x916   :  { %v8367_v24 = vpop.eup %8366 }
 0x917   :  { %v3660_v29 = vmul.f32 0.7978846, %v3658_v40  ;;  %v3663_v4 = vadd.f32 1.0, %v8367_v24  ;;  %v8300_v40 = vld [vmem:[%s10722_s6 + $0x48] sm:$0xff]   ;;  %v8301_v24 = vld [vmem:[%s10722_s6 + $0x58] sm:$0xff]  }
 0x919   :  { %8368 = vtanh.f32 %v3660_v29  ;;  %v3665_v5 = vmul.f32 0.5, %v3663_v4  ;;  %v8302_v29 = vld [vmem:[%s10722_s6 + $0x40] sm:$0xff]   ;;  %v8303_v4 = vld [vmem:[%s10722_s6 + $0x50] sm:$0xff]  }
 0x91b   :  { %v3667_v42 = vmul.f32 %v3665_v5, %v3603_v28  ;;  %v8304_v5 = vld [vmem:[%s10722_s6 + $0x68] sm:$0xff]  }
 0x91d   :  { %v3669_v13 = vpack.c.bf16 %v3667_v42, %v3667_v42  ;;  %v8305_v42 = vld [vmem:[%s10722_s6 + $0x78] sm:$0xff]  }
 0x91f   :  { %7837 = vmatmul.mubr.bf16.vlgmr.msra.gmra.mxu1 %v3669_v13  ;;  %v8306_v13 = vld [vmem:[%s10722_s6 + $0x60] sm:$0xff]  }
 0x920   :  { %7864 = vmatprep.mubr.msk.bf16.mxu1 %vm8456_vm1, %v8455_v27  ;;  %7861 = vmatpush3.bf16.msra.mxu1 %v8292_v10 }
 0x921   :  { %7862 = vmatprep.subr.bf16.mxu1 %v8455_v27 }
 0x924   :  { %7863 = vmatpush3.bf16.msra.mxu1 %v8294_v35 }
 0x925   :  { %7876 = vmatprep.subr.bf16.mxu1 %v8455_v27 }
 0x926   :  { %v8369_v1 = vpop.eup %8368 }
 0x927   :  { %v3664_v49 = vadd.f32 1.0, %v8369_v1  ;;  %v8307_v1 = vld [vmem:[%s10722_s6 + $0x70] sm:$0xff]  }
 0x929   :  { %v3666_v52 = vmul.f32 0.5, %v3664_v49  ;;  %v8308_v49 = vld [vmem:[%s10723_s7 + $0x48] sm:$0xff]  }
 0x92b   :  { %v3668_v7 = vmul.f32 %v3666_v52, %v3646_v59  ;;  %v8298_v59 = vld [vmem:[%s10721_s5 + $0x60] sm:$0xff]   ;;  %v8309_v52 = vld [vmem:[%s10723_s7 + $0x58] sm:$0xff]  }
 0x92d   :  { %v3670_v11 = vpack.c.bf16 %v3668_v7, %v3668_v7  ;;  %v8310_v7 = vld [vmem:[%s10723_s7 + $0x40] sm:$0xff]  }
 0x92f   :  { %7857 = vmatmul.mubr.bf16.vlgmr.msra.gmra.mxu0 %v3670_v11  ;;  %v8311_v11 = vld [vmem:[%s10723_s7 + $0x50] sm:$0xff]  }
 0x930   :  { %7872 = vmatprep.mubr.msk.bf16.mxu0 %vm8456_vm1, %v8455_v27  ;;  %7869 = vmatpush3.bf16.msra.mxu0 %v8293_v23 }
 0x931   :  { %7870 = vmatprep.subr.bf16.mxu0 %v8455_v27 }
 0x934   :  { %7871 = vmatpush3.bf16.msra.mxu0 %v8295_v46 }
 0x935   :  { %7884 = vmatprep.subr.bf16.mxu0 %v8455_v27 }
 0x9df   :  { %v3774_v8 = vpop.f32.mrf.mxu1 }
 0x9e0   :  { %v3775_v58 = vadd.f32 %v6892_v39, %v3774_v8  ;;  %v8313_v8 = vld [vmem:[%s10723_s7 + $0x78] sm:$0xff]  }
 0x9e1   :  { %v7838_v14 = vpop.f32.mrf.mxu1 }
 0x9e2   :  { %v10161_v15 = vadd.f32 %v3775_v58, %v10071_v43  ;;  %v8314_v58 = vld [vmem:[%s10723_s7 + $0x60] sm:$0xff]   ;;  %v8315_v14 = vld [vmem:[%s10723_s7 + $0x70] sm:$0xff]  }
 0x9e3   :  { %v3777_v17 = vpop.f32.mrf.mxu1 }
 0x9e4   :  { %v3824_v47 = vsel %vm1046_vm0, %v10161_v15, 0.0 }
 0x9e5   :  { %3825 = vadd.xlane.f32.xlu0 %v3824_v47  ;;  %v7839_v18 = vpop.f32.mrf.mxu1 }
 0x9ef   :  { %v3814_v0 = vpop.f32.mrf.mxu0 }
 0x9f0   :  { %v3815_v12 = vadd.f32 %v6892_v39, %v3814_v0  ;;  %v8312_v39 = vld [vmem:[%s10723_s7 + $0x68] sm:$0xff]  }
 0x9f1   :  { %v7858_v6 = vpop.f32.mrf.mxu0 }
 0x9f2   :  { %v10166_v19 = vadd.f32 %v3815_v12, %v10080_v16 }
 0x9f3   :  { %v3817_v20 = vpop.f32.mrf.mxu0 }
 0x9f4   :  { %v3827_v3 = vsel %vm1046_vm0, %v10166_v19, 0.0 }
 0x9f5   :  { %3828 = vadd.xlane.f32.xlu1 %v3827_v3  ;;  %v7859_v22 = vpop.f32.mrf.mxu0 }
 0xa6e   :  { %v3826_v43 = vpop.xlane.xlu0 %3825 }
 0xa6f   :  { %v3830_v33 = vmul.f32 0.03125, %v3826_v43 }
 0xa71   :  { %v3832_v25 = vsub.f32 %v10161_v15, %v3830_v33 }
 0xa73   :  { %v3834_v9 = vmul.f32 %v3832_v25, %v3832_v25 }
 0xa75   :  { %v3836_v26 = vsel %vm1046_vm0, %v3834_v9, 0.0 }
 0xa76   :  { %3837 = vadd.xlane.f32.xlu0 %v3836_v26 }
 0xa7e   :  { %v3829_v55 = vpop.xlane.xlu1 %3828 }
 0xa7f   :  { %v3831_v2 = vmul.f32 0.03125, %v3829_v55 }
 0xa81   :  { %v3833_v30 = vsub.f32 %v10166_v19, %v3831_v2 }
 0xa83   :  { %v3835_v16 = vmul.f32 %v3833_v30, %v3833_v30 }
 0xa85   :  { %v3839_v32 = vsel %vm1046_vm0, %v3835_v16, 0.0 }
 0xa86   :  { %3840 = vadd.xlane.f32.xlu1 %v3839_v32 }
 0xaff   :  { %v3838_v36 = vpop.xlane.xlu0 %3837 }
 0xb00   :  { %v3842_v38 = vmul.f32 0.03125, %v3838_v36 }
 0xb02   :  { %v3844_v41 = vadd.f32 1e-05, %v3842_v38 }
 0xb04   :  { %8370 = vrsqrt.f32 %v3844_v41 }
 0xb0f   :  { %v3841_v50 = vpop.xlane.xlu1 %3840 }
 0xb10   :  { %v3843_v51 = vmul.f32 0.03125, %v3841_v50 }
 0xb11   :  { %v8371_v28 = vpop.eup %8370 }
 0xb12   :  { %v3848_v34 = vmul.f32 %v8371_v28, %v3832_v25  ;;  %v3845_v44 = vadd.f32 1e-05, %v3843_v51 }
 0xb14   :  { %v3854_v48 = vmul.f32 %v6901_v54, %v3848_v34  ;;  %8372 = vrsqrt.f32 %v3845_v44 }
 0xb16   :  { %v3860_v53 = vadd.f32 %v6902_v45, %v3854_v48 }
 0xb18   :  { %v10202_v31 = vpack.c.bf16 %v3860_v53, %v3860_v53 }
 0xb1a   :  { %7865 = vmatmul.mubr.msk.bf16.vlgmr.msra.gmra.mxu1 %vm1046_vm0, %v10202_v31  ;;  %7873 = vmatmul.mubr.msk.bf16.vlgmr.msra.gmra.mxu0 %vm1046_vm0, %v10202_v31 }
 0xb1b   :  { %7877 = vmatpush3.bf16.msra.mxu1 %v8296_v56  ;;  %7885 = vmatpush3.bf16.msra.mxu0 %v8297_v57 }
 0xb1c   :  { %7878 = vmatprep.subr.bf16.mxu1 %v8455_v27  ;;  %7886 = vmatprep.subr.bf16.mxu0 %v8455_v27 }
 0xb1d   :  { %7880 = vmatprep.mubr.msk.bf16.mxu1 %vm8456_vm1, %v8455_v27  ;;  %7888 = vmatprep.mubr.msk.bf16.mxu0 %vm8456_vm1, %v8455_v27 }
 0xb1f   :  { %7879 = vmatpush3.bf16.msra.mxu1 %v8298_v59  ;;  %7887 = vmatpush3.bf16.msra.mxu0 %v8299_v60 }
 0xb20   :  { %7892 = vmatprep.subr.bf16.mxu1 %v8455_v27  ;;  %7900 = vmatprep.subr.bf16.mxu0 %v8455_v27 }
 0xb21   :  { %v8373_v61 = vpop.eup %8372 }
 0xb22   :  { %v3849_v62 = vmul.f32 %v8373_v61, %v3833_v30  ;;  %7881 = vmatmul.mubr.msk.bf16.vlgmr.msra.gmra.mxu1 %vm1046_vm0, %v10202_v31  ;;  %7889 = vmatmul.mubr.msk.bf16.vlgmr.msra.gmra.mxu0 %vm1046_vm0, %v10202_v31 }
 0xb23   :  { %7893 = vmatpush3.bf16.msra.mxu1 %v8292_v10  ;;  %7901 = vmatpush3.bf16.msra.mxu0 %v8293_v23 }
 0xb24   :  { %v3855_v37 = vmul.f32 %v6901_v54, %v3849_v62  ;;  %7894 = vmatprep.subr.bf16.mxu1 %v8455_v27  ;;  %7902 = vmatprep.subr.bf16.mxu0 %v8455_v27 }
 0xb25   :  { %7896 = vmatprep.mubr.msk.bf16.mxu1 %vm8456_vm1, %v8455_v27  ;;  %7904 = vmatprep.mubr.msk.bf16.mxu0 %vm8456_vm1, %v8455_v27 }
 0xb26   :  { %v3861_v21 = vadd.f32 %v6902_v45, %v3855_v37 }
 0xb27   :  { %7895 = vmatpush3.bf16.msra.mxu1 %v8294_v35  ;;  %7903 = vmatpush3.bf16.msra.mxu0 %v8295_v46 }
 0xb28   :  { %v10232_v63 = vpack.c.bf16 %v3861_v21, %v3861_v21  ;;  %7908 = vmatprep.subr.bf16.mxu1 %v8455_v27  ;;  %7916 = vmatprep.subr.bf16.mxu0 %v8455_v27 }
 0xb2a   :  { %7897 = vmatmul.mubr.msk.bf16.vlgmr.msra.gmra.mxu1 %vm1046_vm0, %v10232_v63  ;;  %7905 = vmatmul.mubr.msk.bf16.vlgmr.msra.gmra.mxu0 %vm1046_vm0, %v10232_v63 }
 0xb2b   :  { %7909 = vmatpush3.bf16.msra.mxu1 %v8296_v56  ;;  %7917 = vmatpush3.bf16.msra.mxu0 %v8297_v57 }
 0xb2c   :  { %7910 = vmatprep.subr.bf16.mxu1 %v8455_v27  ;;  %7918 = vmatprep.subr.bf16.mxu0 %v8455_v27 }
 0xb2d   :  { %7912 = vmatprep.mubr.msk.bf16.mxu1 %vm8456_vm1, %v8455_v27  ;;  %7920 = vmatprep.mubr.msk.bf16.mxu0 %vm8456_vm1, %v8455_v27 }
 0xb2f   :  { %7911 = vmatpush3.bf16.msra.mxu1 %v8298_v59  ;;  %7919 = vmatpush3.bf16.msra.mxu0 %v8299_v60 }
 0xb30   :  { %7924 = vmatprep.subr.bf16.mxu1 %v8455_v27  ;;  %7932 = vmatprep.subr.bf16.mxu0 %v8455_v27 }
 0xb32   :  { %7913 = vmatmul.mubr.msk.bf16.vlgmr.msra.gmra.mxu1 %vm1046_vm0, %v10232_v63  ;;  %7921 = vmatmul.mubr.msk.bf16.vlgmr.msra.gmra.mxu0 %vm1046_vm0, %v10232_v63 }
 0xb33   :  { %7925 = vmatpush3.bf16.msra.mxu1 %v8300_v40  ;;  %7933 = vmatpush3.bf16.msra.mxu0 %v8301_v24 }
 0xb34   :  { %7926 = vmatprep.subr.bf16.mxu1 %v8455_v27  ;;  %7934 = vmatprep.subr.bf16.mxu0 %v8455_v27 }
 0xb35   :  { %7928 = vmatprep.mubr.msk.bf16.mxu1 %vm8456_vm1, %v8455_v27  ;;  %7936 = vmatprep.mubr.msk.bf16.mxu0 %vm8456_vm1, %v8455_v27 }
 0xb37   :  { %7927 = vmatpush3.bf16.msra.mxu1 %v8302_v29  ;;  %7935 = vmatpush3.bf16.msra.mxu0 %v8303_v4 }
 0xb38   :  { %7940 = vmatprep.subr.bf16.mxu1 %v8455_v27  ;;  %7948 = vmatprep.subr.bf16.mxu0 %v8455_v27 }
 0xb3a   :  { %7929 = vmatmul.mubr.msk.bf16.vlgmr.msra.gmra.mxu1 %vm1046_vm0, %v10202_v31  ;;  %7937 = vmatmul.mubr.msk.bf16.vlgmr.msra.gmra.mxu0 %vm1046_vm0, %v10202_v31 }
 0xb3b   :  { %7941 = vmatpush3.bf16.msra.mxu1 %v8304_v5  ;;  %7949 = vmatpush3.bf16.msra.mxu0 %v8305_v42 }
 0xb3c   :  { %7942 = vmatprep.subr.bf16.mxu1 %v8455_v27  ;;  %7950 = vmatprep.subr.bf16.mxu0 %v8455_v27 }
 0xb3d   :  { %7944 = vmatprep.mubr.msk.bf16.mxu1 %vm8456_vm1, %v8455_v27  ;;  %7952 = vmatprep.mubr.msk.bf16.mxu0 %vm8456_vm1, %v8455_v27 }
 0xb3f   :  { %7943 = vmatpush3.bf16.msra.mxu1 %v8306_v13  ;;  %7951 = vmatpush3.bf16.msra.mxu0 %v8307_v1 }
 0xb40   :  { %7956 = vmatprep.subr.bf16.mxu1 %v8455_v27  ;;  %7964 = vmatprep.subr.bf16.mxu0 %v8455_v27 }
 0xb42   :  { %7945 = vmatmul.mubr.msk.bf16.vlgmr.msra.gmra.mxu1 %vm1046_vm0, %v10202_v31  ;;  %7953 = vmatmul.mubr.msk.bf16.vlgmr.msra.gmra.mxu0 %vm1046_vm0, %v10202_v31 }
 0xb43   :  { %7957 = vmatpush3.bf16.msra.mxu1 %v8300_v40  ;;  %7965 = vmatpush3.bf16.msra.mxu0 %v8301_v24 }
 0xb44   :  { %7958 = vmatprep.subr.bf16.mxu1 %v8455_v27  ;;  %7966 = vmatprep.subr.bf16.mxu0 %v8455_v27 }
 0xb45   :  { %7960 = vmatprep.mubr.msk.bf16.mxu1 %vm8456_vm1, %v8455_v27  ;;  %7968 = vmatprep.mubr.msk.bf16.mxu0 %vm8456_vm1, %v8455_v27 }
 0xb47   :  { %7959 = vmatpush3.bf16.msra.mxu1 %v8302_v29  ;;  %7967 = vmatpush3.bf16.msra.mxu0 %v8303_v4 }
 0xb48   :  { %7972 = vmatprep.subr.bf16.mxu1 %v8455_v27  ;;  %7980 = vmatprep.subr.bf16.mxu0 %v8455_v27 }
 0xb4a   :  { %7961 = vmatmul.mubr.msk.bf16.vlgmr.msra.gmra.mxu1 %vm1046_vm0, %v10232_v63  ;;  %7969 = vmatmul.mubr.msk.bf16.vlgmr.msra.gmra.mxu0 %vm1046_vm0, %v10232_v63 }
 0xb4b   :  { %7973 = vmatpush3.bf16.msra.mxu1 %v8304_v5  ;;  %7981 = vmatpush3.bf16.msra.mxu0 %v8305_v42 }
 0xb4c   :  { %7974 = vmatprep.subr.bf16.mxu1 %v8455_v27  ;;  %7982 = vmatprep.subr.bf16.mxu0 %v8455_v27 }
 0xb4d   :  { %7976 = vmatprep.mubr.msk.bf16.mxu1 %vm8456_vm1, %v8455_v27  ;;  %7984 = vmatprep.mubr.msk.bf16.mxu0 %vm8456_vm1, %v8455_v27 }
 0xb4f   :  { %7975 = vmatpush3.bf16.msra.mxu1 %v8306_v13  ;;  %7983 = vmatpush3.bf16.msra.mxu0 %v8307_v1 }
 0xb50   :  { %7988 = vmatprep.subr.bf16.mxu1 %v8455_v27  ;;  %7996 = vmatprep.subr.bf16.mxu0 %v8455_v27 }
 0xb52   :  { %7977 = vmatmul.mubr.msk.bf16.vlgmr.msra.gmra.mxu1 %vm1046_vm0, %v10232_v63  ;;  %7985 = vmatmul.mubr.msk.bf16.vlgmr.msra.gmra.mxu0 %vm1046_vm0, %v10232_v63 }
 0xb53   :  { %7989 = vmatpush3.bf16.msra.mxu1 %v8308_v49  ;;  %7997 = vmatpush3.bf16.msra.mxu0 %v8309_v52 }
 0xb54   :  { %7990 = vmatprep.subr.bf16.mxu1 %v8455_v27  ;;  %7998 = vmatprep.subr.bf16.mxu0 %v8455_v27 }
 0xb55   :  { %7992 = vmatprep.mubr.msk.bf16.mxu1 %vm8456_vm1, %v8455_v27  ;;  %8000 = vmatprep.mubr.msk.bf16.mxu0 %vm8456_vm1, %v8455_v27 }
 0xb57   :  { %7991 = vmatpush3.bf16.msra.mxu1 %v8310_v7  ;;  %7999 = vmatpush3.bf16.msra.mxu0 %v8311_v11 }
 0xb58   :  { %8004 = vmatprep.subr.bf16.mxu1 %v8455_v27  ;;  %8012 = vmatprep.subr.bf16.mxu0 %v8455_v27 }
 0xb5a   :  { %7993 = vmatmul.mubr.msk.bf16.vlgmr.msra.gmra.mxu1 %vm1046_vm0, %v10202_v31  ;;  %8001 = vmatmul.mubr.msk.bf16.vlgmr.msra.gmra.mxu0 %vm1046_vm0, %v10202_v31 }
 0xb5b   :  { %8005 = vmatpush3.bf16.msra.mxu1 %v8312_v39  ;;  %8013 = vmatpush3.bf16.msra.mxu0 %v8313_v8 }
 0xb5c   :  { %8006 = vmatprep.subr.bf16.mxu1 %v8455_v27  ;;  %8014 = vmatprep.subr.bf16.mxu0 %v8455_v27 }
 0xb5d   :  { %8008 = vmatprep.mubr.msk.bf16.mxu1 %vm8456_vm1, %v8455_v27  ;;  %8016 = vmatprep.mubr.msk.bf16.mxu0 %vm8456_vm1, %v8455_v27 }
 0xb5f   :  { %8007 = vmatpush3.bf16.msra.mxu1 %v8314_v58  ;;  %8015 = vmatpush3.bf16.msra.mxu0 %v8315_v14 }
 0xb60   :  { %8020 = vmatprep.subr.bf16.mxu1 %v8455_v27  ;;  %8028 = vmatprep.subr.bf16.mxu0 %v8455_v27 }
 0xb62   :  { %8009 = vmatmul.mubr.msk.bf16.vlgmr.msra.gmra.mxu1 %vm1046_vm0, %v10202_v31  ;;  %8017 = vmatmul.mubr.msk.bf16.vlgmr.msra.gmra.mxu0 %vm1046_vm0, %v10202_v31 }
 0xb63   :  { %8021 = vmatpush3.bf16.msra.mxu1 %v8308_v49  ;;  %8029 = vmatpush3.bf16.msra.mxu0 %v8309_v52 }
 0xb64   :  { %8022 = vmatprep.subr.bf16.mxu1 %v8455_v27  ;;  %8030 = vmatprep.subr.bf16.mxu0 %v8455_v27 }
 0xb65   :  { %8024 = vmatprep.mubr.msk.bf16.mxu1 %vm8456_vm1, %v8455_v27  ;;  %8032 = vmatprep.mubr.msk.bf16.mxu0 %vm8456_vm1, %v8455_v27 }
 0xb67   :  { %8023 = vmatpush3.bf16.msra.mxu1 %v8310_v7  ;;  %8031 = vmatpush3.bf16.msra.mxu0 %v8311_v11 }
 0xb68   :  { %8036 = vmatprep.subr.bf16.mxu1 %v8455_v27  ;;  %8044 = vmatprep.subr.bf16.mxu0 %v8455_v27 }
 0xb6a   :  { %8025 = vmatmul.mubr.msk.bf16.vlgmr.msra.gmra.mxu1 %vm1046_vm0, %v10232_v63  ;;  %8033 = vmatmul.mubr.msk.bf16.vlgmr.msra.gmra.mxu0 %vm1046_vm0, %v10232_v63 }
 0xb6b   :  { %8037 = vmatpush3.bf16.msra.mxu1 %v8312_v39  ;;  %8045 = vmatpush3.bf16.msra.mxu0 %v8313_v8 }
 0xb6c   :  { %8038 = vmatprep.subr.bf16.mxu1 %v8455_v27  ;;  %8046 = vmatprep.subr.bf16.mxu0 %v8455_v27 }
 0xb6d   :  { %8040 = vmatprep.mubr.msk.bf16.mxu1 %vm8456_vm1, %v8455_v27  ;;  %8048 = vmatprep.mubr.msk.bf16.mxu0 %vm8456_vm1, %v8455_v27 }
 0xb6f   :  { %8039 = vmatpush3.bf16.msra.mxu1 %v8314_v58  ;;  %8047 = vmatpush3.bf16.msra.mxu0 %v8315_v14 }
 0xb70   :  { %8052 = vmatprep.subr.bf16.mxu1 %v8455_v27  ;;  %8058 = vmatprep.subr.bf16.mxu0 %v8455_v27 }
 0xb72   :  { %8041 = vmatmul.mubr.msk.bf16.vlgmr.msra.gmra.mxu1 %vm1046_vm0, %v10232_v63  ;;  %8049 = vmatmul.mubr.msk.bf16.vlgmr.msra.gmra.mxu0 %vm1046_vm0, %v10232_v63 }
 0xb73   :  { %8054 = vmatprep.mubr.msk.bf16.mxu1 %vm8456_vm1, %v8455_v27  ;;  %8060 = vmatprep.mubr.msk.bf16.mxu0 %vm8456_vm1, %v8455_v27 }
 0xbda   :  { %v3930_v17 = vpop.f32.mrf.mxu1  ;;  %v3982_v47 = vpop.f32.mrf.mxu0 }
 0xbdb   :  { %v5025_v24 = vpack.c.bf16 %v3930_v17, %v3930_v17  ;;  %v5026_v29 = vpack.c.bf16 %v3982_v47, %v3982_v47 }
 0xbdc   :  { %v7866_v18 = vpop.f32.mrf.mxu1  ;;  %v7874_v0 = vpop.f32.mrf.mxu0 }
 0xbde   :  { %v3933_v12 = vpop.f32.mrf.mxu1  ;;  %v3985_v6 = vpop.f32.mrf.mxu0 }
 0xbe0   :  { %v7867_v20 = vpop.f32.mrf.mxu1  ;;  %v7875_v3 = vpop.f32.mrf.mxu0 }
 0xbe2   :  { %v10400_v22 = vpop.f32.mrf.mxu1  ;;  %v10402_v43 = vpop.f32.mrf.mxu0 }
 0xbe3   :  { %v5027_v14 = vpack.c.bf16 %v10400_v22, %v10400_v22  ;;  %v5028_v17 = vpack.c.bf16 %v10402_v43, %v10402_v43 }
 0xbe4   :  { %v7882_v33 = vpop.f32.mrf.mxu1  ;;  %v7890_v25 = vpop.f32.mrf.mxu0 }
 0xbe6   :  { %v4037_v9 = vpop.f32.mrf.mxu1  ;;  %v4089_v26 = vpop.f32.mrf.mxu0 }
 0xbe8   :  { %v7883_v55 = vpop.f32.mrf.mxu1  ;;  %v7891_v2 = vpop.f32.mrf.mxu0 }
 0xbea   :  { %v10404_v30 = vpop.f32.mrf.mxu1  ;;  %v10406_v16 = vpop.f32.mrf.mxu0 }
 0xbeb   :  { %v5029_v26 = vpack.c.bf16 %v10404_v30, %v10404_v30  ;;  %v5030_v55 = vpack.c.bf16 %v10406_v16, %v10406_v16 }
 0xbec   :  { %v7898_v32 = vpop.f32.mrf.mxu1  ;;  %v7906_v10 = vpop.f32.mrf.mxu0 }
 0xbee   :  { %v4132_v23 = vpop.f32.mrf.mxu1  ;;  %v4172_v35 = vpop.f32.mrf.mxu0 }
 0xbf0   :  { %v7899_v46 = vpop.f32.mrf.mxu1  ;;  %v7907_v36 = vpop.f32.mrf.mxu0 }
 0xbf2   :  { %v10408_v38 = vpop.f32.mrf.mxu1  ;;  %v10410_v41 = vpop.f32.mrf.mxu0 }
 0xbf4   :  { %v7914_v50 = vpop.f32.mrf.mxu1  ;;  %v7922_v51 = vpop.f32.mrf.mxu0 }
 0xbf6   :  { %v4212_v28 = vpop.f32.mrf.mxu1  ;;  %v4252_v54 = vpop.f32.mrf.mxu0 }
 0xbf7   :  { %v5031_v54 = vpack.c.bf16 %v10408_v38, %v10408_v38 }
 0xbf8   :  { %v7915_v34 = vpop.f32.mrf.mxu1  ;;  %v7923_v44 = vpop.f32.mrf.mxu0 }
 0xbf9   :  { %v5032_v34 = vpack.c.bf16 %v10410_v41, %v10410_v41 }
 0xbfa   :  { %v4318_v45 = vpop.f32.mrf.mxu1  ;;  %v4370_v48 = vpop.f32.mrf.mxu0 }
 0xbfb   :  { %v5033_v53 = vpack.c.bf16 %v4318_v45, %v4318_v45  ;;  %v5034_v56 = vpack.c.bf16 %v4370_v48, %v4370_v48 }
 0xbfc   :  { %v7930_v57 = vpop.f32.mrf.mxu1  ;;  %v7938_v31 = vpop.f32.mrf.mxu0 }
 0xbfd   :  { %v5045_v59 = vsel %vm2262_vm2, %v5033_v53, 0  ;;  %v5091_v60 = vsel %vm2262_vm2, %v5034_v56, 0 }
 0xbfe   :  { %v4321_v61 = vpop.f32.mrf.mxu1  ;;  %v4373_v62 = vpop.f32.mrf.mxu0  ;;  %8053 = vmatpush3.bf16.xpose.msra.mxu1 %v5045_v59  ;;  %8059 = vmatpush3.bf16.xpose.msra.mxu0 %v5091_v60 }
 0xbff   :  { %8064 = vmatprep.subr.bf16.mxu1 %v8455_v27  ;;  %8070 = vmatprep.subr.bf16.mxu0 %v8455_v27 }
 0xc00   :  { %v7931_v37 = vpop.f32.mrf.mxu1  ;;  %v7939_v21 = vpop.f32.mrf.mxu0 }
 0xc02   :  { %v4422_v63 = vpop.f32.mrf.mxu1  ;;  %v4474_v40 = vpop.f32.mrf.mxu0 }
 0xc03   :  { %v5035_v4 = vpack.c.bf16 %v4422_v63, %v4422_v63  ;;  %v5036_v5 = vpack.c.bf16 %v4474_v40, %v4474_v40 }
 0xc04   :  { %v7946_v42 = vpop.f32.mrf.mxu1  ;;  %v7954_v13 = vpop.f32.mrf.mxu0 }
 0xc05   :  { %v5137_v1 = vsel %vm2262_vm2, %v5035_v4, 0  ;;  %v5183_v49 = vsel %vm2262_vm2, %v5036_v5, 0  ;;  %8055 = vmatmul.mubr.msk.bf16.vlgmr.msra.gmra.mxu1 %vm2262_vm2, %v5025_v24  ;;  %8061 = vmatmul.mubr.msk.bf16.vlgmr.msra.gmra.mxu0 %vm2262_vm2, %v5026_v29 }
 0xc06   :  { %v4425_v52 = vpop.f32.mrf.mxu1  ;;  %v4477_v7 = vpop.f32.mrf.mxu0  ;;  %8065 = vmatpush3.bf16.xpose.msra.mxu1 %v5137_v1  ;;  %8071 = vmatpush3.bf16.xpose.msra.mxu0 %v5183_v49 }
 0xc07   :  { %8066 = vmatprep.mubr.msk.bf16.mxu1 %vm8456_vm1, %v8455_v27  ;;  %8072 = vmatprep.mubr.msk.bf16.mxu0 %vm8456_vm1, %v8455_v27 }
 0xc08   :  { %v7947_v11 = vpop.f32.mrf.mxu1  ;;  %v7955_v39 = vpop.f32.mrf.mxu0  ;;  %8076 = vmatprep.subr.bf16.mxu1 %v8455_v27  ;;  %8082 = vmatprep.subr.bf16.mxu0 %v8455_v27 }
 0xc0a   :  { %v4514_v8 = vpop.f32.mrf.mxu1  ;;  %v4554_v58 = vpop.f32.mrf.mxu0 }
 0xc0b   :  { %v5037_v47 = vpack.c.bf16 %v4514_v8, %v4514_v8  ;;  %v5038_v18 = vpack.c.bf16 %v4554_v58, %v4554_v58 }
 0xc0c   :  { %v7962_v0 = vpop.f32.mrf.mxu1  ;;  %v7970_v12 = vpop.f32.mrf.mxu0 }
 0xc0d   :  { %v5229_v6 = vsel %vm2262_vm2, %v5037_v47, 0  ;;  %v5275_v20 = vsel %vm2262_vm2, %v5038_v18, 0  ;;  %8067 = vmatmul.mubr.msk.bf16.vlgmr.msra.gmra.mxu1 %vm2262_vm2, %v5027_v14  ;;  %8073 = vmatmul.mubr.msk.bf16.vlgmr.msra.gmra.mxu0 %vm2262_vm2, %v5028_v17 }
 0xc0e   :  { %v4517_v3 = vpop.f32.mrf.mxu1  ;;  %v4557_v33 = vpop.f32.mrf.mxu0  ;;  %8077 = vmatpush3.bf16.xpose.msra.mxu1 %v5229_v6  ;;  %8083 = vmatpush3.bf16.xpose.msra.mxu0 %v5275_v20 }
 0xc0f   :  { %8078 = vmatprep.mubr.msk.bf16.mxu1 %vm8456_vm1, %v8455_v27  ;;  %8084 = vmatprep.mubr.msk.bf16.mxu0 %vm8456_vm1, %v8455_v27 }
 0xc10   :  { %v7963_v22 = vpop.f32.mrf.mxu1  ;;  %v7971_v43 = vpop.f32.mrf.mxu0  ;;  %8088 = vmatprep.subr.bf16.mxu1 %v8455_v27  ;;  %8094 = vmatprep.subr.bf16.mxu0 %v8455_v27 }
 0xc12   :  { %v4594_v25 = vpop.f32.mrf.mxu1  ;;  %v4634_v9 = vpop.f32.mrf.mxu0 }
 0xc13   :  { %v5039_v2 = vpack.c.bf16 %v4594_v25, %v4594_v25  ;;  %v5040_v32 = vpack.c.bf16 %v4634_v9, %v4634_v9 }
 0xc14   :  { %v7978_v10 = vpop.f32.mrf.mxu1  ;;  %v7986_v23 = vpop.f32.mrf.mxu0 }
 0xc15   :  { %v5321_v35 = vsel %vm2262_vm2, %v5039_v2, 0  ;;  %v5367_v46 = vsel %vm2262_vm2, %v5040_v32, 0  ;;  %8079 = vmatmul.mubr.msk.bf16.vlgmr.msra.gmra.mxu1 %vm2262_vm2, %v5029_v26  ;;  %8085 = vmatmul.mubr.msk.bf16.vlgmr.msra.gmra.mxu0 %vm2262_vm2, %v5030_v55 }
 0xc16   :  { %v4597_v36 = vpop.f32.mrf.mxu1  ;;  %v4637_v50 = vpop.f32.mrf.mxu0  ;;  %8089 = vmatpush3.bf16.xpose.msra.mxu1 %v5321_v35  ;;  %8095 = vmatpush3.bf16.xpose.msra.mxu0 %v5367_v46 }
 0xc17   :  { %8090 = vmatprep.mubr.msk.bf16.mxu1 %vm8456_vm1, %v8455_v27  ;;  %8096 = vmatprep.mubr.msk.bf16.mxu0 %vm8456_vm1, %v8455_v27 }
 0xc18   :  { %v7979_v30 = vpop.f32.mrf.mxu1  ;;  %v7987_v16 = vpop.f32.mrf.mxu0  ;;  %8100 = vmatprep.subr.bf16.mxu1 %v8455_v27  ;;  %8106 = vmatprep.subr.bf16.mxu0 %v8455_v27 }
 0xc1a   :  { %v4703_v51 = vpop.f32.mrf.mxu1  ;;  %v4755_v28 = vpop.f32.mrf.mxu0 }
 0xc1b   :  { %v5513_v44 = vpack.c.bf16 %v4703_v51, %v4703_v51  ;;  %v5514_v45 = vpack.c.bf16 %v4755_v28, %v4755_v28 }
 0xc1c   :  { %v7994_v48 = vpop.f32.mrf.mxu1  ;;  %v8002_v53 = vpop.f32.mrf.mxu0 }
 0xc1d   :  { %v5525_v56 = vsel %vm517_vm3, %v5513_v44, 0  ;;  %v5571_v57 = vsel %vm517_vm3, %v5514_v45, 0  ;;  %8091 = vmatmul.mubr.msk.bf16.vlgmr.msra.gmra.mxu1 %vm2262_vm2, %v5031_v54  ;;  %8097 = vmatmul.mubr.msk.bf16.vlgmr.msra.gmra.mxu0 %vm2262_vm2, %v5032_v34 }
 0xc1e   :  { %v4706_v31 = vpop.f32.mrf.mxu1  ;;  %v4758_v59 = vpop.f32.mrf.mxu0  ;;  %8101 = vmatpush3.bf16.msra.mxu1 %v5525_v56  ;;  %8107 = vmatpush3.bf16.msra.mxu0 %v5571_v57 }
 0xc1f   :  { %8102 = vmatprep.mubr.msk.bf16.mxu1 %vm8456_vm1, %v8455_v27  ;;  %8108 = vmatprep.mubr.msk.bf16.mxu0 %vm8456_vm1, %v8455_v27 }
 0xc20   :  { %v7995_v38 = vpop.f32.mrf.mxu1  ;;  %v8003_v41 = vpop.f32.mrf.mxu0  ;;  %8112 = vmatprep.subr.bf16.mxu1 %v8455_v27  ;;  %8118 = vmatprep.subr.bf16.mxu0 %v8455_v27 }
 0xc22   :  { %v10468_v60 = vpop.f32.mrf.mxu1  ;;  %v10470_v61 = vpop.f32.mrf.mxu0 }
 0xc24   :  { %v8010_v62 = vpop.f32.mrf.mxu1  ;;  %v8018_v37 = vpop.f32.mrf.mxu0 }
 0xc26   :  { %v4810_v21 = vpop.f32.mrf.mxu1  ;;  %v4862_v63 = vpop.f32.mrf.mxu0 }
 0xc28   :  { %v8011_v40 = vpop.f32.mrf.mxu1  ;;  %v8019_v24 = vpop.f32.mrf.mxu0 }
 0xc2a   :  { %v10472_v29 = vpop.f32.mrf.mxu1  ;;  %v10474_v4 = vpop.f32.mrf.mxu0 }
 0xc2c   :  { %v8026_v5 = vpop.f32.mrf.mxu1  ;;  %v8034_v42 = vpop.f32.mrf.mxu0 }
 0xc2e   :  { %v4902_v13 = vpop.f32.mrf.mxu1  ;;  %v4942_v1 = vpop.f32.mrf.mxu0 }
 0xc30   :  { %v8027_v49 = vpop.f32.mrf.mxu1  ;;  %v8035_v52 = vpop.f32.mrf.mxu0 }
 0xc32   :  { %v10476_v7 = vpop.f32.mrf.mxu1  ;;  %v10478_v11 = vpop.f32.mrf.mxu0 }
 0xc34   :  { %v8042_v39 = vpop.f32.mrf.mxu1  ;;  %v8050_v8 = vpop.f32.mrf.mxu0 }
 0xc36   :  { %v4982_v58 = vpop.f32.mrf.mxu1  ;;  %v5022_v14 = vpop.f32.mrf.mxu0 }
 0xc38   :  { %v8043_v17 = vpop.f32.mrf.mxu1  ;;  %v8051_v47 = vpop.f32.mrf.mxu0 }
 0xcc5   :  { %v5081_v18 = vpop.f32.mrf.mxu1  ;;  %v5127_v0 = vpop.f32.mrf.mxu0 }
 0xcc6   :  { %v5409_v12 = vmul.f32 0.35355338, %v5081_v18  ;;  %v5410_v6 = vmul.f32 0.35355338, %v5127_v0 }
 0xcc7   :  { %v8056_v20 = vpop.f32.mrf.mxu1  ;;  %v8062_v3 = vpop.f32.mrf.mxu0 }
 0xcc8   :  { %v5420_v33 = vsel %vm2262_vm2, %v5410_v6, -inf  ;;  %v5417_v22 = vsel %vm2262_vm2, %v5409_v12, -inf }
 0xcc9   :  { %5421 = vmax.xlane.f32.xlu1 %v5420_v33  ;;  %v5130_v43 = vpop.f32.mrf.mxu0  ;;  %5418 = vmax.xlane.f32.xlu0 %v5417_v22  ;;  %v5084_v25 = vpop.f32.mrf.mxu1 }
 0xccb   :  { %v8057_v9 = vpop.f32.mrf.mxu1  ;;  %v8063_v26 = vpop.f32.mrf.mxu0 }
 0xccd   :  { %v5173_v55 = vpop.f32.mrf.mxu1  ;;  %v5219_v2 = vpop.f32.mrf.mxu0 }
 0xcce   :  { %v5411_v32 = vmul.f32 0.35355338, %v5173_v55  ;;  %v5412_v10 = vmul.f32 0.35355338, %v5219_v2 }
 0xccf   :  { %v8068_v23 = vpop.f32.mrf.mxu1  ;;  %v8074_v35 = vpop.f32.mrf.mxu0 }
 0xcd0   :  { %v5426_v46 = vsel %vm2262_vm2, %v5412_v10, -inf  ;;  %v5423_v36 = vsel %vm2262_vm2, %v5411_v32, -inf }
 0xcd1   :  { %5427 = vmax.xlane.f32.xlu1 %v5426_v46  ;;  %v5222_v50 = vpop.f32.mrf.mxu0  ;;  %5424 = vmax.xlane.f32.xlu0 %v5423_v36  ;;  %v5176_v30 = vpop.f32.mrf.mxu1 }
 0xcd3   :  { %v8069_v16 = vpop.f32.mrf.mxu1  ;;  %v8075_v51 = vpop.f32.mrf.mxu0 }
 0xcd5   :  { %v5265_v28 = vpop.f32.mrf.mxu1  ;;  %v5311_v54 = vpop.f32.mrf.mxu0 }
 0xcd6   :  { %v5413_v34 = vmul.f32 0.35355338, %v5265_v28  ;;  %v5414_v44 = vmul.f32 0.35355338, %v5311_v54 }
 0xcd7   :  { %v8080_v45 = vpop.f32.mrf.mxu1  ;;  %v8086_v48 = vpop.f32.mrf.mxu0 }
 0xcd8   :  { %v5432_v53 = vsel %vm2262_vm2, %v5414_v44, -inf  ;;  %v5429_v56 = vsel %vm2262_vm2, %v5413_v34, -inf }
 0xcd9   :  { %5433 = vmax.xlane.f32.xlu1 %v5432_v53  ;;  %v5314_v57 = vpop.f32.mrf.mxu0  ;;  %5430 = vmax.xlane.f32.xlu0 %v5429_v56  ;;  %v5268_v31 = vpop.f32.mrf.mxu1 }
 0xcdb   :  { %v8081_v59 = vpop.f32.mrf.mxu1  ;;  %v8087_v38 = vpop.f32.mrf.mxu0 }
 0xcdd   :  { %v5357_v41 = vpop.f32.mrf.mxu1  ;;  %v5403_v62 = vpop.f32.mrf.mxu0 }
 0xcde   :  { %v5415_v37 = vmul.f32 0.35355338, %v5357_v41  ;;  %v5416_v21 = vmul.f32 0.35355338, %v5403_v62 }
 0xcdf   :  { %v8092_v63 = vpop.f32.mrf.mxu1  ;;  %v8098_v40 = vpop.f32.mrf.mxu0 }
 0xce0   :  { %v5438_v24 = vsel %vm2262_vm2, %v5416_v21, -inf  ;;  %v5435_v5 = vsel %vm2262_vm2, %v5415_v37, -inf  ;;  %v5515_v40 = vpack.c.bf16 %v10468_v60, %v10468_v60 }
 0xce1   :  { %5439 = vmax.xlane.f32.xlu1 %v5438_v24  ;;  %v5406_v42 = vpop.f32.mrf.mxu0  ;;  %5436 = vmax.xlane.f32.xlu0 %v5435_v5  ;;  %v5360_v13 = vpop.f32.mrf.mxu1 }
 0xce3   :  { %v8093_v1 = vpop.f32.mrf.mxu1  ;;  %v8099_v49 = vpop.f32.mrf.mxu0 }
 0xd52   :  { %v5422_v52 = vpop.xlane.xlu1 %5421  ;;  %v5419_v39 = vpop.xlane.xlu0 %5418 }
 0xd53   :  { %v5442_v8 = vsub.f32 %v5410_v6, %v5422_v52  ;;  %v5441_v58 = vsub.f32 %v5409_v12, %v5419_v39  ;;  %v5617_v52 = vsel %vm517_vm3, %v5515_v40, 0  ;;  %v5518_v39 = vpack.c.bf16 %v10474_v4, %v10474_v4 }
 0xd55   :  { %v5451_v14 = vmul.f32 1.442695, %v5442_v8  ;;  %v5449_v17 = vmul.f32 1.442695, %v5441_v58  ;;  %v5517_v58 = vpack.c.bf16 %v10472_v29, %v10472_v29 }
 0xd57   :  { %8374 = vpow2.f32 %v5451_v14 }
 0xd58   :  { %8376 = vpow2.f32 %v5449_v17 }
 0xd5a   :  { %v5428_v47 = vpop.xlane.xlu1 %5427  ;;  %v5425_v18 = vpop.xlane.xlu0 %5424 }
 0xd5b   :  { %v5444_v0 = vsub.f32 %v5412_v10, %v5428_v47  ;;  %v5443_v20 = vsub.f32 %v5411_v32, %v5425_v18 }
 0xd5d   :  { %v5455_v3 = vmul.f32 1.442695, %v5444_v0  ;;  %v5453_v33 = vmul.f32 1.442695, %v5443_v20  ;;  %v5755_v20 = vsel %vm517_vm3, %v5518_v39, 0 }
 0xd5f   :  { %8378 = vpow2.f32 %v5455_v3  ;;  %v5709_v3 = vsel %vm517_vm3, %v5517_v58, 0 }
 0xd60   :  { %8380 = vpow2.f32 %v5453_v33  ;;  %v5520_v33 = vpack.c.bf16 %v10478_v11, %v10478_v11 }
 0xd62   :  { %v5434_v22 = vpop.xlane.xlu1 %5433  ;;  %v5431_v43 = vpop.xlane.xlu0 %5430 }
 0xd63   :  { %v5446_v25 = vsub.f32 %v5414_v44, %v5434_v22  ;;  %v5445_v9 = vsub.f32 %v5413_v34, %v5431_v43  ;;  %v5519_v43 = vpack.c.bf16 %v10476_v7, %v10476_v7  ;;  %v7016_v7 = vld [vmem:[%s10724_s8 + $0x14] sm:$0xf] }
 0xd64   :  { %v8375_v26 = vpop.eup %8374 }
 0xd65   :  { %v8377_v55 = vpop.eup %8376  ;;  %v5459_v6 = vmul.f32 1.442695, %v5446_v25  ;;  %v5457_v12 = vmul.f32 1.442695, %v5445_v9  ;;  %v5468_v2 = vsel %vm2262_vm2, %v8375_v26, 0.0 }
 0xd66   :  { %5469 = vadd.xlane.f32.xlu1 %v5468_v2  ;;  %v5465_v23 = vsel %vm2262_vm2, %v8377_v55, 0.0 }
 0xd67   :  { %8382 = vpow2.f32 %v5459_v6  ;;  %5466 = vadd.xlane.f32.xlu0 %v5465_v23  ;;  %v5801_v6 = vsel %vm517_vm3, %v5519_v43, 0  ;;  %v7015_v23 = vld [vmem:[%s10724_s8 + $0x10] sm:$0xf] }
 0xd68   :  { %8384 = vpow2.f32 %v5457_v12 }
 0xd6a   :  { %v5440_v32 = vpop.xlane.xlu1 %5439  ;;  %v5437_v10 = vpop.xlane.xlu0 %5436 }
 0xd6b   :  { %v5448_v35 = vsub.f32 %v5416_v21, %v5440_v32  ;;  %v5447_v46 = vsub.f32 %v5415_v37, %v5437_v10  ;;  %v5516_v21 = vpack.c.bf16 %v10470_v61, %v10470_v61 }
 0xd6c   :  { %v8379_v36 = vpop.eup %8378 }
 0xd6d   :  { %v8381_v50 = vpop.eup %8380  ;;  %v5463_v30 = vmul.f32 1.442695, %v5448_v35  ;;  %v5461_v16 = vmul.f32 1.442695, %v5447_v46  ;;  %v5474_v51 = vsel %vm2262_vm2, %v8379_v36, 0.0  ;;  %v5663_v49 = vsel %vm517_vm3, %v5516_v21, 0 }
 0xd6e   :  { %5475 = vadd.xlane.f32.xlu1 %v5474_v51  ;;  %v5471_v28 = vsel %vm2262_vm2, %v8381_v50, 0.0  ;;  %v5952_v35 = vsel %vm517_vm3, %v7016_v7, 0 }
 0xd6f   :  { %8386 = vpow2.f32 %v5463_v30  ;;  %5472 = vadd.xlane.f32.xlu0 %v5471_v28  ;;  %v7017_v30 = vld [vmem:[%s10724_s8 + $0x18] sm:$0xf] }
 0xd70   :  { %8388 = vpow2.f32 %v5461_v16 }
 0xd74   :  { %v10492_v54 = vpop.eup %8382 }
 0xd75   :  { %v10494_v34 = vpop.eup %8384  ;;  %v5480_v44 = vsel %vm2262_vm2, %v10492_v54, 0.0 }
 0xd76   :  { %5481 = vadd.xlane.f32.xlu1 %v5480_v44  ;;  %v5477_v45 = vsel %vm2262_vm2, %v10494_v34, 0.0 }
 0xd77   :  { %5478 = vadd.xlane.f32.xlu0 %v5477_v45  ;;  %v5998_v45 = vsel %vm517_vm3, %v7017_v30, 0  ;;  %v7027_v30 = vld [vmem:[%s10725_s9 + $0x1] ss:$0 sm:$0xff] }
 0xd7c   :  { %v10500_v48 = vpop.eup %8386 }
 0xd7d   :  { %v10502_v53 = vpop.eup %8388  ;;  %v5486_v56 = vsel %vm2262_vm2, %v10500_v48, 0.0 }
 0xd7e   :  { %5487 = vadd.xlane.f32.xlu1 %v5486_v56  ;;  %v5483_v57 = vsel %vm2262_vm2, %v10502_v53, 0.0 }
 0xd7f   :  { %5484 = vadd.xlane.f32.xlu0 %v5483_v57 }
 0xdef   :  { %v5470_v31 = vpop.xlane.xlu1 %5469 }
 0xdf0   :  { %8390 = vrcp.f32 %v5470_v31  ;;  %v5467_v59 = vpop.xlane.xlu0 %5466 }
 0xdf1   :  { %8392 = vrcp.f32 %v5467_v59 }
 0xdf7   :  { %v5476_v38 = vpop.xlane.xlu1 %5475 }
 0xdf8   :  { %8394 = vrcp.f32 %v5476_v38  ;;  %v5473_v41 = vpop.xlane.xlu0 %5472 }
 0xdf9   :  { %8396 = vrcp.f32 %v5473_v41 }
 0xdfd   :  { %v8391_v62 = vpop.eup %8390 }
 0xdfe   :  { %v8393_v37 = vpop.eup %8392  ;;  %v5498_v63 = vmul.f32 %v8391_v62, %v8375_v26 }
 0xdff   :  { %v5497_v24 = vmul.f32 %v8393_v37, %v8377_v55  ;;  %v5482_v5 = vpop.xlane.xlu1 %5481  ;;  %v5847_v55 = vsel %vm517_vm3, %v5520_v33, 0 }
 0xe00   :  { %v5506_v42 = vpack.c.bf16 %v5498_v63, %v5498_v63  ;;  %8398 = vrcp.f32 %v5482_v5  ;;  %v5479_v13 = vpop.xlane.xlu0 %5478 }
 0xe01   :  { %v5505_v1 = vpack.c.bf16 %v5497_v24, %v5497_v24  ;;  %8400 = vrcp.f32 %v5479_v13 }
 0xe02   :  { %8109 = vmatmul.mubr.msk.bf16.vlgmr.msra.gmra.mxu0 %vm2262_vm2, %v5506_v42 }
 0xe03   :  { %8103 = vmatmul.mubr.msk.bf16.vlgmr.msra.gmra.mxu1 %vm2262_vm2, %v5505_v1  ;;  %8119 = vmatpush3.bf16.msra.mxu0 %v5663_v49 }
 0xe04   :  { %8113 = vmatpush3.bf16.msra.mxu1 %v5617_v52  ;;  %8114 = vmatprep.mubr.msk.bf16.mxu1 %vm8456_vm1, %v8455_v27 }
 0xe05   :  { %v8395_v60 = vpop.eup %8394  ;;  %8120 = vmatprep.mubr.msk.bf16.mxu0 %vm8456_vm1, %v8455_v27  ;;  %8124 = vmatprep.subr.bf16.mxu1 %v8455_v27 }
 0xe06   :  { %v8397_v61 = vpop.eup %8396  ;;  %v5500_v8 = vmul.f32 %v8395_v60, %v8379_v36  ;;  %8130 = vmatprep.subr.bf16.mxu0 %v8455_v27  ;;  %v5906_v36 = vsel %vm517_vm3, %v7015_v23, 0 }
 0xe07   :  { %v5499_v14 = vmul.f32 %v8397_v61, %v8381_v50  ;;  %v5488_v17 = vpop.xlane.xlu1 %5487  ;;  %v7018_v50 = vld [vmem:[%s10724_s8 + $0x1c] sm:$0xf] }
 0xe08   :  { %v5508_v47 = vpack.c.bf16 %v5500_v8, %v5500_v8  ;;  %8402 = vrcp.f32 %v5488_v17  ;;  %v5485_v18 = vpop.xlane.xlu0 %5484 }
 0xe09   :  { %v5507_v0 = vpack.c.bf16 %v5499_v14, %v5499_v14  ;;  %8404 = vrcp.f32 %v5485_v18 }
 0xe0a   :  { %8121 = vmatmul.mubr.msk.bf16.vlgmr.msra.gmra.mxu0 %vm2262_vm2, %v5508_v47 }
 0xe0b   :  { %8115 = vmatmul.mubr.msk.bf16.vlgmr.msra.gmra.mxu1 %vm2262_vm2, %v5507_v0  ;;  %8131 = vmatpush3.bf16.msra.mxu0 %v5755_v20 }
 0xe0c   :  { %8125 = vmatpush3.bf16.msra.mxu1 %v5709_v3  ;;  %8126 = vmatprep.mubr.msk.bf16.mxu1 %vm8456_vm1, %v8455_v27 }
 0xe0d   :  { %v8399_v29 = vpop.eup %8398  ;;  %8132 = vmatprep.mubr.msk.bf16.mxu0 %vm8456_vm1, %v8455_v27  ;;  %8136 = vmatprep.subr.bf16.mxu1 %v8455_v27 }
 0xe0e   :  { %v8401_v4 = vpop.eup %8400  ;;  %v5502_v22 = vmul.f32 %v8399_v29, %v10492_v54  ;;  %8142 = vmatprep.subr.bf16.mxu0 %v8455_v27  ;;  %v6044_v54 = vsel %vm517_vm3, %v7018_v50, 0 }
 0xe0f   :  { %v5501_v25 = vmul.f32 %v8401_v4, %v10494_v34 }
 0xe10   :  { %v5510_v9 = vpack.c.bf16 %v5502_v22, %v5502_v22 }
 0xe11   :  { %v5509_v26 = vpack.c.bf16 %v5501_v25, %v5501_v25 }
 0xe12   :  { %8133 = vmatmul.mubr.msk.bf16.vlgmr.msra.gmra.mxu0 %vm2262_vm2, %v5510_v9 }
 0xe13   :  { %8127 = vmatmul.mubr.msk.bf16.vlgmr.msra.gmra.mxu1 %vm2262_vm2, %v5509_v26  ;;  %8143 = vmatpush3.bf16.msra.mxu0 %v5847_v55 }
 0xe14   :  { %8137 = vmatpush3.bf16.msra.mxu1 %v5801_v6  ;;  %8138 = vmatprep.mubr.msk.bf16.mxu1 %vm8456_vm1, %v8455_v27 }
 0xe15   :  { %v8403_v11 = vpop.eup %8402  ;;  %8144 = vmatprep.mubr.msk.bf16.mxu0 %vm8456_vm1, %v8455_v27  ;;  %8148 = vmatprep.subr.bf16.mxu1 %v8455_v27 }
 0xe16   :  { %v8405_v12 = vpop.eup %8404  ;;  %v5504_v2 = vmul.f32 %v8403_v11, %v10500_v48  ;;  %8154 = vmatprep.subr.bf16.mxu0 %v8455_v27 }
 0xe17   :  { %v5503_v32 = vmul.f32 %v8405_v12, %v10502_v53 }
 0xe18   :  { %v5512_v10 = vpack.c.bf16 %v5504_v2, %v5504_v2 }
 0xe19   :  { %v5511_v46 = vpack.c.bf16 %v5503_v32, %v5503_v32 }
 0xe1a   :  { %8145 = vmatmul.mubr.msk.bf16.vlgmr.msra.gmra.mxu0 %vm2262_vm2, %v5512_v10 }
 0xe1b   :  { %8139 = vmatmul.mubr.msk.bf16.vlgmr.msra.gmra.mxu1 %vm2262_vm2, %v5511_v46  ;;  %8155 = vmatpush3.bf16.msra.mxu0 %v5952_v35 }
 0xe1c   :  { %8149 = vmatpush3.bf16.msra.mxu1 %v5906_v36  ;;  %8150 = vmatprep.mubr.msk.bf16.mxu1 %vm8456_vm1, %v8455_v27 }
 0xe1d   :  { %8156 = vmatprep.mubr.msk.bf16.mxu0 %vm8456_vm1, %v8455_v27  ;;  %8160 = vmatprep.subr.bf16.mxu1 %v8455_v27 }
 0xe1e   :  { %8166 = vmatprep.subr.bf16.mxu0 %v8455_v27 }
 0xec2   :  { %v5607_v16 = vpop.f32.mrf.mxu0 }
 0xec3   :  { %v5561_v51 = vpop.f32.mrf.mxu1  ;;  %v5890_v28 = vpack.c.bf16 %v5607_v16, %v5607_v16 }
 0xec4   :  { %v5889_v34 = vpack.c.bf16 %v5561_v51, %v5561_v51  ;;  %v8110_v44 = vpop.f32.mrf.mxu0 }
 0xec5   :  { %v8104_v48 = vpop.f32.mrf.mxu1  ;;  %8157 = vmatmul.mubr.msk.bf16.vlgmr.msra.gmra.mxu0 %vm2262_vm2, %v5890_v28 }
 0xec6   :  { %8151 = vmatmul.mubr.msk.bf16.vlgmr.msra.gmra.mxu1 %vm2262_vm2, %v5889_v34  ;;  %v5610_v53 = vpop.f32.mrf.mxu0  ;;  %8167 = vmatpush3.bf16.msra.mxu0 %v6044_v54 }
 0xec7   :  { %v5564_v56 = vpop.f32.mrf.mxu1  ;;  %8161 = vmatpush3.bf16.msra.mxu1 %v5998_v45  ;;  %8162 = vmatprep.mubr.msk.bf16.mxu1 %vm8456_vm1, %v8455_v27 }
 0xec8   :  { %v8111_v57 = vpop.f32.mrf.mxu0  ;;  %8168 = vmatprep.mubr.msk.bf16.mxu0 %vm8456_vm1, %v8455_v27  ;;  %8172 = vmatprep.subr.bf16.mxu1 %v8455_v27 }
 0xec9   :  { %v8105_v31 = vpop.f32.mrf.mxu1  ;;  %8178 = vmatprep.subr.bf16.mxu0 %v8455_v27 }
 0xeca   :  { %v5699_v59 = vpop.f32.mrf.mxu0 }
 0xecb   :  { %v5653_v38 = vpop.f32.mrf.mxu1  ;;  %v5892_v41 = vpack.c.bf16 %v5699_v59, %v5699_v59 }
 0xecc   :  { %v5891_v62 = vpack.c.bf16 %v5653_v38, %v5653_v38  ;;  %v8122_v37 = vpop.f32.mrf.mxu0 }
 0xecd   :  { %v8116_v21 = vpop.f32.mrf.mxu1  ;;  %8169 = vmatmul.mubr.msk.bf16.vlgmr.msra.gmra.mxu0 %vm2262_vm2, %v5892_v41 }
 0xece   :  { %8163 = vmatmul.mubr.msk.bf16.vlgmr.msra.gmra.mxu1 %vm2262_vm2, %v5891_v62  ;;  %v5702_v63 = vpop.f32.mrf.mxu0  ;;  %8179 = vmatpush3.bf16.msra.mxu0 %v5952_v35 }
 0xecf   :  { %v5656_v40 = vpop.f32.mrf.mxu1  ;;  %8173 = vmatpush3.bf16.msra.mxu1 %v5906_v36  ;;  %8174 = vmatprep.mubr.msk.bf16.mxu1 %vm8456_vm1, %v8455_v27 }
 0xed0   :  { %v8123_v24 = vpop.f32.mrf.mxu0  ;;  %8180 = vmatprep.mubr.msk.bf16.mxu0 %vm8456_vm1, %v8455_v27  ;;  %8184 = vmatprep.subr.bf16.mxu1 %v8455_v27 }
 0xed1   :  { %v8117_v5 = vpop.f32.mrf.mxu1  ;;  %8190 = vmatprep.subr.bf16.mxu0 %v8455_v27 }
 0xed2   :  { %v5791_v42 = vpop.f32.mrf.mxu0 }
 0xed3   :  { %v5745_v13 = vpop.f32.mrf.mxu1  ;;  %v5894_v1 = vpack.c.bf16 %v5791_v42, %v5791_v42 }
 0xed4   :  { %v5893_v49 = vpack.c.bf16 %v5745_v13, %v5745_v13  ;;  %v8134_v52 = vpop.f32.mrf.mxu0 }
 0xed5   :  { %v8128_v60 = vpop.f32.mrf.mxu1  ;;  %8181 = vmatmul.mubr.msk.bf16.vlgmr.msra.gmra.mxu0 %vm2262_vm2, %v5894_v1 }
 0xed6   :  { %8175 = vmatmul.mubr.msk.bf16.vlgmr.msra.gmra.mxu1 %vm2262_vm2, %v5893_v49  ;;  %v5794_v61 = vpop.f32.mrf.mxu0  ;;  %8191 = vmatpush3.bf16.msra.mxu0 %v6044_v54 }
 0xed7   :  { %v5748_v39 = vpop.f32.mrf.mxu1  ;;  %8185 = vmatpush3.bf16.msra.mxu1 %v5998_v45  ;;  %8186 = vmatprep.mubr.msk.bf16.mxu1 %vm8456_vm1, %v8455_v27 }
 0xed8   :  { %v8135_v8 = vpop.f32.mrf.mxu0  ;;  %8192 = vmatprep.mubr.msk.bf16.mxu0 %vm8456_vm1, %v8455_v27  ;;  %8196 = vmatprep.subr.bf16.mxu1 %v8455_v27 }
 0xed9   :  { %v8129_v58 = vpop.f32.mrf.mxu1  ;;  %8204 = vmatprep.subr.bf16.mxu0 %v8455_v27 }
 0xeda   :  { %v5883_v14 = vpop.f32.mrf.mxu0 }
 0xedb   :  { %v5837_v17 = vpop.f32.mrf.mxu1  ;;  %v5896_v47 = vpack.c.bf16 %v5883_v14, %v5883_v14 }
 0xedc   :  { %v5895_v18 = vpack.c.bf16 %v5837_v17, %v5837_v17  ;;  %v8146_v0 = vpop.f32.mrf.mxu0 }
 0xedd   :  { %v8140_v20 = vpop.f32.mrf.mxu1  ;;  %8193 = vmatmul.mubr.msk.bf16.vlgmr.msra.gmra.mxu0 %vm2262_vm2, %v5896_v47 }
 0xede   :  { %8187 = vmatmul.mubr.msk.bf16.vlgmr.msra.gmra.mxu1 %vm2262_vm2, %v5895_v18  ;;  %v5886_v3 = vpop.f32.mrf.mxu0  ;;  %8208 = vmatprep.mubr.msk.bf16.mxu0 %vm8456_vm1, %v8455_v27 }
 0xedf   :  { %v5840_v29 = vpop.f32.mrf.mxu1  ;;  %8200 = vmatprep.mubr.msk.bf16.mxu1 %vm8456_vm1, %v8455_v27 }
 0xee0   :  { %v8147_v4 = vpop.f32.mrf.mxu0 }
 0xee1   :  { %v8141_v33 = vpop.f32.mrf.mxu1 }
 0xf85   :  { %v5988_v22 = vpop.f32.mrf.mxu0 }
 0xf86   :  { %v5942_v43 = vpop.f32.mrf.mxu1  ;;  %v6259_v11 = vsel %vm1046_vm0, %v5988_v22, 0.0  ;;  %v8316_v22 = vld [vmem:[%s10728_s12 + $0x18] sm:$0xff]  }
 0xf87   :  { %v8158_v25 = vpop.f32.mrf.mxu0  ;;  %v6258_v6 = vsel %vm1046_vm0, %v5942_v43, 0.0  ;;  %8197 = vmatpush3.bf16.msra.mxu1 %v8316_v22  ;;  %8205 = vmatpush3.bf16.msra.mxu0 %v8316_v22  ;;  %v8317_v43 = vld [vmem:[%s10728_s12 + $0x10] sm:$0xff]  }
 0xf88   :  { %v8152_v9 = vpop.f32.mrf.mxu1  ;;  %v6260_v23 = vadd.f32 %v6259_v11, %v6258_v6  ;;  %8198 = vmatprep.subr.bf16.mxu1 %v8455_v27  ;;  %8206 = vmatprep.subr.bf16.mxu0 %v8455_v27 }
 0xf89   :  { %v5991_v26 = vpop.f32.mrf.mxu0 }
 0xf8a   :  { %v5945_v55 = vpop.f32.mrf.mxu1 }
 0xf8b   :  { %v8159_v7 = vpop.f32.mrf.mxu0  ;;  %8199 = vmatpush3.bf16.msra.mxu1 %v8317_v43  ;;  %8207 = vmatpush3.bf16.msra.mxu0 %v8317_v43 }
 0xf8c   :  { %v8153_v12 = vpop.f32.mrf.mxu1  ;;  %8212 = vmatprep.subr.bf16.mxu1 %v8455_v27  ;;  %8232 = vmatprep.subr.bf16.mxu0 %v8455_v27  ;;  %v7028_v7 = vld [vmem:[%s10726_s10 + $0x1] ss:$0 sm:$0xff] }
 0xf8d   :  { %v6080_v2 = vpop.f32.mrf.mxu0 }
 0xf8e   :  { %v6034_v32 = vpop.f32.mrf.mxu1  ;;  %v6263_v50 = vsel %vm1046_vm0, %v6080_v2, 0.0 }
 0xf8f   :  { %v6261_v10 = vsel %vm1046_vm0, %v6034_v32, 0.0  ;;  %v8170_v35 = vpop.f32.mrf.mxu0 }
 0xf90   :  { %v6262_v46 = vadd.f32 %v6261_v10, %v6260_v23  ;;  %v8164_v36 = vpop.f32.mrf.mxu1  ;;  %v7029_v23 = vld [vmem:[%s10744_s25 + $0x1] ss:$0 sm:$0xff] }
 0xf91   :  { %v6083_v16 = vpop.f32.mrf.mxu0 }
 0xf92   :  { %v6264_v51 = vadd.f32 %v6263_v50, %v6262_v46  ;;  %v6037_v28 = vpop.f32.mrf.mxu1 }
 0xf93   :  { %v8171_v54 = vpop.f32.mrf.mxu0  ;;  %v8319_v28 = vld [vmem:[%s10730_s14 + $0x70] sm:$0xff]  }
 0xf94   :  { %v6277_v34 = vadd.f32 %v7027_v30, %v6264_v51  ;;  %v8165_v44 = vpop.f32.mrf.mxu1  ;;  %v8318_v51 = vld [vmem:[%s10730_s14 + $0x78] sm:$0xff]   ;;  %v8320_v54 = vld [vmem:[%s10730_s14 + $0x68] sm:$0xff]  }
 0xf95   :  { %v6166_v45 = vpop.f32.mrf.mxu0  ;;  %v8322_v44 = vld [vmem:[%s10730_s14 + $0x58] sm:$0xff]  }
 0xf96   :  { %v6123_v48 = vpop.f32.mrf.mxu1  ;;  %v10616_v53 = vadd.f32 %v6277_v34, %v10161_v15  ;;  %v6266_v62 = vsel %vm1046_vm0, %v6166_v45, 0.0  ;;  %v8321_v34 = vld [vmem:[%s10730_s14 + $0x60] sm:$0xff]   ;;  %v8323_v45 = vld [vmem:[%s10730_s14 + $0x50] sm:$0xff]  }
 0xf97   :  { %v8182_v56 = vpop.f32.mrf.mxu0  ;;  %v6265_v41 = vsel %vm1046_vm0, %v6123_v48, 0.0  ;;  %v8324_v48 = vld [vmem:[%s10730_s14 + $0x48] sm:$0xff]  }
 0xf98   :  { %v8176_v57 = vpop.f32.mrf.mxu1  ;;  %v6283_v31 = vsel %vm1046_vm0, %v10616_v53, 0.0  ;;  %v6267_v40 = vadd.f32 %v6266_v62, %v6265_v41  ;;  %v8325_v56 = vld [vmem:[%s10730_s14 + $0x40] sm:$0xff]  }
 0xf99   :  { %6284 = vadd.xlane.f32.xlu0 %v6283_v31  ;;  %v6169_v59 = vpop.f32.mrf.mxu0  ;;  %v7034_v57 = vld [vmem:[%s10729_s13 + $0x1] ss:$0 sm:$0xff] }
 0xf9a   :  { %v6126_v38 = vpop.f32.mrf.mxu1 }
 0xf9b   :  { %v8183_v37 = vpop.f32.mrf.mxu0 }
 0xf9c   :  { %v8177_v21 = vpop.f32.mrf.mxu1 }
 0xf9d   :  { %v6252_v63 = vpop.f32.mrf.mxu0 }
 0xf9e   :  { %v6209_v24 = vpop.f32.mrf.mxu1  ;;  %v6270_v1 = vsel %vm1046_vm0, %v6252_v63, 0.0 }
 0xf9f   :  { %v6268_v15 = vsel %vm1046_vm0, %v6209_v24, 0.0  ;;  %v8194_v5 = vpop.f32.mrf.mxu0 }
 0xfa0   :  { %v6269_v42 = vadd.f32 %v6268_v15, %v6267_v40  ;;  %v8188_v13 = vpop.f32.mrf.mxu1 }
 0xfa1   :  { %v6255_v49 = vpop.f32.mrf.mxu0 }
 0xfa2   :  { %v6271_v52 = vadd.f32 %v6270_v1, %v6269_v42  ;;  %v6212_v60 = vpop.f32.mrf.mxu1 }
 0xfa3   :  { %v8195_v61 = vpop.f32.mrf.mxu0 }
 0xfa4   :  { %v6278_v39 = vadd.f32 %v7027_v30, %v6271_v52  ;;  %v8189_v8 = vpop.f32.mrf.mxu1 }
 0xfa6   :  { %v10625_v58 = vadd.f32 %v6278_v39, %v10166_v19 }
 0xfa8   :  { %v6286_v14 = vsel %vm1046_vm0, %v10625_v58, 0.0 }
 0xfa9   :  { %6287 = vadd.xlane.f32.xlu1 %v6286_v14 }
0x1022   :  { %v6285_v17 = vpop.xlane.xlu0 %6284 }
0x1023   :  { %v6289_v47 = vmul.f32 0.03125, %v6285_v17 }
0x1025   :  { %v6291_v18 = vsub.f32 %v10616_v53, %v6289_v47 }
0x1027   :  { %v6293_v0 = vmul.f32 %v6291_v18, %v6291_v18 }
0x1029   :  { %v6295_v20 = vsel %vm1046_vm0, %v6293_v0, 0.0 }
0x102a   :  { %6296 = vadd.xlane.f32.xlu0 %v6295_v20 }
0x1032   :  { %v6288_v3 = vpop.xlane.xlu1 %6287 }
0x1033   :  { %v6290_v29 = vmul.f32 0.03125, %v6288_v3 }
0x1035   :  { %v6292_v4 = vsub.f32 %v10625_v58, %v6290_v29 }
0x1037   :  { %v6294_v33 = vmul.f32 %v6292_v4, %v6292_v4 }
0x1039   :  { %v6298_v19 = vsel %vm1046_vm0, %v6294_v33, 0.0 }
0x103a   :  { %6299 = vadd.xlane.f32.xlu1 %v6298_v19 }
0x10b3   :  { %v6297_v25 = vpop.xlane.xlu0 %6296 }
0x10b4   :  { %v6301_v9 = vmul.f32 0.03125, %v6297_v25 }
0x10b6   :  { %v6303_v26 = vadd.f32 1e-05, %v6301_v9 }
0x10b8   :  { %8406 = vrsqrt.f32 %v6303_v26 }
0x10c3   :  { %v6300_v55 = vpop.xlane.xlu1 %6299 }
0x10c4   :  { %v6302_v6 = vmul.f32 0.03125, %v6300_v55 }
0x10c5   :  { %v8407_v11 = vpop.eup %8406 }
0x10c6   :  { %v6307_v12 = vmul.f32 %v8407_v11, %v6291_v18  ;;  %v6304_v2 = vadd.f32 1e-05, %v6302_v6 }
0x10c8   :  { %v6313_v32 = vmul.f32 %v7028_v7, %v6307_v12  ;;  %8408 = vrsqrt.f32 %v6304_v2 }
0x10ca   :  { %v6319_v10 = vadd.f32 %v7029_v23, %v6313_v32 }
0x10cc   :  { %v6321_v35 = vpack.c.bf16 %v6319_v10, %v6319_v10 }
0x10ce   :  { %8201 = vmatmul.mubr.msk.bf16.vlgmr.msra.gmra.mxu1 %vm1046_vm0, %v6321_v35 }
0x10cf   :  { %8228 = vmatprep.mubr.msk.bf16.mxu1 %vm8456_vm1, %v8455_v27  ;;  %8213 = vmatpush3.bf16.msra.mxu1 %v8318_v51 }
0x10d0   :  { %8214 = vmatprep.subr.bf16.mxu1 %v8455_v27 }
0x10d3   :  { %8215 = vmatpush3.bf16.msra.mxu1 %v8319_v28 }
0x10d4   :  { %8216 = vmatprep.subr.bf16.mxu1 %v8455_v27 }
0x10d5   :  { %v8409_v46 = vpop.eup %8408 }
0x10d6   :  { %v6308_v36 = vmul.f32 %v8409_v46, %v6292_v4  ;;  %v7055_v4 = vld [vmem:[%s10731_s15 + $0x1] ss:$0 sm:$0xff] }
0x10d7   :  { %8217 = vmatpush3.bf16.msra.mxu1 %v8320_v54 }
0x10d8   :  { %v6314_v50 = vmul.f32 %v7028_v7, %v6308_v36  ;;  %8218 = vmatprep.subr.bf16.mxu1 %v8455_v27 }
0x10da   :  { %v6320_v30 = vadd.f32 %v7029_v23, %v6314_v50 }
0x10db   :  { %8219 = vmatpush3.bf16.msra.mxu1 %v8321_v34 }
0x10dc   :  { %v6322_v16 = vpack.c.bf16 %v6320_v30, %v6320_v30  ;;  %8220 = vmatprep.subr.bf16.mxu1 %v8455_v27 }
0x10de   :  { %8209 = vmatmul.mubr.msk.bf16.vlgmr.msra.gmra.mxu0 %vm1046_vm0, %v6322_v16 }
0x10df   :  { %8248 = vmatprep.mubr.msk.bf16.mxu0 %vm8456_vm1, %v8455_v27  ;;  %8233 = vmatpush3.bf16.msra.mxu0 %v8318_v51 }
0x10e0   :  { %8234 = vmatprep.subr.bf16.mxu0 %v8455_v27  ;;  %8221 = vmatpush3.bf16.msra.mxu1 %v8322_v44 }
0x10e1   :  { %8222 = vmatprep.subr.bf16.mxu1 %v8455_v27 }
0x10e3   :  { %8235 = vmatpush3.bf16.msra.mxu0 %v8319_v28 }
0x10e4   :  { %8236 = vmatprep.subr.bf16.mxu0 %v8455_v27  ;;  %8223 = vmatpush3.bf16.msra.mxu1 %v8323_v45 }
0x10e5   :  { %8224 = vmatprep.subr.bf16.mxu1 %v8455_v27 }
0x10e7   :  { %8237 = vmatpush3.bf16.msra.mxu0 %v8320_v54 }
0x10e8   :  { %8238 = vmatprep.subr.bf16.mxu0 %v8455_v27  ;;  %8225 = vmatpush3.bf16.msra.mxu1 %v8324_v48 }
0x10e9   :  { %8226 = vmatprep.subr.bf16.mxu1 %v8455_v27 }
0x10eb   :  { %8239 = vmatpush3.bf16.msra.mxu0 %v8321_v34 }
0x10ec   :  { %8240 = vmatprep.subr.bf16.mxu0 %v8455_v27  ;;  %8227 = vmatpush3.bf16.msra.mxu1 %v8325_v56 }
0x10ef   :  { %8241 = vmatpush3.bf16.msra.mxu0 %v8322_v44 }
0x10f0   :  { %8242 = vmatprep.subr.bf16.mxu0 %v8455_v27 }
0x10f3   :  { %8243 = vmatpush3.bf16.msra.mxu0 %v8323_v45 }
0x10f4   :  { %8244 = vmatprep.subr.bf16.mxu0 %v8455_v27 }
0x10f7   :  { %8245 = vmatpush3.bf16.msra.mxu0 %v8324_v48  ;;  %v7064_v48 = vld [vmem:[%s10732_s16] ss:$0 sm:$0xff]  ;;  %s8430_s16 = scalar_lea.vmem %s6655_s24, 256 }
0x10f8   :  { %8246 = vmatprep.subr.bf16.mxu0 %v8455_v27  ;;  %p8431_p5 = scmp.ne.s32.totalorder %s6655_s24, %s8430_s16  ;;  %p8436_p7 = scmp.lt.s32.totalorder %s8430_s16, %s8430_s16 }
0x10fa   :  { %p8437_p8 = por %p8436_p7, %p8435_p6 }
0x10fb   :  { %8247 = vmatpush3.bf16.msra.mxu0 %v8325_v56 }
0x10fc   :  { %p8438_p9 = pnand %p8437_p8, %p8431_p5 }
0x118e   :  { %v6382_v31 = vpop.f32.mrf.mxu1 }
0x118f   :  { %v6383_v59 = vadd.f32 %v7034_v57, %v6382_v31  ;;  %v7065_v31 = vld [vmem:[%s10733_s17] ss:$0 sm:$0xff] }
0x1190   :  { %v8202_v38 = vpop.f32.mrf.mxu1 }
0x1191   :  { %v6431_v41 = vmul.f32 %v6383_v59, %v6383_v59 }
0x1192   :  { %v6385_v62 = vpop.f32.mrf.mxu1 }
0x1193   :  { %v6433_v37 = vmul.f32 %v6431_v41, %v6383_v59 }
0x1194   :  { %v8203_v21 = vpop.f32.mrf.mxu1 }
0x1195   :  { %v6435_v63 = vmul.f32 0.044715, %v6433_v37 }
0x1197   :  { %v6437_v40 = vadd.f32 %v6435_v63, %v6383_v59 }
0x1199   :  { %v6439_v27 = vmul.f32 0.7978846, %v6437_v40 }
0x119b   :  { %8410 = vtanh.f32 %v6439_v27 }
0x119e   :  { %v6425_v24 = vpop.f32.mrf.mxu0 }
0x119f   :  { %v6426_v15 = vadd.f32 %v7034_v57, %v6425_v24 }
0x11a0   :  { %v8210_v5 = vpop.f32.mrf.mxu0 }
0x11a1   :  { %v6432_v42 = vmul.f32 %v6426_v15, %v6426_v15 }
0x11a2   :  { %v6428_v13 = vpop.f32.mrf.mxu0 }
0x11a3   :  { %v6434_v1 = vmul.f32 %v6432_v42, %v6426_v15 }
0x11a4   :  { %v8211_v49 = vpop.f32.mrf.mxu0 }
0x11a5   :  { %v6436_v52 = vmul.f32 0.044715, %v6434_v1 }
0x11a7   :  { %v6438_v60 = vadd.f32 %v6436_v52, %v6426_v15 }
0x11a8   :  { %v8411_v61 = vpop.eup %8410 }
0x11a9   :  { %v6443_v39 = vadd.f32 1.0, %v8411_v61  ;;  %v6440_v8 = vmul.f32 0.7978846, %v6438_v60 }
0x11ab   :  { %v6445_v14 = vmul.f32 0.5, %v6443_v39  ;;  %8412 = vtanh.f32 %v6440_v8 }
0x11ad   :  { %v6447_v17 = vmul.f32 %v6445_v14, %v6383_v59 }
0x11af   :  { %v6449_v47 = vpack.c.bf16 %v6447_v17, %v6447_v17 }
0x11b1   :  { %8229 = vmatmul.mubr.bf16.vlgmr.msra.gmra.mxu1 %v6449_v47 }
0x11b8   :  { %v8413_v18 = vpop.eup %8412 }
0x11b9   :  { %v6444_v0 = vadd.f32 1.0, %v8413_v18 }
0x11bb   :  { %v6446_v20 = vmul.f32 0.5, %v6444_v0 }
0x11bd   :  { %v6448_v3 = vmul.f32 %v6446_v20, %v6426_v15 }
0x11bf   :  { %v6450_v29 = vpack.c.bf16 %v6448_v3, %v6448_v3 }
0x11c1   :  { %8249 = vmatmul.mubr.bf16.vlgmr.msra.gmra.mxu0 %v6450_v29 }
0x1271   :  { %v6555_v33 = vpop.f32.mrf.mxu1 }
0x1272   :  { %v6556_v19 = vadd.f32 %v7055_v4, %v6555_v33 }
0x1273   :  { %v8230_v22 = vpop.f32.mrf.mxu1 }
0x1274   :  { %v6601_v43 = vadd.f32 %v6556_v19, %v10616_v53 }
0x1275   :  { %v6558_v25 = vpop.f32.mrf.mxu1 }
0x1276   :  { %v6605_v9 = vsel %vm1046_vm0, %v6601_v43, 0.0 }
0x1277   :  { %6606 = vadd.xlane.f32.xlu0 %v6605_v9  ;;  %v8231_v26 = vpop.f32.mrf.mxu1 }
0x1281   :  { %v6595_v55 = vpop.f32.mrf.mxu0 }
0x1282   :  { %v6596_v6 = vadd.f32 %v7055_v4, %v6595_v55 }
0x1283   :  { %v8250_v11 = vpop.f32.mrf.mxu0 }
0x1284   :  { %v6602_v7 = vadd.f32 %v6596_v6, %v10625_v58 }
0x1285   :  { %v6598_v12 = vpop.f32.mrf.mxu0 }
0x1286   :  { %v6608_v2 = vsel %vm1046_vm0, %v6602_v7, 0.0 }
0x1287   :  { %6609 = vadd.xlane.f32.xlu1 %v6608_v2  ;;  %v8251_v23 = vpop.f32.mrf.mxu0 }
0x1300   :  { %v6607_v32 = vpop.xlane.xlu0 %6606 }
0x1301   :  { %v6611_v10 = vmul.f32 0.03125, %v6607_v32 }
0x1303   :  { %v6613_v35 = vsub.f32 %v6601_v43, %v6611_v10 }
0x1305   :  { %v6615_v46 = vmul.f32 %v6613_v35, %v6613_v35 }
0x1307   :  { %v6617_v53 = vsel %vm1046_vm0, %v6615_v46, 0.0 }
0x1308   :  { %6618 = vadd.xlane.f32.xlu0 %v6617_v53 }
0x1310   :  { %v6610_v36 = vpop.xlane.xlu1 %6609 }
0x1311   :  { %v6612_v50 = vmul.f32 0.03125, %v6610_v36 }
0x1313   :  { %v6614_v30 = vsub.f32 %v6602_v7, %v6612_v50 }
0x1315   :  { %v6616_v16 = vmul.f32 %v6614_v30, %v6614_v30 }
0x1317   :  { %v6620_v51 = vsel %vm1046_vm0, %v6616_v16, 0.0 }
0x1318   :  { %6621 = vadd.xlane.f32.xlu1 %v6620_v51 }
0x1391   :  { %v6619_v58 = vpop.xlane.xlu0 %6618 }
0x1392   :  { %v6623_v28 = vmul.f32 0.03125, %v6619_v58 }
0x1394   :  { %v6625_v54 = vadd.f32 1e-05, %v6623_v28 }
0x1396   :  { %8414 = vrsqrt.f32 %v6625_v54 }
0x13a1   :  { %v6622_v34 = vpop.xlane.xlu1 %6621 }
0x13a2   :  { %v6624_v44 = vmul.f32 0.03125, %v6622_v34 }
0x13a3   :  { %v8415_v45 = vpop.eup %8414 }
0x13a4   :  { %v6626_v56 = vadd.f32 1e-05, %v6624_v44  ;;  %v6629_v57 = vmul.f32 %v8415_v45, %v6613_v35 }
0x13a6   :  { %8416 = vrsqrt.f32 %v6626_v56  ;;  %v6637_v59 = vmul.f32 %v7064_v48, %v6629_v57 }
0x13a8   :  { %v6645_v38 = vadd.f32 %v7065_v31, %v6637_v59 }
0x13aa   :  { %6647 = vst.msk [vmem:[#allocation4] sm:$0xff] %vm1046_vm0, %v6645_v38 }
0x13b3   :  { %v8417_v41 = vpop.eup %8416 }
0x13b4   :  { %v6630_v62 = vmul.f32 %v8417_v41, %v6614_v30 }
0x13b6   :  { %v6638_v37 = vmul.f32 %v7064_v48, %v6630_v62 }
0x13b8   :  { %v6646_v21 = vadd.f32 %v7065_v31, %v6638_v37 }
0x13ba   :  { %6648 = vst.msk [vmem:[#allocation4 + $0x8] sm:$0xff] %vm1046_vm0, %v6646_v21 }
0x13bb   :  { %8441 = shalt.err (!%p8438_p9)
}
0x13bc   :  { %s8458_s17 = smov 128   ;;  %s8459_s12 = smov 8  }
0x13bd   :  { %6660 = dma.vmem_to_hbm [thread:$0]  %s6655_s24, 256, %s10734_s18, [#allocation5], %s8458_s17, %s8458_s17, %s8459_s12  }
0x13be   :  { %8452 = dma.done.wait [#allocation5], 256  }
0x13bf   :  { %8453 = vsyncadd [#allocation5], 4294967040 }
0x13c0   :  { %6664 = vsyncpa [#allocation5], 1 }

</bundles_post_ra>
